<compile_context>
chip_gen: v5e
topology: v5e:2x2
jax: 0.10.0
libtpu: 0.0.40
codegen_flags: <defaults>
</compile_context>

<pallas_src>
import functools
import math

import jax
import jax.numpy as jnp
from jax.experimental import pallas as pl
from jax.experimental.pallas import tpu as pltpu


def _dlpgnn_kernel(a_hbm_ref, h_ref,
                   tgw_ref, tga_ref, tgb_ref,
                   tbw_ref, tba_ref, tbb_ref, tbc_ref,
                   qla_ref, qlb_ref, qra_ref, qrb_ref,
                   f_ref,
                   primal_ref, dual_ref,
                   a_vmem, copy_sem,
                   *, K, NL, alpha):
    """Whole DLPGNN forward on one grid cell.

    a_hbm_ref : (M, N) ANY   adjacency A (copied once into a_vmem)
    h_ref     : (1, N) VMEM
    t**_ref   : (L1*K, 1) VMEM   per-coefficient theta columns (layer-major)
    q**_ref   : (Q, 1) VMEM      q_left / q_right taps (a, b)
    f_ref     : (1,) SMEM scalar f
    primal_ref: (1, N) VMEM out  pred_primal (lane-dense row)
    dual_ref  : (1, M) VMEM out  pred_dual   (lane-dense row)
    a_vmem    : (M, N) VMEM scratch (single-buffered copy of A)
    copy_sem  : DMA semaphore
    """
    # Single-buffered copy of the dominant operand (grid=(1,): no pipelining).
    cp = pltpu.make_async_copy(a_hbm_ref, a_vmem, copy_sem)
    cp.start()
    cp.wait()
    A = a_vmem[...]                                   # (M, N) f32
    M, N = A.shape
    f = f_ref[0]

    sigmoid = jax.nn.sigmoid
    dot32 = functools.partial(jnp.dot, preferred_element_type=jnp.float32)
    inv_alpha = 1.0 / float(alpha)
    neg_ln_alpha = -math.log(float(alpha))
    quarter = 0.25     # reference hard-codes `/ 4` in q_left / q_right

    # ---------------- prologue: 2 full reductions + 1 max-product pass ------
    row_sums_c = jnp.sum(A, axis=1, keepdims=True)    # (M, 1) == A @ 1_N
    col_sums_r = jnp.sum(A, axis=0, keepdims=True)    # (1, N) == A^T @ 1_M
    row_sums_r = jnp.transpose(row_sums_c)            # (1, M)

    # q_right / q_left: lane-dense (Q, M) / (Q, N) tiles, one sigmoid each.
    right_mask_r = quarter * jnp.sum(
        sigmoid(qra_ref[...] * row_sums_r + qrb_ref[...]),
        axis=0, keepdims=True)                                            # (1,M)
    right_mask_c = jnp.transpose(right_mask_r)                            # (M,1)
    case1_r = quarter * jnp.sum(
        sigmoid(qla_ref[...] * col_sums_r + qlb_ref[...]),
        axis=0, keepdims=True)                                            # (1,N)
    # case2 = max_product(A^T, right_mask)
    case2_r = jnp.max(A * right_mask_c, axis=0, keepdims=True)            # (1,N)
    left_mask_r = jnp.maximum(case1_r, case2_r)                           # (1,N)

    one_m_r_r = 1.0 - right_mask_r                                        # (1,M)
    one_m_r_c = 1.0 - right_mask_c                                        # (M,1)
    one_m_l_r = 1.0 - left_mask_r                                         # (1,N)

    # ---------------- state init (l = 0): lane-dense row vectors ------------
    r_r = f * jnp.ones((1, N), jnp.float32)
    b_r = jnp.ones((1, N), jnp.float32)
    x_r = jnp.zeros((1, N), jnp.float32)
    y_r = jnp.zeros((1, M), jnp.float32)

    for l in range(NL - 1):                           # statically unrolled (NL small)
        lo, hi = l * K, (l + 1) * K                   # sublane-aligned theta slice
        tg_w = tgw_ref[lo:hi, :]                      # (K, 1)
        tg_a = tga_ref[lo:hi, :]
        tg_b = tgb_ref[lo:hi, :]
        tb_w = tbw_ref[lo:hi, :]
        tb_a = tba_ref[lo:hi, :]
        tb_b = tbb_ref[lo:hi, :]
        tb_c = tbc_ref[lo:hi, :]

        # ro[l+1] = (A @ b[l]) * (1 - right_mask)                      -> MXU
        b_c = jnp.transpose(b_r)                                      # (N,1)
        ro_c = dot32(A, b_c) * one_m_r_c                              # (M,1)
        # ro_t[l+1] = max_product(A^T, ro) * (1 - left_mask)   (mask after max)
        ro_t_r = jnp.max(A * ro_c, axis=0, keepdims=True) * one_m_l_r  # (1,N)
        # ro_max[l+1] = max_product(A, ro_t) * (1 - right_mask)
        ro_max_c = jnp.max(A * ro_t_r, axis=1, keepdims=True) * one_m_r_c  # (M,1)

        g_in_c = ro_c - ro_max_c * inv_alpha                          # (M,1)
        ro_r = jnp.transpose(ro_c)                                    # (1,M)
        g_in_r = jnp.transpose(g_in_c)                                # (1,M)

        # y_delta = g_theta(ro - ro_max/alpha, l) * (1 - right_mask)
        # lane-dense (K, M) tile: graph dim on lanes, K on sublanes.
        sig_g = sigmoid(tg_a * g_in_r + tg_b)                         # (K,M)
        y_delta_r = (jnp.sum(tg_w * sig_g, axis=0, keepdims=True)
                     * one_m_r_r)                                     # (1,M)

        # y[l+1]
        y_r = (y_r + y_delta_r) * one_m_r_r

        # Fused A^T mat-vecs: [A^T @ y_delta ; A^T @ (y_delta / ro)] in one
        # (2, M) @ (M, N) matmul (exact division, no zero-guard -- as in the
        # reference).
        yd2 = jnp.concatenate(
            [y_delta_r, y_delta_r * (1.0 / ro_r)], axis=0)            # (2,M)
        atm = dot32(yd2, A)                                           # (2,N)
        aty_r = atm[0:1, :]                                           # (1,N)
        med2_r = atm[1:2, :]                                          # (1,N)

        # r[l+1] = (r[l] - relu(A^T @ y_delta)) * (1 - left_mask)
        r_r = (r_r - jnp.maximum(aty_r, 0.0)) * one_m_l_r
        # x[l+1] = (x[l] + b[l] * (A^T @ (y_delta / ro))) * (1 - left_mask)
        x_r = (x_r + b_r * med2_r) * one_m_l_r

        # b[l+1] = b_theta(r[l+1], l) * (1 - left_mask), lane-dense (K, N).
        sig_b = sigmoid(tb_a * r_r + tb_b)                            # (K,N)
        power = jnp.exp(jnp.maximum(tb_c * (r_r - f), 0.0) * neg_ln_alpha)
        b_r = (jnp.sum(tb_w * sig_b * power, axis=0, keepdims=True)
               * one_m_l_r)                                           # (1,N)

    # pred_primal = x[L-1]
    primal_ref[...] = x_r
    # pred_dual = y[L-1] + right_mask + A_bar @ (h * left_mask)
    #           = y + right_mask + A @ (h * left_mask / col_sums)
    # (A_bar never materialized; exact column reciprocal folded into hterm.)
    hterm_c = jnp.transpose(h_ref[...] * left_mask_r / col_sums_r)    # (N,1)
    dual_ref[...] = y_r + right_mask_r + jnp.transpose(dot32(A, hterm_c))


def dlpgnn_forward(A, h, theta_g, theta_b, theta_q_left, theta_q_right, f,
                   *, K=16, L_total=6, q_len=4, alpha=2):
    """Pallas-backed DLPGNN forward. A: (M, N) f32, h: (N,) f32."""
    M, N = A.shape
    A = A.astype(jnp.float32)
    h_row = jnp.asarray(h, jnp.float32).reshape(1, N)

    L1 = L_total - 1
    theta_g = jnp.asarray(theta_g, jnp.float32)       # (L1, K, 3)
    theta_b = jnp.asarray(theta_b, jnp.float32)       # (L1, K, 4)

    def cols(t):                                      # (L1, K) -> (L1*K, 1)
        return t.reshape(L1 * K, 1)

    tg_w = cols(theta_g[..., 0])
    tg_a = cols(theta_g[..., 1])
    tg_b = cols(theta_g[..., 2])
    tb_w = cols(theta_b[..., 0])
    tb_a = cols(theta_b[..., 1])
    tb_b = cols(theta_b[..., 2])
    tb_c = cols(theta_b[..., 3])

    tql = jnp.asarray(theta_q_left, jnp.float32)      # (Q, 2)
    tqr = jnp.asarray(theta_q_right, jnp.float32)     # (Q, 2)
    ql_a, ql_b = tql[:, 0:1], tql[:, 1:2]             # (Q, 1)
    qr_a, qr_b = tqr[:, 0:1], tqr[:, 1:2]
    f_arr = jnp.asarray([f], jnp.float32)

    kernel = functools.partial(_dlpgnn_kernel, K=K, NL=L_total, alpha=alpha)

    def full(shape):
        return pl.BlockSpec(shape, lambda i: (0,) * len(shape))

    # VMEM budget: A resident once (single-buffered) + ~2 full (M, N) broadcast
    # temporaries for the max-product passes + vectors + slack, capped by the
    # physical VMEM of the running chip (v7x has only 64 MiB per TensorCore).
    a_bytes = M * N * 4
    try:
        phys_vmem = pltpu.get_tpu_info().vmem_capacity_bytes
    except Exception:
        phys_vmem = 64 * 1024 * 1024
    vmem_limit = int(3.5 * a_bytes) + (2 << 20)
    vmem_limit = min(max(vmem_limit, 16 << 20), int(0.9 * phys_vmem))

    grid_spec = pltpu.PrefetchScalarGridSpec(
        num_scalar_prefetch=0,
        grid=(1,),
        in_specs=[
            pl.BlockSpec(memory_space=pl.ANY),                   # A (manual DMA)
            full((1, N)),                                        # h
            full((L1 * K, 1)),                                   # tg_w
            full((L1 * K, 1)),                                   # tg_a
            full((L1 * K, 1)),                                   # tg_b
            full((L1 * K, 1)),                                   # tb_w
            full((L1 * K, 1)),                                   # tb_a
            full((L1 * K, 1)),                                   # tb_b
            full((L1 * K, 1)),                                   # tb_c
            full((q_len, 1)),                                    # ql_a
            full((q_len, 1)),                                    # ql_b
            full((q_len, 1)),                                    # qr_a
            full((q_len, 1)),                                    # qr_b
            pl.BlockSpec(memory_space=pltpu.MemorySpace.SMEM),   # f
        ],
        out_specs=[
            full((1, N)),                                        # pred_primal
            full((1, M)),                                        # pred_dual
        ],
        scratch_shapes=[
            pltpu.VMEM((M, N), jnp.float32),                     # single copy of A
            pltpu.SemaphoreType.DMA,
        ],
    )

    primal, dual = pl.pallas_call(
        kernel,
        grid_spec=grid_spec,
        out_shape=(
            jax.ShapeDtypeStruct((1, N), jnp.float32),
            jax.ShapeDtypeStruct((1, M), jnp.float32),
        ),
        compiler_params=pltpu.CompilerParams(
            dimension_semantics=("arbitrary",),
            vmem_limit_bytes=vmem_limit),
    )(A, h_row, tg_w, tg_a, tg_b, tb_w, tb_a, tb_b, tb_c,
      ql_a, ql_b, qr_a, qr_b, f_arr)

    return primal.reshape(N), dual.reshape(M)


def _dlpgnn_reference(A, h, theta_g, theta_b, theta_q_left, theta_q_right, f,
                      *, L_total, alpha):
    """Pure-JAX (XLA) reference mirroring the PyTorch module's forward."""
    hp = jax.lax.Precision.HIGHEST
    A = A.astype(jnp.float32)
    M, N = A.shape
    row_sums = A.sum(axis=1)
    col_sums = A.sum(axis=0)

    def q(x, tq):
        return jnp.sum(jax.nn.sigmoid(tq[:, 0][:, None] * x[None, :]
                                      + tq[:, 1][:, None]), axis=0) / 4.0

    right_mask = q(row_sums, theta_q_right)                       # (M,)
    case1 = q(col_sums, theta_q_left)                             # (N,)
    case2 = jnp.max(A * right_mask[:, None], axis=0)              # (N,)
    left_mask = jnp.maximum(case1, case2)

    r = f * jnp.ones((N,), jnp.float32)
    b = jnp.ones((N,), jnp.float32)
    x = jnp.zeros((N,), jnp.float32)
    y = jnp.zeros((M,), jnp.float32)
    for l in range(L_total - 1):
        ro = jnp.dot(A, b, precision=hp) * (1.0 - right_mask)
        ro_t = jnp.max(A * ro[:, None], axis=0) * (1.0 - left_mask)
        ro_max = jnp.max(A * ro_t[None, :], axis=1) * (1.0 - right_mask)
        g_in = ro - ro_max / alpha
        gw, ga, gb = theta_g[l, :, 0], theta_g[l, :, 1], theta_g[l, :, 2]
        y_delta = jnp.sum(
            gw[:, None] * jax.nn.sigmoid(ga[:, None] * g_in[None, :] + gb[:, None]),
            axis=0) * (1.0 - right_mask)
        y = (y + y_delta) * (1.0 - right_mask)
        r = (r - jnp.maximum(jnp.dot(A.T, y_delta, precision=hp), 0.0)) \
            * (1.0 - left_mask)
        med2 = jnp.dot(A.T, y_delta * (1.0 / ro), precision=hp)
        x = (x + b * med2) * (1.0 - left_mask)
        bw, ba, bb, bc = (theta_b[l, :, 0], theta_b[l, :, 1],
                          theta_b[l, :, 2], theta_b[l, :, 3])
        power = jnp.power(jnp.float32(alpha),
                          -jnp.maximum(bc[:, None] * (r[None, :] - f), 0.0))
        b = jnp.sum(
            bw[:, None] * jax.nn.sigmoid(ba[:, None] * r[None, :] + bb[:, None])
            * power, axis=0) * (1.0 - left_mask)
    primal = x
    dual = y + right_mask + jnp.dot(A / col_sums[None, :], h * left_mask,
                                    precision=hp)
    return primal, dual


if __name__ == "__main__":
    # Hyperparameters (module defaults: K=16, L=5 -> self.L=6, alpha=2, q_len=4)
    K = 16
    L_total = 6
    alpha = 2
    q_len = 4

    # Small deterministic problem: bipartite graph with M=64 rows, N=128 cols.
    M, N = 64, 128
    key = jax.random.PRNGKey(0)
    k_a, k_tg, k_tb, k_ql, k_qr = jax.random.split(key, 5)

    # Positive adjacency in [0.1, 1.0) keeps column sums / ro away from zero.
    A = jax.random.uniform(k_a, (M, N), dtype=jnp.float32) * 0.9 + 0.1

    theta_g = jax.random.normal(k_tg, (L_total - 1, K, 3), dtype=jnp.float32)
    theta_b = jax.random.normal(k_tb, (L_total - 1, K, 4), dtype=jnp.float32)
    # Demo-input conditioning only (semantics unchanged): positive b_theta
    # mixture weights / non-negative decay slopes and small q-tap slopes keep
    # the reference model's unguarded 1/ro term finite and well scaled.
    theta_b = theta_b.at[..., 0].set(jnp.abs(theta_b[..., 0]))
    theta_b = theta_b.at[..., 3].set(jnp.abs(theta_b[..., 3]))
    q_scale = jnp.asarray([0.02, 1.0], jnp.float32)
    theta_q_left = jax.random.normal(k_ql, (q_len, 2), dtype=jnp.float32) * q_scale
    theta_q_right = jax.random.normal(k_qr, (q_len, 2), dtype=jnp.float32) * q_scale
    f = 100.0
    h = jnp.ones((N,), jnp.float32)

    pred_primal, pred_dual = dlpgnn_forward(
        A, h, theta_g, theta_b, theta_q_left, theta_q_right, f,
        K=K, L_total=L_total, q_len=q_len, alpha=alpha)
    jax.block_until_ready((pred_primal, pred_dual))
    assert pred_primal.shape == (N,) and pred_dual.shape == (M,)

    ref_primal, ref_dual = _dlpgnn_reference(
        A, h, theta_g, theta_b, theta_q_left, theta_q_right, f,
        L_total=L_total, alpha=alpha)
    assert jnp.allclose(pred_primal, ref_primal, rtol=5e-2, atol=5e-2), \
        "pred_primal mismatch vs reference"
    assert jnp.allclose(pred_dual, ref_dual, rtol=5e-2, atol=5e-2), \
        "pred_dual mismatch vs reference"
    print("KERNEL_OK")
</pallas_src>

<mosaic_0001>
module attributes {stable_mosaic.version = 11 : i64} {
  func.func @_dlpgnn_kernel(%arg0: i32, %arg1: memref<64x128xf32, #tpu.memory_space<any>>, %arg2: memref<1x128xf32, #tpu.memory_space<vmem>>, %arg3: memref<80x1xf32, #tpu.memory_space<vmem>>, %arg4: memref<80x1xf32, #tpu.memory_space<vmem>>, %arg5: memref<80x1xf32, #tpu.memory_space<vmem>>, %arg6: memref<80x1xf32, #tpu.memory_space<vmem>>, %arg7: memref<80x1xf32, #tpu.memory_space<vmem>>, %arg8: memref<80x1xf32, #tpu.memory_space<vmem>>, %arg9: memref<80x1xf32, #tpu.memory_space<vmem>>, %arg10: memref<4x1xf32, #tpu.memory_space<vmem>>, %arg11: memref<4x1xf32, #tpu.memory_space<vmem>>, %arg12: memref<4x1xf32, #tpu.memory_space<vmem>>, %arg13: memref<4x1xf32, #tpu.memory_space<vmem>>, %arg14: memref<1xf32, #tpu.memory_space<smem>>, %arg15: memref<1x128xf32, #tpu.memory_space<vmem>>, %arg16: memref<1x64xf32, #tpu.memory_space<vmem>>, %arg17: memref<64x128xf32, #tpu.memory_space<vmem>>, %arg18: memref<!tpu.dma_semaphore, #tpu.memory_space<semaphore_mem>>) attributes {dimension_semantics = [#tpu.dimension_semantics<arbitrary>], iteration_bounds = array<i64: 1>, scalar_prefetch = 0 : i64, scratch_operands = 2 : i64, tpu.core_type = #tpu.core_type<tc>, window_params = [{}, {pipeline_mode = #tpu.pipeline_mode<synchronous>, transform_indices = @transform_1, window_bounds = array<i64: 1, 128>}, {pipeline_mode = #tpu.pipeline_mode<synchronous>, transform_indices = @transform_2, window_bounds = array<i64: 80, 1>}, {pipeline_mode = #tpu.pipeline_mode<synchronous>, transform_indices = @transform_3, window_bounds = array<i64: 80, 1>}, {pipeline_mode = #tpu.pipeline_mode<synchronous>, transform_indices = @transform_4, window_bounds = array<i64: 80, 1>}, {pipeline_mode = #tpu.pipeline_mode<synchronous>, transform_indices = @transform_5, window_bounds = array<i64: 80, 1>}, {pipeline_mode = #tpu.pipeline_mode<synchronous>, transform_indices = @transform_6, window_bounds = array<i64: 80, 1>}, {pipeline_mode = #tpu.pipeline_mode<synchronous>, transform_indices = @transform_7, window_bounds = array<i64: 80, 1>}, {pipeline_mode = #tpu.pipeline_mode<synchronous>, transform_indices = @transform_8, window_bounds = array<i64: 80, 1>}, {pipeline_mode = #tpu.pipeline_mode<synchronous>, transform_indices = @transform_9, window_bounds = array<i64: 4, 1>}, {pipeline_mode = #tpu.pipeline_mode<synchronous>, transform_indices = @transform_10, window_bounds = array<i64: 4, 1>}, {pipeline_mode = #tpu.pipeline_mode<synchronous>, transform_indices = @transform_11, window_bounds = array<i64: 4, 1>}, {pipeline_mode = #tpu.pipeline_mode<synchronous>, transform_indices = @transform_12, window_bounds = array<i64: 4, 1>}, {transform_indices = @transform_13, window_bounds = array<i64: 1>}, {pipeline_mode = #tpu.pipeline_mode<synchronous>, transform_indices = @transform_14, window_bounds = array<i64: 1, 128>}, {pipeline_mode = #tpu.pipeline_mode<synchronous>, transform_indices = @transform_15, window_bounds = array<i64: 1, 64>}]} {
    tpu.enqueue_dma source(%arg1 : memref<64x128xf32, #tpu.memory_space<any>>) target(%arg17 : memref<64x128xf32, #tpu.memory_space<vmem>>) target_semaphore(%arg18 : memref<!tpu.dma_semaphore, #tpu.memory_space<semaphore_mem>>)
    tpu.wait_dma2 semaphore(%arg18 : memref<!tpu.dma_semaphore, #tpu.memory_space<semaphore_mem>>) src(%arg1 : memref<64x128xf32, #tpu.memory_space<any>>) dst(%arg17 : memref<64x128xf32, #tpu.memory_space<vmem>>)
    %c0 = arith.constant 0 : index
    %c0_0 = arith.constant 0 : index
    %0 = vector.load %arg17[%c0, %c0_0] : memref<64x128xf32, #tpu.memory_space<vmem>>, vector<64x128xf32>
    %c0_1 = arith.constant 0 : index
    %1 = memref.load %arg14[%c0_1] : memref<1xf32, #tpu.memory_space<smem>>
    %cst = arith.constant dense<0.000000e+00> : vector<64xf32>
    %2 = vector.multi_reduction <add>, %0, %cst [1] : vector<64x128xf32> to vector<64xf32>
    %3 = vector.shape_cast %2 : vector<64xf32> to vector<64x1xf32>
    %cst_2 = arith.constant dense<0.000000e+00> : vector<128xf32>
    %4 = vector.multi_reduction <add>, %0, %cst_2 [0] : vector<64x128xf32> to vector<128xf32>
    %5 = vector.shape_cast %4 : vector<128xf32> to vector<1x128xf32>
    %6 = tpu.transpose %3, [1, 0] : vector<64x1xf32> -> vector<1x64xf32>
    %c0_3 = arith.constant 0 : index
    %c0_4 = arith.constant 0 : index
    %7 = vector.load %arg12[%c0_3, %c0_4] : memref<4x1xf32, #tpu.memory_space<vmem>>, vector<4x1xf32>
    %8 = vector.broadcast %7 : vector<4x1xf32> to vector<4x64xf32>
    %9 = vector.broadcast %6 : vector<1x64xf32> to vector<4x64xf32>
    %10 = arith.mulf %8, %9 : vector<4x64xf32>
    %c0_5 = arith.constant 0 : index
    %c0_6 = arith.constant 0 : index
    %11 = vector.load %arg13[%c0_5, %c0_6] : memref<4x1xf32, #tpu.memory_space<vmem>>, vector<4x1xf32>
    %12 = vector.broadcast %11 : vector<4x1xf32> to vector<4x64xf32>
    %13 = arith.addf %10, %12 : vector<4x64xf32>
    %14 = arith.negf %13 : vector<4x64xf32>
    %15 = math.exp %14 : vector<4x64xf32>
    %cst_7 = arith.constant 1.000000e+00 : f32
    %16 = vector.broadcast %cst_7 : f32 to vector<4x64xf32>
    %17 = arith.addf %16, %15 : vector<4x64xf32>
    %18 = arith.divf %16, %17 : vector<4x64xf32>
    %cst_8 = arith.constant dense<0.000000e+00> : vector<64xf32>
    %19 = vector.multi_reduction <add>, %18, %cst_8 [0] : vector<4x64xf32> to vector<64xf32>
    %20 = vector.shape_cast %19 : vector<64xf32> to vector<1x64xf32>
    %cst_9 = arith.constant 2.500000e-01 : f32
    %21 = vector.broadcast %cst_9 : f32 to vector<1x64xf32>
    %22 = arith.mulf %21, %20 : vector<1x64xf32>
    %23 = tpu.transpose %22, [1, 0] : vector<1x64xf32> -> vector<64x1xf32>
    %c0_10 = arith.constant 0 : index
    %c0_11 = arith.constant 0 : index
    %24 = vector.load %arg10[%c0_10, %c0_11] : memref<4x1xf32, #tpu.memory_space<vmem>>, vector<4x1xf32>
    %25 = vector.broadcast %24 : vector<4x1xf32> to vector<4x128xf32>
    %26 = vector.broadcast %5 : vector<1x128xf32> to vector<4x128xf32>
    %27 = arith.mulf %25, %26 : vector<4x128xf32>
    %c0_12 = arith.constant 0 : index
    %c0_13 = arith.constant 0 : index
    %28 = vector.load %arg11[%c0_12, %c0_13] : memref<4x1xf32, #tpu.memory_space<vmem>>, vector<4x1xf32>
    %29 = vector.broadcast %28 : vector<4x1xf32> to vector<4x128xf32>
    %30 = arith.addf %27, %29 : vector<4x128xf32>
    %31 = arith.negf %30 : vector<4x128xf32>
    %32 = math.exp %31 : vector<4x128xf32>
    %cst_14 = arith.constant 1.000000e+00 : f32
    %33 = vector.broadcast %cst_14 : f32 to vector<4x128xf32>
    %34 = arith.addf %33, %32 : vector<4x128xf32>
    %35 = arith.divf %33, %34 : vector<4x128xf32>
    %cst_15 = arith.constant dense<0.000000e+00> : vector<128xf32>
    %36 = vector.multi_reduction <add>, %35, %cst_15 [0] : vector<4x128xf32> to vector<128xf32>
    %37 = vector.shape_cast %36 : vector<128xf32> to vector<1x128xf32>
    %cst_16 = arith.constant 2.500000e-01 : f32
    %38 = vector.broadcast %cst_16 : f32 to vector<1x128xf32>
    %39 = arith.mulf %38, %37 : vector<1x128xf32>
    %40 = vector.broadcast %23 : vector<64x1xf32> to vector<64x128xf32>
    %41 = arith.mulf %0, %40 : vector<64x128xf32>
    %cst_17 = arith.constant dense<0xFF800000> : vector<128xf32>
    %42 = vector.multi_reduction <maximumf>, %41, %cst_17 [0] : vector<64x128xf32> to vector<128xf32>
    %43 = vector.shape_cast %42 : vector<128xf32> to vector<1x128xf32>
    %44 = arith.maximumf %39, %43 : vector<1x128xf32>
    %cst_18 = arith.constant 1.000000e+00 : f32
    %45 = vector.broadcast %cst_18 : f32 to vector<1x64xf32>
    %46 = arith.subf %45, %22 : vector<1x64xf32>
    %cst_19 = arith.constant 1.000000e+00 : f32
    %47 = vector.broadcast %cst_19 : f32 to vector<64x1xf32>
    %48 = arith.subf %47, %23 : vector<64x1xf32>
    %cst_20 = arith.constant 1.000000e+00 : f32
    %49 = vector.broadcast %cst_20 : f32 to vector<1x128xf32>
    %50 = arith.subf %49, %44 : vector<1x128xf32>
    %cst_21 = arith.constant 1.000000e+00 : f32
    %51 = vector.broadcast %cst_21 : f32 to vector<1x128xf32>
    %52 = vector.broadcast %1 : f32 to vector<1x128xf32>
    %53 = arith.mulf %52, %51 : vector<1x128xf32>
    %cst_22 = arith.constant 1.000000e+00 : f32
    %54 = vector.broadcast %cst_22 : f32 to vector<1x128xf32>
    %cst_23 = arith.constant 0.000000e+00 : f32
    %55 = vector.broadcast %cst_23 : f32 to vector<1x128xf32>
    %cst_24 = arith.constant 0.000000e+00 : f32
    %56 = vector.broadcast %cst_24 : f32 to vector<1x64xf32>
    %c0_25 = arith.constant 0 : index
    %c0_26 = arith.constant 0 : index
    %57 = vector.load %arg3[%c0_25, %c0_26] : memref<80x1xf32, #tpu.memory_space<vmem>>, vector<16x1xf32>
    %c0_27 = arith.constant 0 : index
    %c0_28 = arith.constant 0 : index
    %58 = vector.load %arg4[%c0_27, %c0_28] : memref<80x1xf32, #tpu.memory_space<vmem>>, vector<16x1xf32>
    %c0_29 = arith.constant 0 : index
    %c0_30 = arith.constant 0 : index
    %59 = vector.load %arg5[%c0_29, %c0_30] : memref<80x1xf32, #tpu.memory_space<vmem>>, vector<16x1xf32>
    %c0_31 = arith.constant 0 : index
    %c0_32 = arith.constant 0 : index
    %60 = vector.load %arg6[%c0_31, %c0_32] : memref<80x1xf32, #tpu.memory_space<vmem>>, vector<16x1xf32>
    %c0_33 = arith.constant 0 : index
    %c0_34 = arith.constant 0 : index
    %61 = vector.load %arg7[%c0_33, %c0_34] : memref<80x1xf32, #tpu.memory_space<vmem>>, vector<16x1xf32>
    %c0_35 = arith.constant 0 : index
    %c0_36 = arith.constant 0 : index
    %62 = vector.load %arg8[%c0_35, %c0_36] : memref<80x1xf32, #tpu.memory_space<vmem>>, vector<16x1xf32>
    %c0_37 = arith.constant 0 : index
    %c0_38 = arith.constant 0 : index
    %63 = vector.load %arg9[%c0_37, %c0_38] : memref<80x1xf32, #tpu.memory_space<vmem>>, vector<16x1xf32>
    %64 = tpu.transpose %54, [1, 0] : vector<1x128xf32> -> vector<128x1xf32>
    %cst_39 = arith.constant dense<0.000000e+00> : vector<64x1xf32>
    %65 = tpu.matmul %0, %64, %cst_39 {dimension_numbers = #tpu.dot_dimension_numbers<[1], [0], [0], [1], [0, 0, 1, 1], [], []>} : vector<64x128xf32>, vector<128x1xf32>, vector<64x1xf32> -> vector<64x1xf32>
    %66 = arith.mulf %65, %48 : vector<64x1xf32>
    %67 = vector.broadcast %66 : vector<64x1xf32> to vector<64x128xf32>
    %68 = arith.mulf %0, %67 : vector<64x128xf32>
    %cst_40 = arith.constant dense<0xFF800000> : vector<128xf32>
    %69 = vector.multi_reduction <maximumf>, %68, %cst_40 [0] : vector<64x128xf32> to vector<128xf32>
    %70 = vector.shape_cast %69 : vector<128xf32> to vector<1x128xf32>
    %71 = arith.mulf %70, %50 : vector<1x128xf32>
    %72 = vector.broadcast %71 : vector<1x128xf32> to vector<64x128xf32>
    %73 = arith.mulf %0, %72 : vector<64x128xf32>
    %cst_41 = arith.constant dense<0xFF800000> : vector<64xf32>
    %74 = vector.multi_reduction <maximumf>, %73, %cst_41 [1] : vector<64x128xf32> to vector<64xf32>
    %75 = vector.shape_cast %74 : vector<64xf32> to vector<64x1xf32>
    %76 = arith.mulf %75, %48 : vector<64x1xf32>
    %cst_42 = arith.constant 5.000000e-01 : f32
    %77 = vector.broadcast %cst_42 : f32 to vector<64x1xf32>
    %78 = arith.mulf %76, %77 : vector<64x1xf32>
    %79 = arith.subf %66, %78 : vector<64x1xf32>
    %80 = tpu.transpose %66, [1, 0] : vector<64x1xf32> -> vector<1x64xf32>
    %81 = tpu.transpose %79, [1, 0] : vector<64x1xf32> -> vector<1x64xf32>
    %82 = vector.broadcast %58 : vector<16x1xf32> to vector<16x64xf32>
    %83 = vector.broadcast %81 : vector<1x64xf32> to vector<16x64xf32>
    %84 = arith.mulf %82, %83 : vector<16x64xf32>
    %85 = vector.broadcast %59 : vector<16x1xf32> to vector<16x64xf32>
    %86 = arith.addf %84, %85 : vector<16x64xf32>
    %87 = arith.negf %86 : vector<16x64xf32>
    %88 = math.exp %87 : vector<16x64xf32>
    %cst_43 = arith.constant 1.000000e+00 : f32
    %89 = vector.broadcast %cst_43 : f32 to vector<16x64xf32>
    %90 = arith.addf %89, %88 : vector<16x64xf32>
    %91 = arith.divf %89, %90 : vector<16x64xf32>
    %92 = vector.broadcast %57 : vector<16x1xf32> to vector<16x64xf32>
    %93 = arith.mulf %92, %91 : vector<16x64xf32>
    %cst_44 = arith.constant dense<0.000000e+00> : vector<64xf32>
    %94 = vector.multi_reduction <add>, %93, %cst_44 [0] : vector<16x64xf32> to vector<64xf32>
    %95 = vector.shape_cast %94 : vector<64xf32> to vector<1x64xf32>
    %96 = arith.mulf %95, %46 : vector<1x64xf32>
    %97 = arith.addf %56, %96 : vector<1x64xf32>
    %98 = arith.mulf %97, %46 : vector<1x64xf32>
    %cst_45 = arith.constant 1.000000e+00 : f32
    %99 = vector.broadcast %cst_45 : f32 to vector<1x64xf32>
    %100 = arith.divf %99, %80 : vector<1x64xf32>
    %101 = arith.mulf %96, %100 : vector<1x64xf32>
    %102 = tpu.concatenate %96, %101 in 0 : vector<1x64xf32>, vector<1x64xf32> -> vector<2x64xf32>
    %cst_46 = arith.constant dense<0.000000e+00> : vector<2x128xf32>
    %103 = tpu.matmul %102, %0, %cst_46 {dimension_numbers = #tpu.dot_dimension_numbers<[1], [0], [0], [1], [0, 0, 1, 1], [], []>} : vector<2x64xf32>, vector<64x128xf32>, vector<2x128xf32> -> vector<2x128xf32>
    %104 = vector.extract_strided_slice %103 {offsets = [0, 0], sizes = [1, 128], strides = [1, 1]} : vector<2x128xf32> to vector<1x128xf32>
    %105 = vector.extract_strided_slice %103 {offsets = [1, 0], sizes = [1, 128], strides = [1, 1]} : vector<2x128xf32> to vector<1x128xf32>
    %cst_47 = arith.constant 0.000000e+00 : f32
    %106 = vector.broadcast %cst_47 : f32 to vector<1x128xf32>
    %107 = arith.maximumf %104, %106 : vector<1x128xf32>
    %108 = arith.subf %53, %107 : vector<1x128xf32>
    %109 = arith.mulf %108, %50 : vector<1x128xf32>
    %110 = arith.mulf %54, %105 : vector<1x128xf32>
    %111 = arith.addf %55, %110 : vector<1x128xf32>
    %112 = arith.mulf %111, %50 : vector<1x128xf32>
    %113 = vector.broadcast %61 : vector<16x1xf32> to vector<16x128xf32>
    %114 = vector.broadcast %109 : vector<1x128xf32> to vector<16x128xf32>
    %115 = arith.mulf %113, %114 : vector<16x128xf32>
    %116 = vector.broadcast %62 : vector<16x1xf32> to vector<16x128xf32>
    %117 = arith.addf %115, %116 : vector<16x128xf32>
    %118 = arith.negf %117 : vector<16x128xf32>
    %119 = math.exp %118 : vector<16x128xf32>
    %cst_48 = arith.constant 1.000000e+00 : f32
    %120 = vector.broadcast %cst_48 : f32 to vector<16x128xf32>
    %121 = arith.addf %120, %119 : vector<16x128xf32>
    %122 = arith.divf %120, %121 : vector<16x128xf32>
    %123 = vector.broadcast %1 : f32 to vector<1x128xf32>
    %124 = arith.subf %109, %123 : vector<1x128xf32>
    %125 = vector.broadcast %63 : vector<16x1xf32> to vector<16x128xf32>
    %126 = vector.broadcast %124 : vector<1x128xf32> to vector<16x128xf32>
    %127 = arith.mulf %125, %126 : vector<16x128xf32>
    %cst_49 = arith.constant 0.000000e+00 : f32
    %128 = vector.broadcast %cst_49 : f32 to vector<16x128xf32>
    %129 = arith.maximumf %127, %128 : vector<16x128xf32>
    %cst_50 = arith.constant -0.693147182 : f32
    %130 = vector.broadcast %cst_50 : f32 to vector<16x128xf32>
    %131 = arith.mulf %129, %130 : vector<16x128xf32>
    %132 = math.exp %131 : vector<16x128xf32>
    %133 = vector.broadcast %60 : vector<16x1xf32> to vector<16x128xf32>
    %134 = arith.mulf %133, %122 : vector<16x128xf32>
    %135 = arith.mulf %134, %132 : vector<16x128xf32>
    %cst_51 = arith.constant dense<0.000000e+00> : vector<128xf32>
    %136 = vector.multi_reduction <add>, %135, %cst_51 [0] : vector<16x128xf32> to vector<128xf32>
    %137 = vector.shape_cast %136 : vector<128xf32> to vector<1x128xf32>
    %138 = arith.mulf %137, %50 : vector<1x128xf32>
    %c16 = arith.constant 16 : index
    %c0_52 = arith.constant 0 : index
    %139 = vector.load %arg3[%c16, %c0_52] : memref<80x1xf32, #tpu.memory_space<vmem>>, vector<16x1xf32>
    %c16_53 = arith.constant 16 : index
    %c0_54 = arith.constant 0 : index
    %140 = vector.load %arg4[%c16_53, %c0_54] : memref<80x1xf32, #tpu.memory_space<vmem>>, vector<16x1xf32>
    %c16_55 = arith.constant 16 : index
    %c0_56 = arith.constant 0 : index
    %141 = vector.load %arg5[%c16_55, %c0_56] : memref<80x1xf32, #tpu.memory_space<vmem>>, vector<16x1xf32>
    %c16_57 = arith.constant 16 : index
    %c0_58 = arith.constant 0 : index
    %142 = vector.load %arg6[%c16_57, %c0_58] : memref<80x1xf32, #tpu.memory_space<vmem>>, vector<16x1xf32>
    %c16_59 = arith.constant 16 : index
    %c0_60 = arith.constant 0 : index
    %143 = vector.load %arg7[%c16_59, %c0_60] : memref<80x1xf32, #tpu.memory_space<vmem>>, vector<16x1xf32>
    %c16_61 = arith.constant 16 : index
    %c0_62 = arith.constant 0 : index
    %144 = vector.load %arg8[%c16_61, %c0_62] : memref<80x1xf32, #tpu.memory_space<vmem>>, vector<16x1xf32>
    %c16_63 = arith.constant 16 : index
    %c0_64 = arith.constant 0 : index
    %145 = vector.load %arg9[%c16_63, %c0_64] : memref<80x1xf32, #tpu.memory_space<vmem>>, vector<16x1xf32>
    %146 = tpu.transpose %138, [1, 0] : vector<1x128xf32> -> vector<128x1xf32>
    %cst_65 = arith.constant dense<0.000000e+00> : vector<64x1xf32>
    %147 = tpu.matmul %0, %146, %cst_65 {dimension_numbers = #tpu.dot_dimension_numbers<[1], [0], [0], [1], [0, 0, 1, 1], [], []>} : vector<64x128xf32>, vector<128x1xf32>, vector<64x1xf32> -> vector<64x1xf32>
    %148 = arith.mulf %147, %48 : vector<64x1xf32>
    %149 = vector.broadcast %148 : vector<64x1xf32> to vector<64x128xf32>
    %150 = arith.mulf %0, %149 : vector<64x128xf32>
    %cst_66 = arith.constant dense<0xFF800000> : vector<128xf32>
    %151 = vector.multi_reduction <maximumf>, %150, %cst_66 [0] : vector<64x128xf32> to vector<128xf32>
    %152 = vector.shape_cast %151 : vector<128xf32> to vector<1x128xf32>
    %153 = arith.mulf %152, %50 : vector<1x128xf32>
    %154 = vector.broadcast %153 : vector<1x128xf32> to vector<64x128xf32>
    %155 = arith.mulf %0, %154 : vector<64x128xf32>
    %cst_67 = arith.constant dense<0xFF800000> : vector<64xf32>
    %156 = vector.multi_reduction <maximumf>, %155, %cst_67 [1] : vector<64x128xf32> to vector<64xf32>
    %157 = vector.shape_cast %156 : vector<64xf32> to vector<64x1xf32>
    %158 = arith.mulf %157, %48 : vector<64x1xf32>
    %cst_68 = arith.constant 5.000000e-01 : f32
    %159 = vector.broadcast %cst_68 : f32 to vector<64x1xf32>
    %160 = arith.mulf %158, %159 : vector<64x1xf32>
    %161 = arith.subf %148, %160 : vector<64x1xf32>
    %162 = tpu.transpose %148, [1, 0] : vector<64x1xf32> -> vector<1x64xf32>
    %163 = tpu.transpose %161, [1, 0] : vector<64x1xf32> -> vector<1x64xf32>
    %164 = vector.broadcast %140 : vector<16x1xf32> to vector<16x64xf32>
    %165 = vector.broadcast %163 : vector<1x64xf32> to vector<16x64xf32>
    %166 = arith.mulf %164, %165 : vector<16x64xf32>
    %167 = vector.broadcast %141 : vector<16x1xf32> to vector<16x64xf32>
    %168 = arith.addf %166, %167 : vector<16x64xf32>
    %169 = arith.negf %168 : vector<16x64xf32>
    %170 = math.exp %169 : vector<16x64xf32>
    %cst_69 = arith.constant 1.000000e+00 : f32
    %171 = vector.broadcast %cst_69 : f32 to vector<16x64xf32>
    %172 = arith.addf %171, %170 : vector<16x64xf32>
    %173 = arith.divf %171, %172 : vector<16x64xf32>
    %174 = vector.broadcast %139 : vector<16x1xf32> to vector<16x64xf32>
    %175 = arith.mulf %174, %173 : vector<16x64xf32>
    %cst_70 = arith.constant dense<0.000000e+00> : vector<64xf32>
    %176 = vector.multi_reduction <add>, %175, %cst_70 [0] : vector<16x64xf32> to vector<64xf32>
    %177 = vector.shape_cast %176 : vector<64xf32> to vector<1x64xf32>
    %178 = arith.mulf %177, %46 : vector<1x64xf32>
    %179 = arith.addf %98, %178 : vector<1x64xf32>
    %180 = arith.mulf %179, %46 : vector<1x64xf32>
    %cst_71 = arith.constant 1.000000e+00 : f32
    %181 = vector.broadcast %cst_71 : f32 to vector<1x64xf32>
    %182 = arith.divf %181, %162 : vector<1x64xf32>
    %183 = arith.mulf %178, %182 : vector<1x64xf32>
    %184 = tpu.concatenate %178, %183 in 0 : vector<1x64xf32>, vector<1x64xf32> -> vector<2x64xf32>
    %cst_72 = arith.constant dense<0.000000e+00> : vector<2x128xf32>
    %185 = tpu.matmul %184, %0, %cst_72 {dimension_numbers = #tpu.dot_dimension_numbers<[1], [0], [0], [1], [0, 0, 1, 1], [], []>} : vector<2x64xf32>, vector<64x128xf32>, vector<2x128xf32> -> vector<2x128xf32>
    %186 = vector.extract_strided_slice %185 {offsets = [0, 0], sizes = [1, 128], strides = [1, 1]} : vector<2x128xf32> to vector<1x128xf32>
    %187 = vector.extract_strided_slice %185 {offsets = [1, 0], sizes = [1, 128], strides = [1, 1]} : vector<2x128xf32> to vector<1x128xf32>
    %cst_73 = arith.constant 0.000000e+00 : f32
    %188 = vector.broadcast %cst_73 : f32 to vector<1x128xf32>
    %189 = arith.maximumf %186, %188 : vector<1x128xf32>
    %190 = arith.subf %109, %189 : vector<1x128xf32>
    %191 = arith.mulf %190, %50 : vector<1x128xf32>
    %192 = arith.mulf %138, %187 : vector<1x128xf32>
    %193 = arith.addf %112, %192 : vector<1x128xf32>
    %194 = arith.mulf %193, %50 : vector<1x128xf32>
    %195 = vector.broadcast %143 : vector<16x1xf32> to vector<16x128xf32>
    %196 = vector.broadcast %191 : vector<1x128xf32> to vector<16x128xf32>
    %197 = arith.mulf %195, %196 : vector<16x128xf32>
    %198 = vector.broadcast %144 : vector<16x1xf32> to vector<16x128xf32>
    %199 = arith.addf %197, %198 : vector<16x128xf32>
    %200 = arith.negf %199 : vector<16x128xf32>
    %201 = math.exp %200 : vector<16x128xf32>
    %cst_74 = arith.constant 1.000000e+00 : f32
    %202 = vector.broadcast %cst_74 : f32 to vector<16x128xf32>
    %203 = arith.addf %202, %201 : vector<16x128xf32>
    %204 = arith.divf %202, %203 : vector<16x128xf32>
    %205 = vector.broadcast %1 : f32 to vector<1x128xf32>
    %206 = arith.subf %191, %205 : vector<1x128xf32>
    %207 = vector.broadcast %145 : vector<16x1xf32> to vector<16x128xf32>
    %208 = vector.broadcast %206 : vector<1x128xf32> to vector<16x128xf32>
    %209 = arith.mulf %207, %208 : vector<16x128xf32>
    %cst_75 = arith.constant 0.000000e+00 : f32
    %210 = vector.broadcast %cst_75 : f32 to vector<16x128xf32>
    %211 = arith.maximumf %209, %210 : vector<16x128xf32>
    %cst_76 = arith.constant -0.693147182 : f32
    %212 = vector.broadcast %cst_76 : f32 to vector<16x128xf32>
    %213 = arith.mulf %211, %212 : vector<16x128xf32>
    %214 = math.exp %213 : vector<16x128xf32>
    %215 = vector.broadcast %142 : vector<16x1xf32> to vector<16x128xf32>
    %216 = arith.mulf %215, %204 : vector<16x128xf32>
    %217 = arith.mulf %216, %214 : vector<16x128xf32>
    %cst_77 = arith.constant dense<0.000000e+00> : vector<128xf32>
    %218 = vector.multi_reduction <add>, %217, %cst_77 [0] : vector<16x128xf32> to vector<128xf32>
    %219 = vector.shape_cast %218 : vector<128xf32> to vector<1x128xf32>
    %220 = arith.mulf %219, %50 : vector<1x128xf32>
    %c32 = arith.constant 32 : index
    %c0_78 = arith.constant 0 : index
    %221 = vector.load %arg3[%c32, %c0_78] : memref<80x1xf32, #tpu.memory_space<vmem>>, vector<16x1xf32>
    %c32_79 = arith.constant 32 : index
    %c0_80 = arith.constant 0 : index
    %222 = vector.load %arg4[%c32_79, %c0_80] : memref<80x1xf32, #tpu.memory_space<vmem>>, vector<16x1xf32>
    %c32_81 = arith.constant 32 : index
    %c0_82 = arith.constant 0 : index
    %223 = vector.load %arg5[%c32_81, %c0_82] : memref<80x1xf32, #tpu.memory_space<vmem>>, vector<16x1xf32>
    %c32_83 = arith.constant 32 : index
    %c0_84 = arith.constant 0 : index
    %224 = vector.load %arg6[%c32_83, %c0_84] : memref<80x1xf32, #tpu.memory_space<vmem>>, vector<16x1xf32>
    %c32_85 = arith.constant 32 : index
    %c0_86 = arith.constant 0 : index
    %225 = vector.load %arg7[%c32_85, %c0_86] : memref<80x1xf32, #tpu.memory_space<vmem>>, vector<16x1xf32>
    %c32_87 = arith.constant 32 : index
    %c0_88 = arith.constant 0 : index
    %226 = vector.load %arg8[%c32_87, %c0_88] : memref<80x1xf32, #tpu.memory_space<vmem>>, vector<16x1xf32>
    %c32_89 = arith.constant 32 : index
    %c0_90 = arith.constant 0 : index
    %227 = vector.load %arg9[%c32_89, %c0_90] : memref<80x1xf32, #tpu.memory_space<vmem>>, vector<16x1xf32>
    %228 = tpu.transpose %220, [1, 0] : vector<1x128xf32> -> vector<128x1xf32>
    %cst_91 = arith.constant dense<0.000000e+00> : vector<64x1xf32>
    %229 = tpu.matmul %0, %228, %cst_91 {dimension_numbers = #tpu.dot_dimension_numbers<[1], [0], [0], [1], [0, 0, 1, 1], [], []>} : vector<64x128xf32>, vector<128x1xf32>, vector<64x1xf32> -> vector<64x1xf32>
    %230 = arith.mulf %229, %48 : vector<64x1xf32>
    %231 = vector.broadcast %230 : vector<64x1xf32> to vector<64x128xf32>
    %232 = arith.mulf %0, %231 : vector<64x128xf32>
    %cst_92 = arith.constant dense<0xFF800000> : vector<128xf32>
    %233 = vector.multi_reduction <maximumf>, %232, %cst_92 [0] : vector<64x128xf32> to vector<128xf32>
    %234 = vector.shape_cast %233 : vector<128xf32> to vector<1x128xf32>
    %235 = arith.mulf %234, %50 : vector<1x128xf32>
    %236 = vector.broadcast %235 : vector<1x128xf32> to vector<64x128xf32>
    %237 = arith.mulf %0, %236 : vector<64x128xf32>
    %cst_93 = arith.constant dense<0xFF800000> : vector<64xf32>
    %238 = vector.multi_reduction <maximumf>, %237, %cst_93 [1] : vector<64x128xf32> to vector<64xf32>
    %239 = vector.shape_cast %238 : vector<64xf32> to vector<64x1xf32>
    %240 = arith.mulf %239, %48 : vector<64x1xf32>
    %cst_94 = arith.constant 5.000000e-01 : f32
    %241 = vector.broadcast %cst_94 : f32 to vector<64x1xf32>
    %242 = arith.mulf %240, %241 : vector<64x1xf32>
    %243 = arith.subf %230, %242 : vector<64x1xf32>
    %244 = tpu.transpose %230, [1, 0] : vector<64x1xf32> -> vector<1x64xf32>
    %245 = tpu.transpose %243, [1, 0] : vector<64x1xf32> -> vector<1x64xf32>
    %246 = vector.broadcast %222 : vector<16x1xf32> to vector<16x64xf32>
    %247 = vector.broadcast %245 : vector<1x64xf32> to vector<16x64xf32>
    %248 = arith.mulf %246, %247 : vector<16x64xf32>
    %249 = vector.broadcast %223 : vector<16x1xf32> to vector<16x64xf32>
    %250 = arith.addf %248, %249 : vector<16x64xf32>
    %251 = arith.negf %250 : vector<16x64xf32>
    %252 = math.exp %251 : vector<16x64xf32>
    %cst_95 = arith.constant 1.000000e+00 : f32
    %253 = vector.broadcast %cst_95 : f32 to vector<16x64xf32>
    %254 = arith.addf %253, %252 : vector<16x64xf32>
    %255 = arith.divf %253, %254 : vector<16x64xf32>
    %256 = vector.broadcast %221 : vector<16x1xf32> to vector<16x64xf32>
    %257 = arith.mulf %256, %255 : vector<16x64xf32>
    %cst_96 = arith.constant dense<0.000000e+00> : vector<64xf32>
    %258 = vector.multi_reduction <add>, %257, %cst_96 [0] : vector<16x64xf32> to vector<64xf32>
    %259 = vector.shape_cast %258 : vector<64xf32> to vector<1x64xf32>
    %260 = arith.mulf %259, %46 : vector<1x64xf32>
    %261 = arith.addf %180, %260 : vector<1x64xf32>
    %262 = arith.mulf %261, %46 : vector<1x64xf32>
    %cst_97 = arith.constant 1.000000e+00 : f32
    %263 = vector.broadcast %cst_97 : f32 to vector<1x64xf32>
    %264 = arith.divf %263, %244 : vector<1x64xf32>
    %265 = arith.mulf %260, %264 : vector<1x64xf32>
    %266 = tpu.concatenate %260, %265 in 0 : vector<1x64xf32>, vector<1x64xf32> -> vector<2x64xf32>
    %cst_98 = arith.constant dense<0.000000e+00> : vector<2x128xf32>
    %267 = tpu.matmul %266, %0, %cst_98 {dimension_numbers = #tpu.dot_dimension_numbers<[1], [0], [0], [1], [0, 0, 1, 1], [], []>} : vector<2x64xf32>, vector<64x128xf32>, vector<2x128xf32> -> vector<2x128xf32>
    %268 = vector.extract_strided_slice %267 {offsets = [0, 0], sizes = [1, 128], strides = [1, 1]} : vector<2x128xf32> to vector<1x128xf32>
    %269 = vector.extract_strided_slice %267 {offsets = [1, 0], sizes = [1, 128], strides = [1, 1]} : vector<2x128xf32> to vector<1x128xf32>
    %cst_99 = arith.constant 0.000000e+00 : f32
    %270 = vector.broadcast %cst_99 : f32 to vector<1x128xf32>
    %271 = arith.maximumf %268, %270 : vector<1x128xf32>
    %272 = arith.subf %191, %271 : vector<1x128xf32>
    %273 = arith.mulf %272, %50 : vector<1x128xf32>
    %274 = arith.mulf %220, %269 : vector<1x128xf32>
    %275 = arith.addf %194, %274 : vector<1x128xf32>
    %276 = arith.mulf %275, %50 : vector<1x128xf32>
    %277 = vector.broadcast %225 : vector<16x1xf32> to vector<16x128xf32>
    %278 = vector.broadcast %273 : vector<1x128xf32> to vector<16x128xf32>
    %279 = arith.mulf %277, %278 : vector<16x128xf32>
    %280 = vector.broadcast %226 : vector<16x1xf32> to vector<16x128xf32>
    %281 = arith.addf %279, %280 : vector<16x128xf32>
    %282 = arith.negf %281 : vector<16x128xf32>
    %283 = math.exp %282 : vector<16x128xf32>
    %cst_100 = arith.constant 1.000000e+00 : f32
    %284 = vector.broadcast %cst_100 : f32 to vector<16x128xf32>
    %285 = arith.addf %284, %283 : vector<16x128xf32>
    %286 = arith.divf %284, %285 : vector<16x128xf32>
    %287 = vector.broadcast %1 : f32 to vector<1x128xf32>
    %288 = arith.subf %273, %287 : vector<1x128xf32>
    %289 = vector.broadcast %227 : vector<16x1xf32> to vector<16x128xf32>
    %290 = vector.broadcast %288 : vector<1x128xf32> to vector<16x128xf32>
    %291 = arith.mulf %289, %290 : vector<16x128xf32>
    %cst_101 = arith.constant 0.000000e+00 : f32
    %292 = vector.broadcast %cst_101 : f32 to vector<16x128xf32>
    %293 = arith.maximumf %291, %292 : vector<16x128xf32>
    %cst_102 = arith.constant -0.693147182 : f32
    %294 = vector.broadcast %cst_102 : f32 to vector<16x128xf32>
    %295 = arith.mulf %293, %294 : vector<16x128xf32>
    %296 = math.exp %295 : vector<16x128xf32>
    %297 = vector.broadcast %224 : vector<16x1xf32> to vector<16x128xf32>
    %298 = arith.mulf %297, %286 : vector<16x128xf32>
    %299 = arith.mulf %298, %296 : vector<16x128xf32>
    %cst_103 = arith.constant dense<0.000000e+00> : vector<128xf32>
    %300 = vector.multi_reduction <add>, %299, %cst_103 [0] : vector<16x128xf32> to vector<128xf32>
    %301 = vector.shape_cast %300 : vector<128xf32> to vector<1x128xf32>
    %302 = arith.mulf %301, %50 : vector<1x128xf32>
    %c48 = arith.constant 48 : index
    %c0_104 = arith.constant 0 : index
    %303 = vector.load %arg3[%c48, %c0_104] : memref<80x1xf32, #tpu.memory_space<vmem>>, vector<16x1xf32>
    %c48_105 = arith.constant 48 : index
    %c0_106 = arith.constant 0 : index
    %304 = vector.load %arg4[%c48_105, %c0_106] : memref<80x1xf32, #tpu.memory_space<vmem>>, vector<16x1xf32>
    %c48_107 = arith.constant 48 : index
    %c0_108 = arith.constant 0 : index
    %305 = vector.load %arg5[%c48_107, %c0_108] : memref<80x1xf32, #tpu.memory_space<vmem>>, vector<16x1xf32>
    %c48_109 = arith.constant 48 : index
    %c0_110 = arith.constant 0 : index
    %306 = vector.load %arg6[%c48_109, %c0_110] : memref<80x1xf32, #tpu.memory_space<vmem>>, vector<16x1xf32>
    %c48_111 = arith.constant 48 : index
    %c0_112 = arith.constant 0 : index
    %307 = vector.load %arg7[%c48_111, %c0_112] : memref<80x1xf32, #tpu.memory_space<vmem>>, vector<16x1xf32>
    %c48_113 = arith.constant 48 : index
    %c0_114 = arith.constant 0 : index
    %308 = vector.load %arg8[%c48_113, %c0_114] : memref<80x1xf32, #tpu.memory_space<vmem>>, vector<16x1xf32>
    %c48_115 = arith.constant 48 : index
    %c0_116 = arith.constant 0 : index
    %309 = vector.load %arg9[%c48_115, %c0_116] : memref<80x1xf32, #tpu.memory_space<vmem>>, vector<16x1xf32>
    %310 = tpu.transpose %302, [1, 0] : vector<1x128xf32> -> vector<128x1xf32>
    %cst_117 = arith.constant dense<0.000000e+00> : vector<64x1xf32>
    %311 = tpu.matmul %0, %310, %cst_117 {dimension_numbers = #tpu.dot_dimension_numbers<[1], [0], [0], [1], [0, 0, 1, 1], [], []>} : vector<64x128xf32>, vector<128x1xf32>, vector<64x1xf32> -> vector<64x1xf32>
    %312 = arith.mulf %311, %48 : vector<64x1xf32>
    %313 = vector.broadcast %312 : vector<64x1xf32> to vector<64x128xf32>
    %314 = arith.mulf %0, %313 : vector<64x128xf32>
    %cst_118 = arith.constant dense<0xFF800000> : vector<128xf32>
    %315 = vector.multi_reduction <maximumf>, %314, %cst_118 [0] : vector<64x128xf32> to vector<128xf32>
    %316 = vector.shape_cast %315 : vector<128xf32> to vector<1x128xf32>
    %317 = arith.mulf %316, %50 : vector<1x128xf32>
    %318 = vector.broadcast %317 : vector<1x128xf32> to vector<64x128xf32>
    %319 = arith.mulf %0, %318 : vector<64x128xf32>
    %cst_119 = arith.constant dense<0xFF800000> : vector<64xf32>
    %320 = vector.multi_reduction <maximumf>, %319, %cst_119 [1] : vector<64x128xf32> to vector<64xf32>
    %321 = vector.shape_cast %320 : vector<64xf32> to vector<64x1xf32>
    %322 = arith.mulf %321, %48 : vector<64x1xf32>
    %cst_120 = arith.constant 5.000000e-01 : f32
    %323 = vector.broadcast %cst_120 : f32 to vector<64x1xf32>
    %324 = arith.mulf %322, %323 : vector<64x1xf32>
    %325 = arith.subf %312, %324 : vector<64x1xf32>
    %326 = tpu.transpose %312, [1, 0] : vector<64x1xf32> -> vector<1x64xf32>
    %327 = tpu.transpose %325, [1, 0] : vector<64x1xf32> -> vector<1x64xf32>
    %328 = vector.broadcast %304 : vector<16x1xf32> to vector<16x64xf32>
    %329 = vector.broadcast %327 : vector<1x64xf32> to vector<16x64xf32>
    %330 = arith.mulf %328, %329 : vector<16x64xf32>
    %331 = vector.broadcast %305 : vector<16x1xf32> to vector<16x64xf32>
    %332 = arith.addf %330, %331 : vector<16x64xf32>
    %333 = arith.negf %332 : vector<16x64xf32>
    %334 = math.exp %333 : vector<16x64xf32>
    %cst_121 = arith.constant 1.000000e+00 : f32
    %335 = vector.broadcast %cst_121 : f32 to vector<16x64xf32>
    %336 = arith.addf %335, %334 : vector<16x64xf32>
    %337 = arith.divf %335, %336 : vector<16x64xf32>
    %338 = vector.broadcast %303 : vector<16x1xf32> to vector<16x64xf32>
    %339 = arith.mulf %338, %337 : vector<16x64xf32>
    %cst_122 = arith.constant dense<0.000000e+00> : vector<64xf32>
    %340 = vector.multi_reduction <add>, %339, %cst_122 [0] : vector<16x64xf32> to vector<64xf32>
    %341 = vector.shape_cast %340 : vector<64xf32> to vector<1x64xf32>
    %342 = arith.mulf %341, %46 : vector<1x64xf32>
    %343 = arith.addf %262, %342 : vector<1x64xf32>
    %344 = arith.mulf %343, %46 : vector<1x64xf32>
    %cst_123 = arith.constant 1.000000e+00 : f32
    %345 = vector.broadcast %cst_123 : f32 to vector<1x64xf32>
    %346 = arith.divf %345, %326 : vector<1x64xf32>
    %347 = arith.mulf %342, %346 : vector<1x64xf32>
    %348 = tpu.concatenate %342, %347 in 0 : vector<1x64xf32>, vector<1x64xf32> -> vector<2x64xf32>
    %cst_124 = arith.constant dense<0.000000e+00> : vector<2x128xf32>
    %349 = tpu.matmul %348, %0, %cst_124 {dimension_numbers = #tpu.dot_dimension_numbers<[1], [0], [0], [1], [0, 0, 1, 1], [], []>} : vector<2x64xf32>, vector<64x128xf32>, vector<2x128xf32> -> vector<2x128xf32>
    %350 = vector.extract_strided_slice %349 {offsets = [0, 0], sizes = [1, 128], strides = [1, 1]} : vector<2x128xf32> to vector<1x128xf32>
    %351 = vector.extract_strided_slice %349 {offsets = [1, 0], sizes = [1, 128], strides = [1, 1]} : vector<2x128xf32> to vector<1x128xf32>
    %cst_125 = arith.constant 0.000000e+00 : f32
    %352 = vector.broadcast %cst_125 : f32 to vector<1x128xf32>
    %353 = arith.maximumf %350, %352 : vector<1x128xf32>
    %354 = arith.subf %273, %353 : vector<1x128xf32>
    %355 = arith.mulf %354, %50 : vector<1x128xf32>
    %356 = arith.mulf %302, %351 : vector<1x128xf32>
    %357 = arith.addf %276, %356 : vector<1x128xf32>
    %358 = arith.mulf %357, %50 : vector<1x128xf32>
    %359 = vector.broadcast %307 : vector<16x1xf32> to vector<16x128xf32>
    %360 = vector.broadcast %355 : vector<1x128xf32> to vector<16x128xf32>
    %361 = arith.mulf %359, %360 : vector<16x128xf32>
    %362 = vector.broadcast %308 : vector<16x1xf32> to vector<16x128xf32>
    %363 = arith.addf %361, %362 : vector<16x128xf32>
    %364 = arith.negf %363 : vector<16x128xf32>
    %365 = math.exp %364 : vector<16x128xf32>
    %cst_126 = arith.constant 1.000000e+00 : f32
    %366 = vector.broadcast %cst_126 : f32 to vector<16x128xf32>
    %367 = arith.addf %366, %365 : vector<16x128xf32>
    %368 = arith.divf %366, %367 : vector<16x128xf32>
    %369 = vector.broadcast %1 : f32 to vector<1x128xf32>
    %370 = arith.subf %355, %369 : vector<1x128xf32>
    %371 = vector.broadcast %309 : vector<16x1xf32> to vector<16x128xf32>
    %372 = vector.broadcast %370 : vector<1x128xf32> to vector<16x128xf32>
    %373 = arith.mulf %371, %372 : vector<16x128xf32>
    %cst_127 = arith.constant 0.000000e+00 : f32
    %374 = vector.broadcast %cst_127 : f32 to vector<16x128xf32>
    %375 = arith.maximumf %373, %374 : vector<16x128xf32>
    %cst_128 = arith.constant -0.693147182 : f32
    %376 = vector.broadcast %cst_128 : f32 to vector<16x128xf32>
    %377 = arith.mulf %375, %376 : vector<16x128xf32>
    %378 = math.exp %377 : vector<16x128xf32>
    %379 = vector.broadcast %306 : vector<16x1xf32> to vector<16x128xf32>
    %380 = arith.mulf %379, %368 : vector<16x128xf32>
    %381 = arith.mulf %380, %378 : vector<16x128xf32>
    %cst_129 = arith.constant dense<0.000000e+00> : vector<128xf32>
    %382 = vector.multi_reduction <add>, %381, %cst_129 [0] : vector<16x128xf32> to vector<128xf32>
    %383 = vector.shape_cast %382 : vector<128xf32> to vector<1x128xf32>
    %384 = arith.mulf %383, %50 : vector<1x128xf32>
    %c64 = arith.constant 64 : index
    %c0_130 = arith.constant 0 : index
    %385 = vector.load %arg3[%c64, %c0_130] : memref<80x1xf32, #tpu.memory_space<vmem>>, vector<16x1xf32>
    %c64_131 = arith.constant 64 : index
    %c0_132 = arith.constant 0 : index
    %386 = vector.load %arg4[%c64_131, %c0_132] : memref<80x1xf32, #tpu.memory_space<vmem>>, vector<16x1xf32>
    %c64_133 = arith.constant 64 : index
    %c0_134 = arith.constant 0 : index
    %387 = vector.load %arg5[%c64_133, %c0_134] : memref<80x1xf32, #tpu.memory_space<vmem>>, vector<16x1xf32>
    %388 = tpu.transpose %384, [1, 0] : vector<1x128xf32> -> vector<128x1xf32>
    %cst_135 = arith.constant dense<0.000000e+00> : vector<64x1xf32>
    %389 = tpu.matmul %0, %388, %cst_135 {dimension_numbers = #tpu.dot_dimension_numbers<[1], [0], [0], [1], [0, 0, 1, 1], [], []>} : vector<64x128xf32>, vector<128x1xf32>, vector<64x1xf32> -> vector<64x1xf32>
    %390 = arith.mulf %389, %48 : vector<64x1xf32>
    %391 = vector.broadcast %390 : vector<64x1xf32> to vector<64x128xf32>
    %392 = arith.mulf %0, %391 : vector<64x128xf32>
    %cst_136 = arith.constant dense<0xFF800000> : vector<128xf32>
    %393 = vector.multi_reduction <maximumf>, %392, %cst_136 [0] : vector<64x128xf32> to vector<128xf32>
    %394 = vector.shape_cast %393 : vector<128xf32> to vector<1x128xf32>
    %395 = arith.mulf %394, %50 : vector<1x128xf32>
    %396 = vector.broadcast %395 : vector<1x128xf32> to vector<64x128xf32>
    %397 = arith.mulf %0, %396 : vector<64x128xf32>
    %cst_137 = arith.constant dense<0xFF800000> : vector<64xf32>
    %398 = vector.multi_reduction <maximumf>, %397, %cst_137 [1] : vector<64x128xf32> to vector<64xf32>
    %399 = vector.shape_cast %398 : vector<64xf32> to vector<64x1xf32>
    %400 = arith.mulf %399, %48 : vector<64x1xf32>
    %cst_138 = arith.constant 5.000000e-01 : f32
    %401 = vector.broadcast %cst_138 : f32 to vector<64x1xf32>
    %402 = arith.mulf %400, %401 : vector<64x1xf32>
    %403 = arith.subf %390, %402 : vector<64x1xf32>
    %404 = tpu.transpose %390, [1, 0] : vector<64x1xf32> -> vector<1x64xf32>
    %405 = tpu.transpose %403, [1, 0] : vector<64x1xf32> -> vector<1x64xf32>
    %406 = vector.broadcast %386 : vector<16x1xf32> to vector<16x64xf32>
    %407 = vector.broadcast %405 : vector<1x64xf32> to vector<16x64xf32>
    %408 = arith.mulf %406, %407 : vector<16x64xf32>
    %409 = vector.broadcast %387 : vector<16x1xf32> to vector<16x64xf32>
    %410 = arith.addf %408, %409 : vector<16x64xf32>
    %411 = arith.negf %410 : vector<16x64xf32>
    %412 = math.exp %411 : vector<16x64xf32>
    %cst_139 = arith.constant 1.000000e+00 : f32
    %413 = vector.broadcast %cst_139 : f32 to vector<16x64xf32>
    %414 = arith.addf %413, %412 : vector<16x64xf32>
    %415 = arith.divf %413, %414 : vector<16x64xf32>
    %416 = vector.broadcast %385 : vector<16x1xf32> to vector<16x64xf32>
    %417 = arith.mulf %416, %415 : vector<16x64xf32>
    %cst_140 = arith.constant dense<0.000000e+00> : vector<64xf32>
    %418 = vector.multi_reduction <add>, %417, %cst_140 [0] : vector<16x64xf32> to vector<64xf32>
    %419 = vector.shape_cast %418 : vector<64xf32> to vector<1x64xf32>
    %420 = arith.mulf %419, %46 : vector<1x64xf32>
    %421 = arith.addf %344, %420 : vector<1x64xf32>
    %422 = arith.mulf %421, %46 : vector<1x64xf32>
    %cst_141 = arith.constant 1.000000e+00 : f32
    %423 = vector.broadcast %cst_141 : f32 to vector<1x64xf32>
    %424 = arith.divf %423, %404 : vector<1x64xf32>
    %425 = arith.mulf %420, %424 : vector<1x64xf32>
    %426 = tpu.concatenate %420, %425 in 0 : vector<1x64xf32>, vector<1x64xf32> -> vector<2x64xf32>
    %cst_142 = arith.constant dense<0.000000e+00> : vector<2x128xf32>
    %427 = tpu.matmul %426, %0, %cst_142 {dimension_numbers = #tpu.dot_dimension_numbers<[1], [0], [0], [1], [0, 0, 1, 1], [], []>} : vector<2x64xf32>, vector<64x128xf32>, vector<2x128xf32> -> vector<2x128xf32>
    %428 = vector.extract_strided_slice %427 {offsets = [1, 0], sizes = [1, 128], strides = [1, 1]} : vector<2x128xf32> to vector<1x128xf32>
    %429 = arith.mulf %384, %428 : vector<1x128xf32>
    %430 = arith.addf %358, %429 : vector<1x128xf32>
    %431 = arith.mulf %430, %50 : vector<1x128xf32>
    %c0_143 = arith.constant 0 : index
    %c0_144 = arith.constant 0 : index
    %432 = vector.load %arg15[%c0_143, %c0_144] : memref<1x128xf32, #tpu.memory_space<vmem>>, vector<1x128xf32>
    tpu.vector_store %arg15[%c0_143, %c0_144], %431 {strides = array<i32>} : memref<1x128xf32, #tpu.memory_space<vmem>>, vector<1x128xf32>,
    %c0_145 = arith.constant 0 : index
    %c0_146 = arith.constant 0 : index
    %433 = vector.load %arg2[%c0_145, %c0_146] : memref<1x128xf32, #tpu.memory_space<vmem>>, vector<1x128xf32>
    %434 = arith.mulf %433, %44 : vector<1x128xf32>
    %435 = arith.divf %434, %5 : vector<1x128xf32>
    %436 = tpu.transpose %435, [1, 0] : vector<1x128xf32> -> vector<128x1xf32>
    %437 = arith.addf %422, %22 : vector<1x64xf32>
    %cst_147 = arith.constant dense<0.000000e+00> : vector<64x1xf32>
    %438 = tpu.matmul %0, %436, %cst_147 {dimension_numbers = #tpu.dot_dimension_numbers<[1], [0], [0], [1], [0, 0, 1, 1], [], []>} : vector<64x128xf32>, vector<128x1xf32>, vector<64x1xf32> -> vector<64x1xf32>
    %439 = tpu.transpose %438, [1, 0] : vector<64x1xf32> -> vector<1x64xf32>
    %440 = arith.addf %437, %439 : vector<1x64xf32>
    %c0_148 = arith.constant 0 : index
    %c0_149 = arith.constant 0 : index
    %441 = vector.load %arg16[%c0_148, %c0_149] : memref<1x64xf32, #tpu.memory_space<vmem>>, vector<1x64xf32>
    tpu.vector_store %arg16[%c0_148, %c0_149], %440 {strides = array<i32>} : memref<1x64xf32, #tpu.memory_space<vmem>>, vector<1x64xf32>,
    return
  }
  func.func @transform_1(%arg0: i32) -> (i32, i32) {
    %c0_i32 = arith.constant 0 : i32
    %c0_i32_0 = arith.constant 0 : i32
    %c0_i32_1 = arith.constant 0 : i32
    return %c0_i32, %c0_i32_0 : i32, i32
  }
  func.func @transform_2(%arg0: i32) -> (i32, i32) {
    %c0_i32 = arith.constant 0 : i32
    %c0_i32_0 = arith.constant 0 : i32
    %c0_i32_1 = arith.constant 0 : i32
    return %c0_i32, %c0_i32_0 : i32, i32
  }
  func.func @transform_3(%arg0: i32) -> (i32, i32) {
    %c0_i32 = arith.constant 0 : i32
    %c0_i32_0 = arith.constant 0 : i32
    %c0_i32_1 = arith.constant 0 : i32
    return %c0_i32, %c0_i32_0 : i32, i32
  }
  func.func @transform_4(%arg0: i32) -> (i32, i32) {
    %c0_i32 = arith.constant 0 : i32
    %c0_i32_0 = arith.constant 0 : i32
    %c0_i32_1 = arith.constant 0 : i32
    return %c0_i32, %c0_i32_0 : i32, i32
  }
  func.func @transform_5(%arg0: i32) -> (i32, i32) {
    %c0_i32 = arith.constant 0 : i32
    %c0_i32_0 = arith.constant 0 : i32
    %c0_i32_1 = arith.constant 0 : i32
    return %c0_i32, %c0_i32_0 : i32, i32
  }
  func.func @transform_6(%arg0: i32) -> (i32, i32) {
    %c0_i32 = arith.constant 0 : i32
    %c0_i32_0 = arith.constant 0 : i32
    %c0_i32_1 = arith.constant 0 : i32
    return %c0_i32, %c0_i32_0 : i32, i32
  }
  func.func @transform_7(%arg0: i32) -> (i32, i32) {
    %c0_i32 = arith.constant 0 : i32
    %c0_i32_0 = arith.constant 0 : i32
    %c0_i32_1 = arith.constant 0 : i32
    return %c0_i32, %c0_i32_0 : i32, i32
  }
  func.func @transform_8(%arg0: i32) -> (i32, i32) {
    %c0_i32 = arith.constant 0 : i32
    %c0_i32_0 = arith.constant 0 : i32
    %c0_i32_1 = arith.constant 0 : i32
    return %c0_i32, %c0_i32_0 : i32, i32
  }
  func.func @transform_9(%arg0: i32) -> (i32, i32) {
    %c0_i32 = arith.constant 0 : i32
    %c0_i32_0 = arith.constant 0 : i32
    %c0_i32_1 = arith.constant 0 : i32
    return %c0_i32, %c0_i32_0 : i32, i32
  }
  func.func @transform_10(%arg0: i32) -> (i32, i32) {
    %c0_i32 = arith.constant 0 : i32
    %c0_i32_0 = arith.constant 0 : i32
    %c0_i32_1 = arith.constant 0 : i32
    return %c0_i32, %c0_i32_0 : i32, i32
  }
  func.func @transform_11(%arg0: i32) -> (i32, i32) {
    %c0_i32 = arith.constant 0 : i32
    %c0_i32_0 = arith.constant 0 : i32
    %c0_i32_1 = arith.constant 0 : i32
    return %c0_i32, %c0_i32_0 : i32, i32
  }
  func.func @transform_12(%arg0: i32) -> (i32, i32) {
    %c0_i32 = arith.constant 0 : i32
    %c0_i32_0 = arith.constant 0 : i32
    %c0_i32_1 = arith.constant 0 : i32
    return %c0_i32, %c0_i32_0 : i32, i32
  }
  func.func @transform_13(%arg0: i32) -> i32 {
    %c0_i32 = arith.constant 0 : i32
    %c0_i32_0 = arith.constant 0 : i32
    return %c0_i32 : i32
  }
  func.func @transform_14(%arg0: i32) -> (i32, i32) {
    %c0_i32 = arith.constant 0 : i32
    %c0_i32_0 = arith.constant 0 : i32
    %c0_i32_1 = arith.constant 0 : i32
    return %c0_i32, %c0_i32_0 : i32, i32
  }
  func.func @transform_15(%arg0: i32) -> (i32, i32) {
    %c0_i32 = arith.constant 0 : i32
    %c0_i32_0 = arith.constant 0 : i32
    %c0_i32_1 = arith.constant 0 : i32
    return %c0_i32, %c0_i32_0 : i32, i32
  }
}

</mosaic_0001>

<bundles_post_ra>
// kernel: tpu_custom_call.1
= control target key start
LH: loop header
LB: loop body
LE: loop exit
PB: predicated region body
PF: predicated region fallthrough
CT: control target
= control target key end

     0   :  { %22 = vsyncpa [#allocation6], 0  ;;  %s3868_s0 = inlined_call_operand.vmem [shape: f32[64,128], index: 0, kind: input, shape index: {}]   ;;  %s3869_s1 = inlined_call_operand.vmem [shape: f32[1,128], index: 1, kind: input, shape index: {}]   ;;  %s3870_s2 = inlined_call_operand.vmem [shape: f32[80,1], index: 2, kind: input, shape index: {}]   ;;  %s3871_s3 = inlined_call_operand.vmem [shape: f32[80,1], index: 3, kind: input, shape index: {}]   ;;  %s3872_s4 = inlined_call_operand.vmem [shape: f32[80,1], index: 4, kind: input, shape index: {}]   ;;  %s3873_s5 = inlined_call_operand.vmem [shape: f32[80,1], index: 5, kind: input, shape index: {}]   ;;  %s3874_s6 = inlined_call_operand.vmem [shape: f32[80,1], index: 6, kind: input, shape index: {}]   ;;  %s3875_s7 = inlined_call_operand.vmem [shape: f32[80,1], index: 7, kind: input, shape index: {}]   ;;  %s3876_s8 = inlined_call_operand.vmem [shape: f32[80,1], index: 8, kind: input, shape index: {}]   ;;  %s3877_s9 = inlined_call_operand.vmem [shape: f32[4,1], index: 9, kind: input, shape index: {}]   ;;  %s3878_s10 = inlined_call_operand.vmem [shape: f32[4,1], index: 10, kind: input, shape index: {}]   ;;  %s3879_s11 = inlined_call_operand.vmem [shape: f32[4,1], index: 11, kind: input, shape index: {}]   ;;  %s3880_s12 = inlined_call_operand.vmem [shape: f32[4,1], index: 12, kind: input, shape index: {}]   ;;  %s3881_s13 = inlined_call_operand.<no memory space> [shape: f32[1], index: 13, kind: input, shape index: {}]   ;;  %s3882_s14 = inlined_call_operand.hbm [shape: f32[1,128], index: 14, kind: output, shape index: {0}]   ;;  %s3883_s15 = inlined_call_operand.hbm [shape: f32[1,64], index: 15, kind: output, shape index: {1}]  }
   0x1   :  { %23 = vsyncpa [#allocation8], 0  ;;  %v2923_v0 = vld [vmem:[%s3868_s0] sm:$0xff]  ;;  %v2928_v1 = vld [vmem:[%s3868_s0 + $0x8] sm:$0xff] }
   0x2   :  { %v2933_v2 = vld [vmem:[%s3868_s0 + $0x10] sm:$0xff]  ;;  %v2938_v3 = vld [vmem:[%s3868_s0 + $0x18] sm:$0xff]  ;;  %v2943_v4 = vld [vmem:[%s3868_s0 + $0x20] sm:$0xff] }
   0x3   :  { %v2948_v5 = vld [vmem:[%s3868_s0 + $0x28] sm:$0xff]  ;;  %v2953_v6 = vld [vmem:[%s3868_s0 + $0x30] sm:$0xff]  ;;  %v2958_v7 = vld [vmem:[%s3868_s0 + $0x38] sm:$0xff] }
   0x4   :  { %81 = vsyncadd [#allocation3], 1024  ;;  %94 = vadd.xlane.f32.xlu0 %v2923_v0  ;;  %98 = vadd.xlane.f32.xlu1 %v2933_v2 }
   0x5   :  { %2831 = dma.done.wait [#allocation3], 1024 }
   0x6   :  { %2832 = vsyncadd [#allocation3], 4294966272  ;;  %102 = vadd.xlane.f32.xlu2 %v2943_v4  ;;  %661 = vmatpush.msra.mxu0 %v2958_v7  ;;  %v163_v8 = vld [vmem:[%s3880_s12] sm:$0xf]  ;;  %v2837_v9 = vmov 0   ;;  %v348_v15 = vld [vmem:[%s3871_s3 + $0x8] sm:$0xff] }
   0x7   :  { %1123 = vmatpush.msra.mxu1 %v2958_v7  ;;  %1586 = vmatpush.msra.mxu2 %v2958_v7  ;;  %v230_v10 = vld [vmem:[%s3877_s9] sm:$0xf]  ;;  %vm189_vm3 = vcmask 519168   ;;  %vm263_vm9 = vcmask 1043456   ;;  %s2618_s24 = sshll.u32 %s3883_s15, 4  ;;  %s2839_s9 = smov [#allocation5]   ;;  %s2619_s24 = int_to_ptr.hbm [resolvable:$true] %s2618_s24 }
   0x8   :  { %662 = vmatpush.msra.mxu0 %v2953_v6  ;;  %2049 = vmatpush.msra.mxu3 %v2958_v7  ;;  %v237_v12 = vld [vmem:[%s3878_s10] sm:$0xf]  ;;  %s2605_s10 = sshll.u32 %s2839_s9, 4  ;;  %s2606_s10 = int_to_ptr.vmem [resolvable:$true] %s2605_s10 }
   0x9   :  { %1124 = vmatpush.msra.mxu1 %v2953_v6  ;;  %1587 = vmatpush.msra.mxu2 %v2953_v6  ;;  %v155_v17 = vld [vmem:[%s3879_s11] sm:$0xf] }
   0xa   :  { %663 = vmatpush.msra.mxu0 %v2948_v5  ;;  %2050 = vmatpush.msra.mxu3 %v2953_v6  ;;  %v347_v49 = vld [vmem:[%s3871_s3] sm:$0xff] }
   0xb   :  { %1125 = vmatpush.msra.mxu1 %v2948_v5  ;;  %1588 = vmatpush.msra.mxu2 %v2948_v5 }
   0xc   :  { %664 = vmatpush.msra.mxu0 %v2943_v4  ;;  %2051 = vmatpush.msra.mxu3 %v2948_v5 }
   0xd   :  { %96 = vadd.xlane.f32.xlu0 %v2928_v1  ;;  %100 = vadd.xlane.f32.xlu1 %v2938_v3 }
   0xe   :  { %104 = vadd.xlane.f32.xlu2 %v2948_v5  ;;  %665 = vmatpush.msra.mxu0 %v2938_v3 }
   0xf   :  { %1126 = vmatpush.msra.mxu1 %v2943_v4  ;;  %1589 = vmatpush.msra.mxu2 %v2943_v4 }
  0x10   :  { %666 = vmatpush.msra.mxu0 %v2933_v2  ;;  %2052 = vmatpush.msra.mxu3 %v2943_v4 }
  0x11   :  { %1127 = vmatpush.msra.mxu1 %v2938_v3  ;;  %1590 = vmatpush.msra.mxu2 %v2938_v3 }
  0x12   :  { %667 = vmatpush.msra.mxu0 %v2928_v1  ;;  %2053 = vmatpush.msra.mxu3 %v2938_v3 }
  0x13   :  { %1128 = vmatpush.msra.mxu1 %v2933_v2  ;;  %1591 = vmatpush.msra.mxu2 %v2933_v2 }
  0x14   :  { %668 = vmatpush.msra.mxu0 %v2923_v0  ;;  %2054 = vmatpush.msra.mxu3 %v2933_v2 }
  0x15   :  { %106 = vadd.xlane.f32.xlu0 %v2953_v6  ;;  %108 = vadd.xlane.f32.xlu1 %v2958_v7 }
  0x16   :  { %1129 = vmatpush.msra.mxu1 %v2928_v1  ;;  %1592 = vmatpush.msra.mxu2 %v2928_v1 }
  0x17   :  { %2055 = vmatpush.msra.mxu3 %v2928_v1  ;;  %2504 = vmatpush.msrb.mxu0 %v2958_v7 }
  0x18   :  { %1130 = vmatpush.msra.mxu1 %v2923_v0  ;;  %1593 = vmatpush.msra.mxu2 %v2923_v0 }
  0x19   :  { %2056 = vmatpush.msra.mxu3 %v2923_v0  ;;  %2505 = vmatpush.msrb.mxu0 %v2953_v6 }
  0x1a   :  { %2673 = vset.pattern.permute.xlu0 %v2837_v9  ;;  %2672 = vset.pattern.permute.xlu2 %v2837_v9 }
  0x1b   :  { %2506 = vmatpush.msrb.mxu0 %v2948_v5 }
  0x1d   :  { %2507 = vmatpush.msrb.mxu0 %v2943_v4 }
  0x1f   :  { %2508 = vmatpush.msrb.mxu0 %v2938_v3 }
  0x21   :  { %2509 = vmatpush.msrb.mxu0 %v2933_v2 }
  0x23   :  { %2510 = vmatpush.msrb.mxu0 %v2928_v1 }
  0x25   :  { %2511 = vmatpush.msrb.mxu0 %v2923_v0 }
  0x26   :  { %158 = vperm.xlu2 %2672, %v155_v17  }
  0x29   :  { %166 = vperm.xlu0 %2673, %v163_v8  }
  0x31   :  { %233 = vperm.xlu0 %2673, %v230_v10  }
  0x39   :  { %240 = vperm.xlu0 %2673, %v237_v12  }
  0x41   :  { %548 = vperm.xlu0 %2673, %v348_v15  }
  0x77   :  { %v95_v11 = vpop.xlane.xlu0 %94  ;;  %v3020_v14 = vpop.xlane.xlu1 %98 }
  0x78   :  { %123 = vxpose.xlu1.b32.start [1/8] (short) (narrow) %v95_v11, 8 }
  0x79   :  { %v3032_v18 = vpop.xlane.xlu2 %102 }
  0x80   :  { %v3017_v13 = vpop.xlane.xlu0 %96  ;;  %v3026_v16 = vpop.xlane.xlu1 %100 }
  0x81   :  { %124 = vxpose.xlu1.b32.cont [2/8] (short) (narrow) %v3017_v13, 8  ;;  %v3035_v19 = vpop.xlane.xlu2 %104 }
  0x88   :  { %v3038_v20 = vpop.xlane.xlu0 %106  ;;  %v3041_v21 = vpop.xlane.xlu1 %108 }
  0x89   :  { %125 = vxpose.xlu1.b32.cont [3/8] (short) (narrow) %v3020_v14, 8  ;;  %v159_v23 = vpop.permute.xlu2 %158 }
  0x91   :  { %126 = vxpose.xlu1.b32.cont [4/8] (short) (narrow) %v3026_v16, 8 }
  0x99   :  { %127 = vxpose.xlu1.b32.cont [5/8] (short) (narrow) %v3032_v18, 8 }
  0x9b   :  { %v167_v26 = vpop.permute.xlu0 %166 }
  0xa1   :  { %128 = vxpose.xlu1.b32.cont [6/8] (short) (narrow) %v3035_v19, 8 }
  0xa3   :  { %v234_v15 = vpop.permute.xlu0 %233 }
  0xa9   :  { %129 = vxpose.xlu1.b32.cont [7/8] (short) (narrow) %v3038_v20, 8 }
  0xb1   :  { %130 = vxpose.xlu1.b32.end [8/8] (short) (narrow) %v3041_v21, 8 }
 0x104   :  { %2674 = vset.pattern.permute.xlu1 %v2837_v9 }
 0x10b   :  { %543 = vperm.xlu1 %2674, %v347_v49  }
 0x11d   :  { %v139_v22 = vpop.trf.xlu1 }
 0x11e   :  { %v161_v24 = vperm.slane %v139_v22, 0 }
 0x120   :  { %v162_v25 = vmul.f32 %v161_v24, %v159_v23 }
 0x122   :  { %v169_v27 = vadd.f32 %v167_v26, %v162_v25 }
 0x124   :  { %v2642_v28 = vmul.f32 -1.442695, %v169_v27 }
 0x126   :  { %2675 = vpow2.f32 %v2642_v28 }
 0x12c   :  { %v2676_v29 = vpop.eup %2675 }
 0x12d   :  { %v173_v30 = vadd.f32 1.0, %v2676_v29 }
 0x12f   :  { %2677 = vrcp.f32 %v173_v30  ;;  %v185_v34 = vand.u32 2147483648, %v173_v30  ;;  %v183_v36 = vand.u32 2147483647, %v173_v30  ;;  %vm179_vm1 = vweird.f32 %v173_v30 }
 0x131   :  { %v186_v38 = vor.u32 1.1754944e-38, %v185_v34  ;;  %vm184_vm4 = vcmp.eq.f32.partialorder %v183_v36, 8.507059e+37 }
 0x135   :  { %v2678_v31 = vpop.eup %2677 }
 0x136   :  { %v175_v32 = vmul.f32 %v2678_v31, %v173_v30  ;;  %vm180_vm0 = vweird.f32 %v2678_v31 }
 0x137   :  { %vm181_vm2 = vmor %vm179_vm1, %vm180_vm0 }
 0x138   :  { %v176_v33 = vsub.f32 1.0, %v175_v32 }
 0x13a   :  { %v177_v35 = vmul.f32 %v2678_v31, %v176_v33 }
 0x13c   :  { %v178_v37 = vadd.f32 %v2678_v31, %v177_v35 }
 0x13e   :  { %v182_v39 = vsel %vm181_vm2, %v2678_v31, %v178_v37  ;;  %vm616_vm2 = vcmask 523264  }
 0x13f   :  { %v187_v40 = vsel %vm184_vm4, %v186_v38, %v182_v39 }
 0x140   :  { %v190_v41 = vsel %vm189_vm3, %v187_v40, 0.0 }
 0x141   :  { %v191_v42 = vrot.slane %v190_v41, 4 }
 0x143   :  { %v192_v43 = vadd.f32 %v191_v42, %v190_v41 }
 0x145   :  { %v193_v44 = vrot.slane %v192_v43, 2 }
 0x147   :  { %v194_v45 = vadd.f32 %v193_v44, %v192_v43 }
 0x149   :  { %v195_v46 = vrot.slane %v194_v45, 1 }
 0x14b   :  { %v196_v47 = vadd.f32 %v195_v46, %v194_v45 }
 0x14d   :  { %v3044_v48 = vmul.f32 0.25, %v196_v47 }
 0x14f   :  { %198 = vxpose.xlu2.b32.start.end [1/1] (short) (narrow) %v3044_v48, 64 }
 0x1e8   :  { %v214_v50 = vpop.trf.xlu2 }
 0x1e9   :  { %v3050_v51 = vsub.f32 1.0, %v214_v50 }
 0x1eb   :  { %v3053_v52 = vmul.f32 %v3050_v51, %v95_v11 }
 0x1ed   :  { %369 = vperm.xlu0 %2673, %v3053_v52  }
 0x1f0   :  { %274 = vperm.xlu2 %2672, %v214_v50   ;;  %v215_v53 = vpop.trf.xlu2 }
 0x1f1   :  { %v3056_v54 = vsub.f32 1.0, %v215_v53 }
 0x1f3   :  { %v3060_v55 = vmul.f32 %v3056_v54, %v3017_v13 }
 0x1f5   :  { %374 = vperm.xlu1 %2674, %v3060_v55   ;;  %279 = vperm.xlu0 %2673, %v215_v53  }
 0x1f8   :  { %v216_v56 = vpop.trf.xlu2 }
 0x1f9   :  { %v3063_v57 = vsub.f32 1.0, %v216_v56 }
 0x1fb   :  { %v3067_v58 = vmul.f32 %v3063_v57, %v3020_v14 }
 0x1fd   :  { %284 = vperm.xlu0 %2673, %v216_v56  }
 0x200   :  { %v217_v59 = vpop.trf.xlu2 }
 0x201   :  { %v3070_v60 = vsub.f32 1.0, %v217_v59 }
 0x203   :  { %v3074_v61 = vmul.f32 %v3070_v60, %v3026_v16  ;;  %v110_v16 = vadd.f32 %v2928_v1, %v2923_v0 }
 0x205   :  { %379 = vperm.xlu0 %2673, %v3067_v58   ;;  %v111_v22 = vadd.f32 %v110_v16, %v2933_v2 }
 0x208   :  { %v218_v62 = vpop.trf.xlu2 }
 0x209   :  { %v3077_v63 = vsub.f32 1.0, %v218_v62 }
 0x20b   :  { %v3081_v8 = vmul.f32 %v3077_v63, %v3032_v18  ;;  %v241_v18 = vpop.permute.xlu0 %240 }
 0x20d   :  { %289 = vperm.xlu0 %2673, %v217_v59  }
 0x210   :  { %v219_v9 = vpop.trf.xlu2 }
 0x211   :  { %v3084_v10 = vsub.f32 1.0, %v219_v9 }
 0x213   :  { %v3088_v11 = vmul.f32 %v3084_v10, %v3035_v19  ;;  %v3109_v24 = vpop.permute.xlu0 %548 }
 0x215   :  { %384 = vperm.xlu0 %2673, %v3074_v61  }
 0x218   :  { %v220_v12 = vpop.trf.xlu2 }
 0x219   :  { %v3091_v13 = vsub.f32 1.0, %v220_v12 }
 0x21b   :  { %v3095_v14 = vmul.f32 %v3091_v13, %v3038_v20  ;;  %v112_v20 = vadd.f32 %v111_v22, %v2938_v3 }
 0x21d   :  { %294 = vperm.xlu0 %2673, %v218_v62   ;;  %v113_v25 = vadd.f32 %v112_v20, %v2943_v4 }
 0x21f   :  { %v114_v26 = vadd.f32 %v113_v25, %v2948_v5  ;;  %v3120_v25 = vpop.permute.xlu1 %543 }
 0x220   :  { %v221_v17 = vpop.trf.xlu2 }
 0x221   :  { %v3100_v19 = vsub.f32 1.0, %v221_v17  ;;  %v115_v28 = vadd.f32 %v114_v26, %v2953_v6 }
 0x223   :  { %v3105_v23 = vmul.f32 %v3100_v19, %v3041_v21  ;;  %v116_v29 = vadd.f32 %v115_v28, %v2958_v7 }
 0x225   :  { %389 = vperm.xlu0 %2673, %v3081_v8   ;;  %v117_v31 = vrot.slane %v116_v29, 4 }
 0x227   :  { %v118_v21 = vadd.f32 %v117_v31, %v116_v29 }
 0x229   :  { %v119_v33 = vrot.slane %v118_v21, 2 }
 0x22b   :  { %v120_v34 = vadd.f32 %v119_v33, %v118_v21 }
 0x22d   :  { %299 = vperm.xlu0 %2673, %v219_v9   ;;  %v121_v36 = vrot.slane %v120_v34, 1 }
 0x22f   :  { %v3117_v37 = vadd.f32 %v121_v36, %v120_v34 }
 0x231   :  { %v236_v39 = vmul.f32 %v234_v15, %v3117_v37 }
 0x233   :  { %v243_v40 = vadd.f32 %v241_v18, %v236_v39 }
 0x235   :  { %394 = vperm.xlu0 %2673, %v3088_v11   ;;  %v2643_v42 = vmul.f32 -1.442695, %v243_v40 }
 0x237   :  { %2679 = vpow2.f32 %v2643_v42 }
 0x23d   :  { %304 = vperm.xlu0 %2673, %v220_v12   ;;  %v2680_v44 = vpop.eup %2679 }
 0x23e   :  { %v247_v45 = vadd.f32 1.0, %v2680_v44 }
 0x240   :  { %2681 = vrcp.f32 %v247_v45  ;;  %vm253_vm5 = vweird.f32 %v247_v45  ;;  %v259_v62 = vand.u32 2147483648, %v247_v45  ;;  %v257_v12 = vand.u32 2147483647, %v247_v45 }
 0x242   :  { %v260_v16 = vor.u32 1.1754944e-38, %v259_v62  ;;  %vm258_vm8 = vcmp.eq.f32.partialorder %v257_v12, 8.507059e+37 }
 0x245   :  { %399 = vperm.xlu0 %2673, %v3095_v14  }
 0x246   :  { %v2682_v47 = vpop.eup %2681 }
 0x247   :  { %v249_v50 = vmul.f32 %v2682_v47, %v247_v45  ;;  %vm254_vm6 = vweird.f32 %v2682_v47 }
 0x248   :  { %vm255_vm7 = vmor %vm253_vm5, %vm254_vm6 }
 0x249   :  { %v250_v53 = vsub.f32 1.0, %v249_v50 }
 0x24a   :  { %v275_v28 = vpop.permute.xlu2 %274 }
 0x24b   :  { %v251_v59 = vmul.f32 %v2682_v47, %v250_v53  ;;  %v312_v34 = vmul.f32 %v275_v28, %v2923_v0 }
 0x24d   :  { %309 = vperm.xlu0 %2673, %v221_v17   ;;  %v252_v9 = vadd.f32 %v2682_v47, %v251_v59 }
 0x24f   :  { %v256_v17 = vsel %vm255_vm7, %v2682_v47, %v252_v9  ;;  %vm648_vm7 = vcmask 1040384  }
 0x250   :  { %v261_v18 = vsel %vm258_vm8, %v260_v16, %v256_v17 }
 0x251   :  { %v264_v20 = vsel %vm263_vm9, %v261_v18, 0.0 }
 0x252   :  { %v265_v26 = vrot.slane %v264_v20, 4 }
 0x254   :  { %v266_v36 = vadd.f32 %v265_v26, %v264_v20 }
 0x255   :  { %404 = vperm.xlu0 %2673, %v3105_v23  }
 0x25f   :  { %v3113_v27 = vpop.permute.xlu0 %369 }
 0x267   :  { %v280_v30 = vpop.permute.xlu0 %279  ;;  %v375_v53 = vpop.permute.xlu1 %374 }
 0x268   :  { %v313_v31 = vmul.f32 %v280_v30, %v2928_v1  ;;  %v267_v30 = vrot.slane %v266_v36, 2  ;;  %v408_v9 = vmul.f32 %v375_v53, %v2928_v1 }
 0x26a   :  { %v268_v17 = vadd.f32 %v267_v30, %v266_v36 }
 0x26f   :  { %v285_v32 = vpop.permute.xlu0 %284 }
 0x270   :  { %v314_v40 = vmul.f32 %v285_v32, %v2933_v2 }
 0x277   :  { %v380_v35 = vpop.permute.xlu0 %379 }
 0x278   :  { %v409_v16 = vmul.f32 %v380_v35, %v2933_v2 }
 0x27f   :  { %v290_v38 = vpop.permute.xlu0 %289 }
 0x280   :  { %v315_v42 = vmul.f32 %v290_v38, %v2938_v3  ;;  %v407_v38 = vmul.f32 %v3113_v27, %v2923_v0 }
 0x287   :  { %v385_v41 = vpop.permute.xlu0 %384 }
 0x288   :  { %v410_v20 = vmul.f32 %v385_v41, %v2938_v3 }
 0x28f   :  { %v295_v43 = vpop.permute.xlu0 %294 }
 0x290   :  { %v316_v21 = vmul.f32 %v295_v43, %v2943_v4 }
 0x292   :  { %v320_v47 = vmax.f32 %v312_v34, %v316_v21 }
 0x297   :  { %v390_v46 = vpop.permute.xlu0 %389 }
 0x298   :  { %v411_v12 = vmul.f32 %v390_v46, %v2943_v4 }
 0x29f   :  { %v300_v49 = vpop.permute.xlu0 %299 }
 0x2a0   :  { %v317_v29 = vmul.f32 %v300_v49, %v2948_v5 }
 0x2a2   :  { %v321_v44 = vmax.f32 %v313_v31, %v317_v29  ;;  %v415_v29 = vmax.f32 %v407_v38, %v411_v12  ;;  %v350_v38 = vld [vmem:[%s3872_s4 + $0x8] sm:$0xff] }
 0x2a4   :  { %v324_v59 = vmax.f32 %v320_v47, %v321_v44 }
 0x2a7   :  { %v395_v56 = vpop.permute.xlu0 %394 }
 0x2a8   :  { %v412_v43 = vmul.f32 %v395_v56, %v2948_v5 }
 0x2aa   :  { %v416_v26 = vmax.f32 %v408_v9, %v412_v43 }
 0x2af   :  { %v305_v15 = vpop.permute.xlu0 %304 }
 0x2b0   :  { %v318_v33 = vmul.f32 %v305_v15, %v2953_v6 }
 0x2b2   :  { %v322_v50 = vmax.f32 %v314_v40, %v318_v33  ;;  %v419_v33 = vmax.f32 %v415_v29, %v416_v26  ;;  %v356_v26 = vld [vmem:[%s3875_s7 + $0x8] sm:$0xff] }
 0x2b7   :  { %v400_v22 = vpop.permute.xlu0 %399 }
 0x2b8   :  { %v413_v32 = vmul.f32 %v400_v22, %v2953_v6  ;;  %v269_v22 = vrot.slane %v268_v17, 1 }
 0x2ba   :  { %v417_v31 = vmax.f32 %v409_v16, %v413_v32  ;;  %v346_v16 = vld [vmem:[%s3870_s2 + $0x8] sm:$0xff] }
 0x2bf   :  { %v310_v39 = vpop.permute.xlu0 %309 }
 0x2c0   :  { %v319_v45 = vmul.f32 %v310_v39, %v2958_v7 }
 0x2c2   :  { %v323_v49 = vmax.f32 %v315_v42, %v319_v45  ;;  %v270_v42 = vadd.f32 %v269_v22, %v268_v17  ;;  %v353_v17 = vld [vmem:[%s3874_s6] sm:$0xff]  ;;  %v352_v22 = vld [vmem:[%s3873_s5 + $0x8] sm:$0xff] }
 0x2c4   :  { %v325_v62 = vmax.f32 %v322_v50, %v323_v49  ;;  %v271_v41 = vmul.f32 0.25, %v270_v42 }
 0x2c6   :  { %v326_v15 = vmax.f32 %v324_v59, %v325_v62 }
 0x2c7   :  { %v405_v18 = vpop.permute.xlu0 %404 }
 0x2c8   :  { %v327_v28 = vrot.slane %v326_v15, 4  ;;  %v414_v56 = vmul.f32 %v405_v18, %v2958_v7  ;;  %v354_v18 = vld [vmem:[%s3874_s6 + $0x8] sm:$0xff] }
 0x2ca   :  { %v328_v21 = vmax.f32 %v326_v15, %v327_v28  ;;  %v418_v46 = vmax.f32 %v410_v20, %v414_v56  ;;  %v349_v15 = vld [vmem:[%s3872_s4] sm:$0xff] }
 0x2cb   :  { %v355_v20 = vld [vmem:[%s3875_s7] sm:$0xff] }
 0x2cc   :  { %v329_v34 = vrot.slane %v328_v21, 2  ;;  %v420_v39 = vmax.f32 %v417_v31, %v418_v46  ;;  %v357_v56 = vld [vmem:[%s3876_s8] sm:$0xff]  ;;  %v358_v31 = vld [vmem:[%s3876_s8 + $0x8] sm:$0xff] }
 0x2cd   :  { %v351_v46 = vld [vmem:[%s3873_s5] sm:$0xff] }
 0x2ce   :  { %v330_v40 = vmax.f32 %v328_v21, %v329_v34  ;;  %v421_v27 = vmax.f32 %v419_v33, %v420_v39  ;;  %v345_v34 = vld [vmem:[%s3870_s2] sm:$0xff] }
 0x2d0   :  { %v331_v35 = vrot.slane %v330_v40, 1  ;;  %v422_v36 = vrot.slane %v421_v27, 4 }
 0x2d2   :  { %v332_v44 = vmax.f32 %v330_v40, %v331_v35  ;;  %v423_v45 = vmax.f32 %v421_v27, %v422_v36 }
 0x2d4   :  { %v424_v47 = vrot.slane %v423_v45, 2  ;;  %v3139_v50 = vmax.f32 %v271_v41, %v332_v44 }
 0x2d6   :  { %v425_v49 = vmax.f32 %v423_v45, %v424_v47  ;;  %v3142_v30 = vsub.f32 1.0, %v3139_v50 }
 0x2d8   :  { %v426_v53 = vrot.slane %v425_v49, 1 }
 0x2da   :  { %v427_v59 = vmax.f32 %v425_v49, %v426_v53 }
 0x2dc   :  { %v428_v43 = vmul.f32 %v427_v59, %v3142_v30 }
 0x2de   :  { %v432_v62 = vmul.f32 %v428_v43, %v2938_v3  ;;  %v430_v9 = vmul.f32 %v428_v43, %v2928_v1  ;;  %v429_v12 = vmul.f32 %v428_v43, %v2923_v0  ;;  %v431_v32 = vmul.f32 %v428_v43, %v2933_v2 }
 0x2df   :  { %v433_v28 = vmul.f32 %v428_v43, %v2943_v4  ;;  %v434_v29 = vmul.f32 %v428_v43, %v2948_v5  ;;  %v435_v21 = vmul.f32 %v428_v43, %v2953_v6  ;;  %v436_v33 = vmul.f32 %v428_v43, %v2958_v7 }
 0x2e0   :  { %443 = vmax.xlane.f32.xlu2 %v432_v62  ;;  %439 = vmax.xlane.f32.xlu1 %v430_v9 }
 0x2e1   :  { %437 = vmax.xlane.f32.xlu0 %v429_v12 }
 0x2e9   :  { %441 = vmax.xlane.f32.xlu0 %v431_v32 }
 0x2f8   :  { %556 = vperm.xlu2 %2672, %v349_v15  }
 0x2fd   :  { %561 = vperm.xlu0 %2673, %v350_v38  }
 0x300   :  { %611 = vperm.xlu2 %2672, %v346_v16  }
 0x308   :  { %680 = vperm.xlu2 %2672, %v353_v17  }
 0x310   :  { %685 = vperm.xlu2 %2672, %v354_v18  }
 0x318   :  { %693 = vperm.xlu2 %2672, %v355_v20  }
 0x320   :  { %698 = vperm.xlu2 %2672, %v356_v26  }
 0x327   :  { %445 = vmax.xlane.f32.xlu0 %v433_v28 }
 0x328   :  { %744 = vperm.xlu2 %2672, %v357_v56  }
 0x32f   :  { %447 = vmax.xlane.f32.xlu0 %v434_v29 }
 0x330   :  { %749 = vperm.xlu2 %2672, %v358_v31  }
 0x337   :  { %449 = vmax.xlane.f32.xlu0 %v435_v21 }
 0x338   :  { %765 = vperm.xlu2 %2672, %v351_v46  }
 0x33f   :  { %451 = vmax.xlane.f32.xlu0 %v436_v33 }
 0x340   :  { %770 = vperm.xlu2 %2672, %v352_v22  }
 0x353   :  { %606 = vperm.xlu0 %2673, %v345_v34   ;;  %v440_v27 = vpop.xlane.xlu1 %439  ;;  %v444_v53 = vpop.xlane.xlu2 %443 }
 0x354   :  { %v438_v39 = vpop.xlane.xlu0 %437  ;;  %v454_v35 = vmul.f32 %v440_v27, %v3056_v54  ;;  %v456_v59 = vmul.f32 %v444_v53, %v3070_v60 }
 0x355   :  { %v453_v40 = vmul.f32 %v438_v39, %v3050_v51 }
 0x356   :  { %v462_v44 = vmul.f32 0.5, %v454_v35  ;;  %v464_v62 = vmul.f32 0.5, %v456_v59 }
 0x357   :  { %v461_v42 = vmul.f32 0.5, %v453_v40 }
 0x358   :  { %v470_v41 = vsub.f32 %v3060_v55, %v462_v44  ;;  %v472_v9 = vsub.f32 %v3074_v61, %v464_v62 }
 0x359   :  { %v469_v36 = vsub.f32 %v3053_v52, %v461_v42 }
 0x35b   :  { %509 = vxpose.xlu1.b32.start [1/8] (short) (narrow) %v469_v36, 8  ;;  %v557_v33 = vpop.permute.xlu2 %556 }
 0x35c   :  { %v442_v45 = vpop.xlane.xlu0 %441 }
 0x35d   :  { %v455_v47 = vmul.f32 %v442_v45, %v3063_v57 }
 0x35f   :  { %v463_v49 = vmul.f32 0.5, %v455_v47 }
 0x361   :  { %v471_v43 = vsub.f32 %v3067_v58, %v463_v49 }
 0x363   :  { %510 = vxpose.xlu1.b32.cont [2/8] (short) (narrow) %v470_v41, 8 }
 0x36b   :  { %511 = vxpose.xlu1.b32.cont [3/8] (short) (narrow) %v471_v43, 8 }
 0x36f   :  { %v562_v12 = vpop.permute.xlu0 %561 }
 0x373   :  { %512 = vxpose.xlu1.b32.cont [4/8] (short) (narrow) %v472_v9, 8 }
 0x375   :  { %477 = vxpose.xlu0.b32.start [1/8] (short) (narrow) %v3053_v52, 8 }
 0x37d   :  { %478 = vxpose.xlu0.b32.cont [2/8] (short) (narrow) %v3060_v55, 8 }
 0x385   :  { %479 = vxpose.xlu0.b32.cont [3/8] (short) (narrow) %v3067_v58, 8 }
 0x38d   :  { %480 = vxpose.xlu0.b32.cont [4/8] (short) (narrow) %v3074_v61, 8 }
 0x395   :  { %481 = vxpose.xlu0.b32.cont [5/8] (short) (narrow) %v3081_v8, 8 }
 0x39a   :  { %v446_v32 = vpop.xlane.xlu0 %445 }
 0x39b   :  { %v457_v15 = vmul.f32 %v446_v32, %v3077_v63 }
 0x39d   :  { %v465_v38 = vmul.f32 0.5, %v457_v15  ;;  %482 = vxpose.xlu0.b32.cont [6/8] (short) (narrow) %v3088_v11, 8 }
 0x39f   :  { %v473_v16 = vsub.f32 %v3081_v8, %v465_v38 }
 0x3a1   :  { %513 = vxpose.xlu1.b32.cont [5/8] (short) (narrow) %v473_v16, 8 }
 0x3a2   :  { %v448_v17 = vpop.xlane.xlu0 %447 }
 0x3a3   :  { %v458_v52 = vmul.f32 %v448_v17, %v3084_v10 }
 0x3a5   :  { %v466_v55 = vmul.f32 0.5, %v458_v52  ;;  %483 = vxpose.xlu0.b32.cont [7/8] (short) (narrow) %v3095_v14, 8 }
 0x3a7   :  { %v474_v58 = vsub.f32 %v3088_v11, %v466_v55 }
 0x3a9   :  { %514 = vxpose.xlu1.b32.cont [6/8] (short) (narrow) %v474_v58, 8  ;;  %v612_v58 = vpop.permute.xlu2 %611 }
 0x3aa   :  { %v450_v61 = vpop.xlane.xlu0 %449 }
 0x3ab   :  { %v459_v18 = vmul.f32 %v450_v61, %v3091_v13 }
 0x3ad   :  { %v467_v20 = vmul.f32 0.5, %v459_v18  ;;  %484 = vxpose.xlu0.b32.end [8/8] (short) (narrow) %v3105_v23, 8 }
 0x3af   :  { %v475_v26 = vsub.f32 %v3095_v14, %v467_v20 }
 0x3b1   :  { %515 = vxpose.xlu1.b32.cont [7/8] (short) (narrow) %v475_v26, 8 }
 0x3b2   :  { %v452_v8 = vpop.xlane.xlu0 %451 }
 0x3b3   :  { %v460_v28 = vmul.f32 %v452_v8, %v3100_v19 }
 0x3b5   :  { %v468_v56 = vmul.f32 0.5, %v460_v28 }
 0x3b7   :  { %v476_v29 = vsub.f32 %v3105_v23, %v468_v56 }
 0x3b9   :  { %516 = vxpose.xlu1.b32.end [8/8] (short) (narrow) %v476_v29, 8 }
 0x3c5   :  { %v607_v27 = vpop.permute.xlu0 %606 }
 0x419   :  { %v493_v23 = vpop.trf.xlu0 }
 0x41a   :  { %vm634_vm3 = vweird.f32 %v493_v23 }
 0x425   :  { %v525_v31 = vpop.trf.xlu1 }
 0x426   :  { %v551_v21 = vperm.slane %v525_v31, 0 }
 0x428   :  { %v552_v11 = vmul.f32 %v551_v21, %v3120_v25  ;;  %v553_v46 = vmul.f32 %v551_v21, %v3109_v24 }
 0x42a   :  { %v564_v22 = vadd.f32 %v557_v33, %v552_v11  ;;  %v565_v34 = vadd.f32 %v562_v12, %v553_v46  ;;  %v640_v33 = vand.u32 2147483648, %v493_v23 }
 0x42c   :  { %v2644_v39 = vmul.f32 -1.442695, %v564_v22  ;;  %v2645_v40 = vmul.f32 -1.442695, %v565_v34  ;;  %v638_v34 = vand.u32 2147483647, %v493_v23 }
 0x42e   :  { %2683 = vpow2.f32 %v2644_v39  ;;  %vm639_vm6 = vcmp.eq.f32.partialorder %v638_v34, 8.507059e+37 }
 0x42f   :  { %2685 = vpow2.f32 %v2645_v40 }
 0x434   :  { %v2684_v14 = vpop.eup %2683 }
 0x435   :  { %v2686_v42 = vpop.eup %2685  ;;  %v572_v35 = vadd.f32 1.0, %v2684_v14  ;;  %v641_v14 = vor.u32 1.1754944e-38, %v640_v33 }
 0x436   :  { %v573_v36 = vadd.f32 1.0, %v2686_v42 }
 0x437   :  { %2687 = vrcp.f32 %v572_v35  ;;  %v585_v47 = vand.u32 2147483648, %v572_v35  ;;  %v583_v59 = vand.u32 2147483647, %v572_v35  ;;  %vm579_vm12 = vweird.f32 %v572_v35 }
 0x438   :  { %2689 = vrcp.f32 %v573_v36  ;;  %v600_v43 = vand.u32 2147483648, %v573_v36  ;;  %v598_v9 = vand.u32 2147483647, %v573_v36  ;;  %vm594_vm14 = vweird.f32 %v573_v36 }
 0x439   :  { %2691 = vrcp.f32 %v493_v23  ;;  %v586_v15 = vor.u32 1.1754944e-38, %v585_v47  ;;  %vm584_vm15 = vcmp.eq.f32.partialorder %v583_v59, 8.507059e+37 }
 0x43a   :  { %v601_v16 = vor.u32 1.1754944e-38, %v600_v43  ;;  %vm599_vm1 = vcmp.eq.f32.partialorder %v598_v9, 8.507059e+37 }
 0x43d   :  { %v2688_v44 = vpop.eup %2687 }
 0x43e   :  { %v2690_v45 = vpop.eup %2689  ;;  %v575_v25 = vmul.f32 %v2688_v44, %v572_v35  ;;  %vm580_vm10 = vweird.f32 %v2688_v44 }
 0x43f   :  { %v590_v41 = vmul.f32 %v2690_v45, %v573_v36  ;;  %vm595_vm11 = vweird.f32 %v2690_v45  ;;  %v2692_v32 = vpop.eup %2691  ;;  %vm581_vm13 = vmor %vm579_vm12, %vm580_vm10 }
 0x440   :  { %v576_v24 = vsub.f32 1.0, %v575_v25  ;;  %vm596_vm0 = vmor %vm594_vm14, %vm595_vm11  ;;  %v630_v61 = vmul.f32 %v2692_v32, %v493_v23  ;;  %vm635_vm4 = vweird.f32 %v2692_v32 }
 0x441   :  { %v591_v49 = vsub.f32 1.0, %v590_v41  ;;  %vm636_vm5 = vmor %vm634_vm3, %vm635_vm4  ;;  %v681_v41 = vpop.permute.xlu2 %680 }
 0x442   :  { %v577_v53 = vmul.f32 %v2688_v44, %v576_v24  ;;  %v631_v56 = vsub.f32 1.0, %v630_v61 }
 0x443   :  { %v592_v62 = vmul.f32 %v2690_v45, %v591_v49 }
 0x444   :  { %v578_v12 = vadd.f32 %v2688_v44, %v577_v53  ;;  %v632_v21 = vmul.f32 %v2692_v32, %v631_v56  ;;  %v3230_v53 = vstv %s3881_s13 }
 0x445   :  { %v593_v38 = vadd.f32 %v2690_v45, %v592_v62 }
 0x446   :  { %v582_v17 = vsel %vm581_vm13, %v2688_v44, %v578_v12  ;;  %v633_v22 = vadd.f32 %v2692_v32, %v632_v21 }
 0x447   :  { %v587_v52 = vsel %vm584_vm15, %v586_v15, %v582_v17  ;;  %v597_v55 = vsel %vm596_vm0, %v2690_v45, %v593_v38 }
 0x448   :  { %v602_v18 = vsel %vm599_vm1, %v601_v16, %v597_v55  ;;  %v614_v20 = vmul.f32 %v607_v27, %v587_v52  ;;  %v3218_v27 = vsub.f32 1.0, %v3044_v48  ;;  %v637_v35 = vsel %vm636_vm5, %v2692_v32, %v633_v22 }
 0x449   :  { %v615_v26 = vmul.f32 %v612_v58, %v602_v18  ;;  %v642_v44 = vsel %vm639_vm6, %v641_v14, %v637_v35  ;;  %v686_v24 = vpop.permute.xlu2 %685 }
 0x44a   :  { %v617_v8 = vsel %vm616_vm2, %v614_v20, 0.0 }
 0x44b   :  { %v618_v28 = vsel %vm616_vm2, %v615_v26, 0.0 }
 0x44c   :  { %v619_v29 = vadd.f32 %v618_v28, %v617_v8 }
 0x44e   :  { %v620_v31 = vrot.slane %v619_v29, 4 }
 0x450   :  { %v621_v11 = vadd.f32 %v620_v31, %v619_v29 }
 0x451   :  { %v694_v47 = vpop.permute.xlu2 %693 }
 0x452   :  { %v622_v46 = vrot.slane %v621_v11, 2 }
 0x454   :  { %v623_v39 = vadd.f32 %v622_v46, %v621_v11 }
 0x456   :  { %v624_v40 = vrot.slane %v623_v39, 1 }
 0x458   :  { %v625_v42 = vadd.f32 %v624_v40, %v623_v39 }
 0x459   :  { %v699_v49 = vpop.permute.xlu2 %698 }
 0x45a   :  { %v3221_v36 = vmul.f32 %v625_v42, %v3218_v27 }
 0x45c   :  { %v644_v45 = vmul.f32 %v642_v44, %v3221_v36 }
 0x45e   :  { %v646_v25 = vrot.slane %v644_v45, 7 }
 0x460   :  { %v649_v23 = vsel %vm648_vm7, %v3221_v36, %v646_v25 }
 0x461   :  { %2646 = vmatmul.msk.f32.vlgmr.msra.gmra.mxu0 %vm616_vm2, %v649_v23  ;;  %v745_v38 = vpop.permute.xlu2 %744 }
 0x469   :  { %v750_v18 = vpop.permute.xlu2 %749 }
 0x471   :  { %v766_v34 = vpop.permute.xlu2 %765 }
 0x4de   :  { %v3232_v59 = vpop.f32.mrf.mxu0 }
 0x4df   :  { %v673_v43 = vmax.f32 %v3232_v59, 0.0 }
 0x4e1   :  { %v674_v62 = vsub.f32 %v3230_v53, %v673_v43 }
 0x4e3   :  { %v3237_v9 = vmul.f32 %v674_v62, %v3142_v30 }
 0x4e5   :  { %v688_v12 = vperm.slane %v3237_v9, 0  ;;  %v741_v52 = vsub.f32 %v3237_v9, %v3230_v53 }
 0x4e7   :  { %v689_v32 = vmul.f32 %v688_v12, %v681_v41  ;;  %v690_v15 = vmul.f32 %v688_v12, %v686_v24  ;;  %v752_v61 = vperm.slane %v741_v52, 0 }
 0x4e9   :  { %v701_v16 = vadd.f32 %v694_v47, %v689_v32  ;;  %v702_v17 = vadd.f32 %v699_v49, %v690_v15  ;;  %v753_v20 = vmul.f32 %v752_v61, %v745_v38  ;;  %v754_v8 = vmul.f32 %v752_v61, %v750_v18 }
 0x4eb   :  { %v2647_v55 = vmul.f32 -1.442695, %v701_v16  ;;  %v2648_v58 = vmul.f32 -1.442695, %v702_v17  ;;  %v755_v31 = vmax.f32 %v753_v20, 0.0  ;;  %v756_v21 = vmax.f32 %v754_v8, 0.0  ;;  %v771_v16 = vpop.permute.xlu2 %770 }
 0x4ed   :  { %2693 = vpow2.f32 %v2647_v55  ;;  %v757_v11 = vmul.f32 -0.6931472, %v755_v31  ;;  %v758_v46 = vmul.f32 -0.6931472, %v756_v21 }
 0x4ee   :  { %2695 = vpow2.f32 %v2648_v58 }
 0x4ef   :  { %v759_v14 = vmul.f32 1.442695, %v757_v11  ;;  %v761_v35 = vmul.f32 1.442695, %v758_v46 }
 0x4f3   :  { %v2694_v26 = vpop.eup %2693 }
 0x4f4   :  { %v2696_v28 = vpop.eup %2695  ;;  %v709_v56 = vadd.f32 1.0, %v2694_v26 }
 0x4f5   :  { %v710_v29 = vadd.f32 1.0, %v2696_v28 }
 0x4f6   :  { %2697 = vrcp.f32 %v709_v56  ;;  %v722_v44 = vand.u32 2147483648, %v709_v56  ;;  %v720_v23 = vand.u32 2147483647, %v709_v56  ;;  %vm716_vm10 = vweird.f32 %v709_v56 }
 0x4f7   :  { %2699 = vrcp.f32 %v710_v29  ;;  %v737_v41 = vand.u32 2147483648, %v710_v29  ;;  %v735_v47 = vand.u32 2147483647, %v710_v29  ;;  %vm731_vm12 = vweird.f32 %v710_v29 }
 0x4f8   :  { %2701 = vpow2.f32 %v759_v14  ;;  %v723_v43 = vor.u32 1.1754944e-38, %v722_v44  ;;  %vm721_vm13 = vcmp.eq.f32.partialorder %v720_v23, 8.507059e+37 }
 0x4f9   :  { %2703 = vpow2.f32 %v761_v35  ;;  %v738_v32 = vor.u32 1.1754944e-38, %v737_v41  ;;  %vm736_vm15 = vcmp.eq.f32.partialorder %v735_v47, 8.507059e+37 }
 0x4fc   :  { %v2698_v33 = vpop.eup %2697 }
 0x4fd   :  { %v2700_v22 = vpop.eup %2699  ;;  %v712_v39 = vmul.f32 %v2698_v33, %v709_v56  ;;  %vm717_vm8 = vweird.f32 %v2698_v33 }
 0x4fe   :  { %v727_v40 = vmul.f32 %v2700_v22, %v710_v29  ;;  %vm732_vm9 = vweird.f32 %v2700_v22  ;;  %vm718_vm11 = vmor %vm716_vm10, %vm717_vm8  ;;  %v2702_v55 = vpop.eup %2701 }
 0x4ff   :  { %v713_v42 = vsub.f32 1.0, %v712_v39  ;;  %vm733_vm14 = vmor %vm731_vm12, %vm732_vm9  ;;  %v2704_v61 = vpop.eup %2703 }
 0x500   :  { %v728_v45 = vsub.f32 1.0, %v727_v40 }
 0x501   :  { %v714_v25 = vmul.f32 %v2698_v33, %v713_v42 }
 0x502   :  { %v729_v24 = vmul.f32 %v2700_v22, %v728_v45 }
 0x503   :  { %v715_v49 = vadd.f32 %v2698_v33, %v714_v25 }
 0x504   :  { %v730_v62 = vadd.f32 %v2700_v22, %v729_v24 }
 0x505   :  { %v719_v12 = vsel %vm718_vm11, %v2698_v33, %v715_v49 }
 0x506   :  { %v724_v15 = vsel %vm721_vm13, %v723_v43, %v719_v12  ;;  %v734_v38 = vsel %vm733_vm14, %v2700_v22, %v730_v62  ;;  %v789_v62 = vld [vmem:[%s3872_s4 + $0x10] sm:$0xff] }
 0x507   :  { %v739_v17 = vsel %vm736_vm15, %v738_v32, %v734_v38  ;;  %v773_v52 = vmul.f32 %v766_v34, %v724_v15 }
 0x508   :  { %v774_v58 = vmul.f32 %v771_v16, %v739_v17  ;;  %v788_v17 = vld [vmem:[%s3871_s3 + $0x18] sm:$0xff] }
 0x509   :  { %v775_v18 = vmul.f32 %v2702_v55, %v773_v52  ;;  %v787_v55 = vld [vmem:[%s3871_s3 + $0x10] sm:$0xff] }
 0x50a   :  { %v776_v20 = vmul.f32 %v2704_v61, %v774_v58 }
 0x50c   :  { %v777_v26 = vadd.f32 %v776_v20, %v775_v18 }
 0x50e   :  { %v778_v8 = vrot.slane %v777_v26, 4 }
 0x510   :  { %v779_v28 = vadd.f32 %v778_v8, %v777_v26 }
 0x512   :  { %v780_v56 = vrot.slane %v779_v28, 2 }
 0x514   :  { %v781_v29 = vadd.f32 %v780_v56, %v779_v28 }
 0x516   :  { %v782_v31 = vrot.slane %v781_v29, 1 }
 0x518   :  { %v783_v21 = vadd.f32 %v782_v31, %v781_v29 }
 0x51a   :  { %v3243_v11 = vmul.f32 %v783_v21, %v3142_v30 }
 0x51c   :  { %v801_v46 = vmul.f32 %v3243_v11, %v2933_v2  ;;  %v800_v33 = vmul.f32 %v3243_v11, %v2928_v1  ;;  %v799_v22 = vmul.f32 %v3243_v11, %v2923_v0  ;;  %v802_v34 = vmul.f32 %v3243_v11, %v2938_v3 }
 0x51d   :  { %v803_v39 = vmul.f32 %v3243_v11, %v2943_v4  ;;  %v804_v40 = vmul.f32 %v3243_v11, %v2948_v5  ;;  %v805_v14 = vmul.f32 %v3243_v11, %v2953_v6  ;;  %v806_v42 = vmul.f32 %v3243_v11, %v2958_v7 }
 0x51e   :  { %811 = vadd.xlane.f32.xlu1 %v801_v46  ;;  %809 = vadd.xlane.f32.xlu0 %v800_v33 }
 0x51f   :  { %807 = vadd.xlane.f32.xlu2 %v799_v22 }
 0x527   :  { %813 = vadd.xlane.f32.xlu2 %v802_v34 }
 0x52f   :  { %815 = vadd.xlane.f32.xlu2 %v803_v39 }
 0x537   :  { %817 = vadd.xlane.f32.xlu2 %v804_v40 }
 0x53f   :  { %819 = vadd.xlane.f32.xlu2 %v805_v14 }
 0x547   :  { %821 = vadd.xlane.f32.xlu2 %v806_v42 }
 0x591   :  { %v810_v45 = vpop.xlane.xlu0 %809  ;;  %v812_v41 = vpop.xlane.xlu1 %811 }
 0x592   :  { %v808_v35 = vpop.xlane.xlu2 %807  ;;  %v3266_v23 = vmul.f32 %v810_v45, %v3056_v54  ;;  %v3270_v47 = vmul.f32 %v812_v41, %v3063_v57 }
 0x593   :  { %v3262_v44 = vmul.f32 %v808_v35, %v3050_v51 }
 0x595   :  { %833 = vperm.xlu2 %2672, %v3262_v44  }
 0x59a   :  { %v814_v25 = vpop.xlane.xlu2 %813 }
 0x59b   :  { %v3281_v12 = vmul.f32 %v814_v25, %v3070_v60 }
 0x59d   :  { %838 = vperm.xlu2 %2672, %v3266_v23  }
 0x5a2   :  { %v816_v24 = vpop.xlane.xlu2 %815 }
 0x5a3   :  { %v3273_v49 = vmul.f32 %v816_v24, %v3077_v63 }
 0x5a5   :  { %843 = vperm.xlu2 %2672, %v3270_v47   ;;  %853 = vperm.xlu1 %2674, %v3273_v49  }
 0x5aa   :  { %v818_v43 = vpop.xlane.xlu2 %817 }
 0x5ab   :  { %v3285_v15 = vmul.f32 %v818_v43, %v3084_v10 }
 0x5ad   :  { %848 = vperm.xlu2 %2672, %v3281_v12   ;;  %1020 = vperm.xlu1 %2674, %v789_v62  }
 0x5b2   :  { %v820_v32 = vpop.xlane.xlu2 %819 }
 0x5b3   :  { %v3288_v38 = vmul.f32 %v820_v32, %v3091_v13 }
 0x5b5   :  { %858 = vperm.xlu2 %2672, %v3285_v15   ;;  %863 = vperm.xlu0 %2673, %v3288_v38  }
 0x5ba   :  { %v822_v16 = vpop.xlane.xlu2 %821 }
 0x5bb   :  { %v3296_v52 = vmul.f32 %v822_v16, %v3100_v19 }
 0x5bd   :  { %1012 = vperm.xlu0 %2673, %v788_v17   ;;  %868 = vperm.xlu2 %2672, %v3296_v52  }
 0x5c5   :  { %1007 = vperm.xlu2 %2672, %v787_v55  }
 0x5ef   :  { %v834_v58 = vpop.permute.xlu2 %833 }
 0x5f0   :  { %v871_v29 = vmul.f32 %v834_v58, %v2923_v0 }
 0x5f7   :  { %v839_v61 = vpop.permute.xlu2 %838 }
 0x5f8   :  { %v872_v46 = vmul.f32 %v839_v61, %v2928_v1 }
 0x5ff   :  { %v844_v18 = vpop.permute.xlu2 %843 }
 0x600   :  { %v873_v22 = vmul.f32 %v844_v18, %v2933_v2 }
 0x607   :  { %v849_v20 = vpop.permute.xlu2 %848 }
 0x608   :  { %v874_v34 = vmul.f32 %v849_v20, %v2938_v3 }
 0x60f   :  { %v859_v26 = vpop.permute.xlu2 %858 }
 0x610   :  { %v876_v31 = vmul.f32 %v859_v26, %v2948_v5 }
 0x612   :  { %v880_v14 = vmax.f32 %v872_v46, %v876_v31  ;;  %v785_v31 = vld [vmem:[%s3870_s2 + $0x10] sm:$0xff] }
 0x613   :  { %v793_v46 = vld [vmem:[%s3874_s6 + $0x10] sm:$0xff] }
 0x617   :  { %v854_v8 = vpop.permute.xlu1 %853  ;;  %v869_v28 = vpop.permute.xlu2 %868 }
 0x618   :  { %v875_v56 = vmul.f32 %v854_v8, %v2943_v4  ;;  %v878_v21 = vmul.f32 %v869_v28, %v2958_v7 }
 0x61a   :  { %v879_v39 = vmax.f32 %v871_v29, %v875_v56  ;;  %v882_v42 = vmax.f32 %v874_v34, %v878_v21  ;;  %v790_v29 = vld [vmem:[%s3872_s4 + $0x18] sm:$0xff] }
 0x61b   :  { %v786_v21 = vld [vmem:[%s3870_s2 + $0x18] sm:$0xff] }
 0x61c   :  { %v883_v45 = vmax.f32 %v879_v39, %v880_v14  ;;  %v796_v34 = vld [vmem:[%s3875_s7 + $0x18] sm:$0xff]  ;;  %v797_v39 = vld [vmem:[%s3876_s8 + $0x10] sm:$0xff] }
 0x61d   :  { %v791_v14 = vld [vmem:[%s3873_s5 + $0x10] sm:$0xff] }
 0x627   :  { %v864_v33 = vpop.permute.xlu0 %863 }
 0x628   :  { %v877_v40 = vmul.f32 %v864_v33, %v2953_v6  ;;  %v794_v33 = vld [vmem:[%s3874_s6 + $0x18] sm:$0xff] }
 0x62a   :  { %v881_v35 = vmax.f32 %v873_v22, %v877_v40  ;;  %v795_v22 = vld [vmem:[%s3875_s7 + $0x10] sm:$0xff]  ;;  %v798_v40 = vld [vmem:[%s3876_s8 + $0x18] sm:$0xff] }
 0x62c   :  { %v884_v25 = vmax.f32 %v881_v35, %v882_v42  ;;  %v1008_v42 = vpop.permute.xlu2 %1007  ;;  %v1021_v35 = vpop.permute.xlu1 %1020 }
 0x62e   :  { %v885_v41 = vmax.f32 %v883_v45, %v884_v25  ;;  %v792_v45 = vld [vmem:[%s3873_s5 + $0x18] sm:$0xff] }
 0x630   :  { %v886_v24 = vrot.slane %v885_v41, 4 }
 0x632   :  { %v887_v43 = vmax.f32 %v885_v41, %v886_v24  ;;  %v1013_v24 = vpop.permute.xlu0 %1012 }
 0x634   :  { %v888_v62 = vrot.slane %v887_v43, 2 }
 0x636   :  { %v889_v32 = vmax.f32 %v887_v43, %v888_v62 }
 0x638   :  { %v890_v16 = vrot.slane %v889_v32, 1 }
 0x63a   :  { %v891_v17 = vmax.f32 %v889_v32, %v890_v16 }
 0x63c   :  { %v892_v55 = vmul.f32 %v891_v17, %v3142_v30 }
 0x63e   :  { %v895_v58 = vmul.f32 %v892_v55, %v2933_v2  ;;  %v894_v61 = vmul.f32 %v892_v55, %v2928_v1  ;;  %v893_v18 = vmul.f32 %v892_v55, %v2923_v0  ;;  %v899_v20 = vmul.f32 %v892_v55, %v2953_v6 }
 0x63f   :  { %v897_v26 = vmul.f32 %v892_v55, %v2943_v4  ;;  %v896_v8 = vmul.f32 %v892_v55, %v2938_v3  ;;  %v900_v28 = vmul.f32 %v892_v55, %v2958_v7  ;;  %v898_v56 = vmul.f32 %v892_v55, %v2948_v5 }
 0x640   :  { %905 = vmax.xlane.f32.xlu0 %v895_v58  ;;  %903 = vmax.xlane.f32.xlu1 %v894_v61 }
 0x641   :  { %901 = vmax.xlane.f32.xlu2 %v893_v18 }
 0x648   :  { %913 = vmax.xlane.f32.xlu0 %v899_v20  ;;  %909 = vmax.xlane.f32.xlu1 %v897_v26 }
 0x649   :  { %907 = vmax.xlane.f32.xlu2 %v896_v8 }
 0x650   :  { %915 = vmax.xlane.f32.xlu1 %v900_v28 }
 0x651   :  { %911 = vmax.xlane.f32.xlu2 %v898_v56 }
 0x669   :  { %1025 = vperm.xlu2 %2672, %v790_v29   ;;  %1070 = vperm.xlu1 %2674, %v785_v31  }
 0x671   :  { %1075 = vperm.xlu2 %2672, %v786_v21  }
 0x679   :  { %1143 = vperm.xlu2 %2672, %v793_v46  }
 0x681   :  { %1148 = vperm.xlu2 %2672, %v794_v33  }
 0x689   :  { %1156 = vperm.xlu2 %2672, %v795_v22  }
 0x691   :  { %1161 = vperm.xlu2 %2672, %v796_v34  }
 0x699   :  { %1207 = vperm.xlu2 %2672, %v797_v39  }
 0x69e   :  { %941 = vxpose.xlu1.b32.start [1/8] (short) (narrow) %v3262_v44, 8 }
 0x6a1   :  { %1212 = vperm.xlu2 %2672, %v798_v40  }
 0x6a6   :  { %942 = vxpose.xlu1.b32.cont [2/8] (short) (narrow) %v3266_v23, 8 }
 0x6a9   :  { %1228 = vperm.xlu2 %2672, %v791_v14  }
 0x6ae   :  { %943 = vxpose.xlu1.b32.cont [3/8] (short) (narrow) %v3270_v47, 8 }
 0x6b1   :  { %1233 = vperm.xlu2 %2672, %v792_v45  }
 0x6b3   :  { %v904_v43 = vpop.xlane.xlu1 %903  ;;  %v906_v55 = vpop.xlane.xlu0 %905 }
 0x6b4   :  { %v902_v25 = vpop.xlane.xlu2 %901  ;;  %v918_v32 = vmul.f32 %v904_v43, %v3056_v54  ;;  %v919_v58 = vmul.f32 %v906_v55, %v3063_v57 }
 0x6b5   :  { %v917_v41 = vmul.f32 %v902_v25, %v3050_v51 }
 0x6b6   :  { %944 = vxpose.xlu1.b32.cont [4/8] (short) (narrow) %v3281_v12, 8  ;;  %v926_v17 = vmul.f32 0.5, %v918_v32  ;;  %v927_v18 = vmul.f32 0.5, %v919_v58 }
 0x6b7   :  { %v925_v62 = vmul.f32 0.5, %v917_v41 }
 0x6b8   :  { %v934_v61 = vsub.f32 %v3266_v23, %v926_v17  ;;  %v935_v26 = vsub.f32 %v3270_v47, %v927_v18 }
 0x6b9   :  { %v933_v16 = vsub.f32 %v3262_v44, %v925_v62 }
 0x6bb   :  { %973 = vxpose.xlu0.b32.start [1/8] (short) (narrow) %v933_v16, 8  ;;  %v910_v28 = vpop.xlane.xlu1 %909  ;;  %v914_v33 = vpop.xlane.xlu0 %913 }
 0x6bc   :  { %v908_v20 = vpop.xlane.xlu2 %907  ;;  %v921_v56 = vmul.f32 %v910_v28, %v3077_v63  ;;  %v923_v22 = vmul.f32 %v914_v33, %v3091_v13 }
 0x6bd   :  { %v920_v8 = vmul.f32 %v908_v20, %v3070_v60 }
 0x6be   :  { %945 = vxpose.xlu1.b32.cont [5/8] (short) (narrow) %v3273_v49, 8  ;;  %v929_v23 = vmul.f32 0.5, %v921_v56  ;;  %v931_v39 = vmul.f32 0.5, %v923_v22 }
 0x6bf   :  { %v928_v44 = vmul.f32 0.5, %v920_v8 }
 0x6c0   :  { %v937_v21 = vsub.f32 %v3273_v49, %v929_v23 }
 0x6c1   :  { %v936_v29 = vsub.f32 %v3281_v12, %v928_v44  ;;  %v939_v12 = vsub.f32 %v3288_v38, %v931_v39 }
 0x6c3   :  { %974 = vxpose.xlu0.b32.cont [2/8] (short) (narrow) %v934_v61, 8  ;;  %v916_v40 = vpop.xlane.xlu1 %915 }
 0x6c4   :  { %v912_v31 = vpop.xlane.xlu2 %911  ;;  %v924_v14 = vmul.f32 %v916_v40, %v3100_v19 }
 0x6c5   :  { %v922_v47 = vmul.f32 %v912_v31, %v3084_v10 }
 0x6c6   :  { %946 = vxpose.xlu1.b32.cont [6/8] (short) (narrow) %v3285_v15, 8  ;;  %v932_v45 = vmul.f32 0.5, %v924_v14 }
 0x6c7   :  { %v930_v46 = vmul.f32 0.5, %v922_v47 }
 0x6c8   :  { %v940_v49 = vsub.f32 %v3296_v52, %v932_v45 }
 0x6c9   :  { %v938_v34 = vsub.f32 %v3285_v15, %v930_v46 }
 0x6cb   :  { %975 = vxpose.xlu0.b32.cont [3/8] (short) (narrow) %v935_v26, 8 }
 0x6cc   :  { %v1026_v32 = vpop.permute.xlu2 %1025 }
 0x6ce   :  { %947 = vxpose.xlu1.b32.cont [7/8] (short) (narrow) %v3288_v38, 8 }
 0x6d3   :  { %976 = vxpose.xlu0.b32.cont [4/8] (short) (narrow) %v936_v29, 8 }
 0x6d4   :  { %v1076_v14 = vpop.permute.xlu2 %1075 }
 0x6d6   :  { %948 = vxpose.xlu1.b32.end [8/8] (short) (narrow) %v3296_v52, 8 }
 0x6db   :  { %977 = vxpose.xlu0.b32.cont [5/8] (short) (narrow) %v937_v21, 8  ;;  %v1071_v38 = vpop.permute.xlu1 %1070 }
 0x6e3   :  { %978 = vxpose.xlu0.b32.cont [6/8] (short) (narrow) %v938_v34, 8 }
 0x6eb   :  { %979 = vxpose.xlu0.b32.cont [7/8] (short) (narrow) %v939_v12, 8 }
 0x6f3   :  { %980 = vxpose.xlu0.b32.end [8/8] (short) (narrow) %v940_v49, 8 }
 0x742   :  { %v957_v52 = vpop.trf.xlu1 }
 0x743   :  { %vm1097_vm10 = vweird.f32 %v957_v52 }
 0x75f   :  { %v989_v25 = vpop.trf.xlu0 }
 0x760   :  { %v1015_v41 = vperm.slane %v989_v25, 0 }
 0x762   :  { %v1016_v43 = vmul.f32 %v1015_v41, %v1008_v42  ;;  %v1017_v62 = vmul.f32 %v1015_v41, %v1013_v24 }
 0x764   :  { %v1028_v16 = vadd.f32 %v1021_v35, %v1016_v43  ;;  %v1029_v17 = vadd.f32 %v1026_v32, %v1017_v62 }
 0x766   :  { %v2649_v15 = vmul.f32 -1.442695, %v1028_v16  ;;  %v2650_v55 = vmul.f32 -1.442695, %v1029_v17 }
 0x768   :  { %2705 = vpow2.f32 %v2649_v15 }
 0x769   :  { %2707 = vpow2.f32 %v2650_v55 }
 0x76e   :  { %v2706_v58 = vpop.eup %2705 }
 0x76f   :  { %v2708_v61 = vpop.eup %2707  ;;  %v1036_v18 = vadd.f32 1.0, %v2706_v58 }
 0x770   :  { %v1037_v20 = vadd.f32 1.0, %v2708_v61  ;;  %v1103_v61 = vand.u32 2147483648, %v957_v52 }
 0x771   :  { %2709 = vrcp.f32 %v1036_v18  ;;  %v1049_v35 = vand.u32 2147483648, %v1036_v18  ;;  %v1047_v29 = vand.u32 2147483647, %v1036_v18  ;;  %vm1043_vm3 = vweird.f32 %v1036_v18 }
 0x772   :  { %2711 = vrcp.f32 %v1037_v20  ;;  %v1064_v23 = vand.u32 2147483648, %v1037_v20  ;;  %v1062_v21 = vand.u32 2147483647, %v1037_v20  ;;  %vm1058_vm5 = vweird.f32 %v1037_v20 }
 0x773   :  { %2713 = vrcp.f32 %v957_v52  ;;  %v1050_v33 = vor.u32 1.1754944e-38, %v1049_v35  ;;  %vm1048_vm6 = vcmp.eq.f32.partialorder %v1047_v29, 8.507059e+37 }
 0x774   :  { %v1065_v34 = vor.u32 1.1754944e-38, %v1064_v23  ;;  %vm1063_vm9 = vcmp.eq.f32.partialorder %v1062_v21, 8.507059e+37 }
 0x777   :  { %v2710_v26 = vpop.eup %2709 }
 0x778   :  { %v2712_v8 = vpop.eup %2711  ;;  %v1039_v44 = vmul.f32 %v2710_v26, %v1036_v18  ;;  %vm1044_vm0 = vweird.f32 %v2710_v26 }
 0x779   :  { %v1054_v42 = vmul.f32 %v2712_v8, %v1037_v20  ;;  %vm1059_vm1 = vweird.f32 %v2712_v8  ;;  %v2714_v46 = vpop.eup %2713  ;;  %vm1045_vm4 = vmor %vm1043_vm3, %vm1044_vm0  ;;  %v1101_v20 = vand.u32 2147483647, %v957_v52 }
 0x77a   :  { %v1040_v24 = vsub.f32 1.0, %v1039_v44  ;;  %vm1060_vm8 = vmor %vm1058_vm5, %vm1059_vm1  ;;  %v1093_v45 = vmul.f32 %v2714_v46, %v957_v52  ;;  %vm1098_vm11 = vweird.f32 %v2714_v46  ;;  %v1144_v52 = vpop.permute.xlu2 %1143 }
 0x77b   :  { %v1055_v28 = vsub.f32 1.0, %v1054_v42  ;;  %vm1099_vm12 = vmor %vm1097_vm10, %vm1098_vm11  ;;  %vm1102_vm13 = vcmp.eq.f32.partialorder %v1101_v20, 8.507059e+37 }
 0x77c   :  { %v1041_v56 = vmul.f32 %v2710_v26, %v1040_v24  ;;  %v1094_v32 = vsub.f32 1.0, %v1093_v45  ;;  %v628_v24 = vmul.f32 %v3221_v36, %v3218_v27 }
 0x77d   :  { %v1056_v31 = vmul.f32 %v2712_v8, %v1055_v28 }
 0x77e   :  { %v1042_v47 = vadd.f32 %v2710_v26, %v1041_v56  ;;  %v1095_v15 = vmul.f32 %v2714_v46, %v1094_v32 }
 0x77f   :  { %v1057_v22 = vadd.f32 %v2712_v8, %v1056_v31 }
 0x780   :  { %v1046_v39 = vsel %vm1045_vm4, %v2710_v26, %v1042_v47  ;;  %v1096_v18 = vadd.f32 %v2714_v46, %v1095_v15 }
 0x781   :  { %v1051_v40 = vsel %vm1048_vm6, %v1050_v33, %v1046_v39  ;;  %v1061_v12 = vsel %vm1060_vm8, %v2712_v8, %v1057_v22 }
 0x782   :  { %v1066_v49 = vsel %vm1063_vm9, %v1065_v34, %v1061_v12  ;;  %v1078_v25 = vmul.f32 %v1071_v38, %v1051_v40  ;;  %v1104_v38 = vor.u32 1.1754944e-38, %v1103_v61  ;;  %v1100_v42 = vsel %vm1099_vm12, %v2714_v46, %v1096_v18  ;;  %v1149_v21 = vpop.permute.xlu2 %1148 }
 0x783   :  { %v1079_v41 = vmul.f32 %v1076_v14, %v1066_v49 }
 0x784   :  { %v1080_v43 = vsel %vm616_vm2, %v1078_v25, 0.0  ;;  %v1105_v28 = vsel %vm1102_vm13, %v1104_v38, %v1100_v42 }
 0x785   :  { %v1081_v62 = vsel %vm616_vm2, %v1079_v41, 0.0 }
 0x786   :  { %v1082_v16 = vadd.f32 %v1081_v62, %v1080_v43 }
 0x788   :  { %v1083_v17 = vrot.slane %v1082_v16, 4 }
 0x78a   :  { %v1084_v55 = vadd.f32 %v1083_v17, %v1082_v16  ;;  %v1157_v47 = vpop.permute.xlu2 %1156 }
 0x78c   :  { %v1085_v58 = vrot.slane %v1084_v55, 2 }
 0x78e   :  { %v1086_v26 = vadd.f32 %v1085_v58, %v1084_v55 }
 0x790   :  { %v1087_v8 = vrot.slane %v1086_v26, 1 }
 0x792   :  { %v1088_v44 = vadd.f32 %v1087_v8, %v1086_v26  ;;  %v1162_v33 = vpop.permute.xlu2 %1161 }
 0x794   :  { %v1089_v35 = vmul.f32 %v1088_v44, %v3218_v27 }
 0x796   :  { %v3381_v56 = vadd.f32 %v1089_v35, %v628_v24  ;;  %v1107_v29 = vmul.f32 %v1105_v28, %v1089_v35 }
 0x798   :  { %v1109_v23 = vrot.slane %v1107_v29, 7 }
 0x79a   :  { %v1111_v31 = vsel %vm648_vm7, %v1089_v35, %v1109_v23  ;;  %v1208_v14 = vpop.permute.xlu2 %1207 }
 0x79b   :  { %2651 = vmatmul.msk.f32.vlgmr.msra.gmra.mxu1 %vm616_vm2, %v1111_v31 }
 0x7a2   :  { %v1213_v32 = vpop.permute.xlu2 %1212 }
 0x7aa   :  { %v1229_v44 = vpop.permute.xlu2 %1228 }
 0x818   :  { %v3385_v22 = vpop.f32.mrf.mxu1 }
 0x819   :  { %v1135_v46 = vmax.f32 %v3385_v22, 0.0 }
 0x81b   :  { %v1136_v36 = vsub.f32 %v3237_v9, %v1135_v46 }
 0x81d   :  { %v3390_v34 = vmul.f32 %v1136_v36, %v3142_v30 }
 0x81f   :  { %v1151_v39 = vperm.slane %v3390_v34, 0  ;;  %v1204_v25 = vsub.f32 %v3390_v34, %v3230_v53 }
 0x821   :  { %v1152_v40 = vmul.f32 %v1151_v39, %v1144_v52  ;;  %v1153_v12 = vmul.f32 %v1151_v39, %v1149_v21  ;;  %v1215_v62 = vperm.slane %v1204_v25, 0  ;;  %v1234_v25 = vpop.permute.xlu2 %1233 }
 0x823   :  { %v1164_v45 = vadd.f32 %v1157_v47, %v1152_v40  ;;  %v1165_v49 = vadd.f32 %v1162_v33, %v1153_v12  ;;  %v1216_v9 = vmul.f32 %v1215_v62, %v1208_v14  ;;  %v1217_v17 = vmul.f32 %v1215_v62, %v1213_v32 }
 0x825   :  { %v2652_v41 = vmul.f32 -1.442695, %v1164_v45  ;;  %v2653_v43 = vmul.f32 -1.442695, %v1165_v49  ;;  %v1218_v61 = vmax.f32 %v1216_v9, 0.0  ;;  %v1219_v18 = vmax.f32 %v1217_v17, 0.0 }
 0x827   :  { %2715 = vpow2.f32 %v2652_v41  ;;  %v1220_v20 = vmul.f32 -0.6931472, %v1218_v61  ;;  %v1221_v26 = vmul.f32 -0.6931472, %v1219_v18 }
 0x828   :  { %2717 = vpow2.f32 %v2653_v43 }
 0x829   :  { %v1222_v35 = vmul.f32 1.442695, %v1220_v20  ;;  %v1224_v29 = vmul.f32 1.442695, %v1221_v26 }
 0x82d   :  { %v2716_v16 = vpop.eup %2715 }
 0x82e   :  { %v2718_v15 = vpop.eup %2717  ;;  %v1172_v55 = vadd.f32 1.0, %v2716_v16 }
 0x82f   :  { %v1173_v58 = vadd.f32 1.0, %v2718_v15 }
 0x830   :  { %2719 = vrcp.f32 %v1172_v55  ;;  %v1185_v23 = vand.u32 2147483648, %v1172_v55  ;;  %v1183_v21 = vand.u32 2147483647, %v1172_v55  ;;  %vm1179_vm0 = vweird.f32 %v1172_v55 }
 0x831   :  { %2721 = vrcp.f32 %v1173_v58  ;;  %v1200_v47 = vand.u32 2147483648, %v1173_v58  ;;  %v1198_v46 = vand.u32 2147483647, %v1173_v58  ;;  %vm1194_vm3 = vweird.f32 %v1173_v58 }
 0x832   :  { %2723 = vpow2.f32 %v1222_v35  ;;  %v1186_v39 = vor.u32 1.1754944e-38, %v1185_v23  ;;  %vm1184_vm4 = vcmp.eq.f32.partialorder %v1183_v21, 8.507059e+37 }
 0x833   :  { %2725 = vpow2.f32 %v1224_v29  ;;  %v1201_v14 = vor.u32 1.1754944e-38, %v1200_v47  ;;  %vm1199_vm6 = vcmp.eq.f32.partialorder %v1198_v46, 8.507059e+37 }
 0x836   :  { %v2720_v8 = vpop.eup %2719 }
 0x837   :  { %v2722_v38 = vpop.eup %2721  ;;  %v1175_v42 = vmul.f32 %v2720_v8, %v1172_v55  ;;  %vm1180_vm14 = vweird.f32 %v2720_v8 }
 0x838   :  { %v1190_v24 = vmul.f32 %v2722_v38, %v1173_v58  ;;  %vm1195_vm15 = vweird.f32 %v2722_v38  ;;  %vm1181_vm1 = vmor %vm1179_vm0, %vm1180_vm14  ;;  %v2724_v62 = vpop.eup %2723 }
 0x839   :  { %v1176_v28 = vsub.f32 1.0, %v1175_v42  ;;  %vm1196_vm5 = vmor %vm1194_vm3, %vm1195_vm15  ;;  %v2726_v9 = vpop.eup %2725 }
 0x83a   :  { %v1191_v31 = vsub.f32 1.0, %v1190_v24 }
 0x83b   :  { %v1177_v52 = vmul.f32 %v2720_v8, %v1176_v28  ;;  %v1251_v28 = vld [vmem:[%s3871_s3 + $0x28] sm:$0xff] }
 0x83c   :  { %v1192_v33 = vmul.f32 %v2722_v38, %v1191_v31 }
 0x83d   :  { %v1178_v36 = vadd.f32 %v2720_v8, %v1177_v52 }
 0x83e   :  { %v1193_v40 = vadd.f32 %v2722_v38, %v1192_v33 }
 0x83f   :  { %v1182_v12 = vsel %vm1181_vm1, %v2720_v8, %v1178_v36 }
 0x840   :  { %v1187_v45 = vsel %vm1184_vm4, %v1186_v39, %v1182_v12  ;;  %v1197_v49 = vsel %vm1196_vm5, %v2722_v38, %v1193_v40 }
 0x841   :  { %v1202_v41 = vsel %vm1199_vm6, %v1201_v14, %v1197_v49  ;;  %v1236_v43 = vmul.f32 %v1229_v44, %v1187_v45  ;;  %v1252_v45 = vld [vmem:[%s3872_s4 + $0x20] sm:$0xff] }
 0x842   :  { %v1237_v32 = vmul.f32 %v1234_v25, %v1202_v41 }
 0x843   :  { %v1238_v16 = vmul.f32 %v2724_v62, %v1236_v43 }
 0x844   :  { %v1239_v17 = vmul.f32 %v2726_v9, %v1237_v32  ;;  %v1250_v9 = vld [vmem:[%s3871_s3 + $0x20] sm:$0xff] }
 0x846   :  { %v1240_v15 = vadd.f32 %v1239_v17, %v1238_v16 }
 0x848   :  { %v1241_v55 = vrot.slane %v1240_v15, 4 }
 0x84a   :  { %v1242_v61 = vadd.f32 %v1241_v55, %v1240_v15 }
 0x84c   :  { %v1243_v18 = vrot.slane %v1242_v61, 2 }
 0x84e   :  { %v1244_v58 = vadd.f32 %v1243_v18, %v1242_v61 }
 0x850   :  { %v1245_v20 = vrot.slane %v1244_v58, 1 }
 0x852   :  { %v1246_v26 = vadd.f32 %v1245_v20, %v1244_v58 }
 0x854   :  { %v3396_v8 = vmul.f32 %v1246_v26, %v3142_v30 }
 0x856   :  { %v1265_v38 = vmul.f32 %v3396_v8, %v2938_v3  ;;  %v1263_v44 = vmul.f32 %v3396_v8, %v2928_v1  ;;  %v1262_v42 = vmul.f32 %v3396_v8, %v2923_v0  ;;  %v1264_v24 = vmul.f32 %v3396_v8, %v2933_v2 }
 0x857   :  { %v1266_v35 = vmul.f32 %v3396_v8, %v2943_v4  ;;  %v1267_v29 = vmul.f32 %v3396_v8, %v2948_v5  ;;  %v1268_v23 = vmul.f32 %v3396_v8, %v2953_v6  ;;  %v1269_v31 = vmul.f32 %v3396_v8, %v2958_v7 }
 0x858   :  { %1276 = vadd.xlane.f32.xlu1 %v1265_v38  ;;  %1272 = vadd.xlane.f32.xlu0 %v1263_v44 }
 0x859   :  { %1270 = vadd.xlane.f32.xlu2 %v1262_v42 }
 0x861   :  { %1274 = vadd.xlane.f32.xlu2 %v1264_v24 }
 0x869   :  { %1278 = vadd.xlane.f32.xlu2 %v1266_v35 }
 0x871   :  { %1280 = vadd.xlane.f32.xlu2 %v1267_v29  ;;  %1475 = vperm.xlu1 %2674, %v1251_v28  }
 0x879   :  { %1282 = vadd.xlane.f32.xlu2 %v1268_v23 }
 0x881   :  { %1284 = vadd.xlane.f32.xlu2 %v1269_v31 }
 0x8cb   :  { %v1273_v47 = vpop.xlane.xlu0 %1272  ;;  %v1277_v12 = vpop.xlane.xlu1 %1276 }
 0x8cc   :  { %v1271_v52 = vpop.xlane.xlu2 %1270  ;;  %v3422_v46 = vmul.f32 %v1273_v47, %v3056_v54  ;;  %v3437_v49 = vmul.f32 %v1277_v12, %v3070_v60 }
 0x8cd   :  { %v3418_v21 = vmul.f32 %v1271_v52, %v3050_v51 }
 0x8cf   :  { %1296 = vperm.xlu2 %2672, %v3418_v21  }
 0x8d4   :  { %v1275_v33 = vpop.xlane.xlu2 %1274 }
 0x8d5   :  { %v3426_v39 = vmul.f32 %v1275_v33, %v3063_v57 }
 0x8d7   :  { %1301 = vperm.xlu2 %2672, %v3422_v46  }
 0x8dc   :  { %v1279_v36 = vpop.xlane.xlu2 %1278 }
 0x8dd   :  { %v3429_v40 = vmul.f32 %v1279_v36, %v3077_v63 }
 0x8df   :  { %1306 = vperm.xlu2 %2672, %v3426_v39   ;;  %1316 = vperm.xlu0 %2673, %v3429_v40  }
 0x8e3   :  { %v3455_v18 = vpop.permute.xlu1 %1475 }
 0x8e4   :  { %v1281_v14 = vpop.xlane.xlu2 %1280 }
 0x8e5   :  { %v3441_v41 = vmul.f32 %v1281_v14, %v3084_v10 }
 0x8e7   :  { %1311 = vperm.xlu2 %2672, %v3437_v49   ;;  %1483 = vperm.xlu0 %2673, %v1252_v45  }
 0x8ec   :  { %v1283_v25 = vpop.xlane.xlu2 %1282 }
 0x8ed   :  { %v3445_v62 = vmul.f32 %v1283_v25, %v3091_v13 }
 0x8ef   :  { %1321 = vperm.xlu2 %2672, %v3441_v41  }
 0x8f4   :  { %v1285_v43 = vpop.xlane.xlu2 %1284 }
 0x8f5   :  { %v3448_v32 = vmul.f32 %v1285_v43, %v3100_v19 }
 0x8f7   :  { %1326 = vperm.xlu2 %2672, %v3445_v62   ;;  %1331 = vperm.xlu1 %2674, %v3448_v32  }
 0x8ff   :  { %1470 = vperm.xlu2 %2672, %v1250_v9  }
 0x929   :  { %v1297_v16 = vpop.permute.xlu2 %1296 }
 0x92a   :  { %v1334_v38 = vmul.f32 %v1297_v16, %v2923_v0 }
 0x931   :  { %v1302_v17 = vpop.permute.xlu2 %1301 }
 0x932   :  { %v1335_v24 = vmul.f32 %v1302_v17, %v2928_v1 }
 0x939   :  { %v1307_v15 = vpop.permute.xlu2 %1306 }
 0x93a   :  { %v1336_v28 = vmul.f32 %v1307_v15, %v2933_v2 }
 0x941   :  { %v1312_v55 = vpop.permute.xlu2 %1311 }
 0x942   :  { %v1337_v29 = vmul.f32 %v1312_v55, %v2938_v3 }
 0x949   :  { %v1322_v61 = vpop.permute.xlu2 %1321 }
 0x94a   :  { %v1339_v44 = vmul.f32 %v1322_v61, %v2948_v5 }
 0x94c   :  { %v1343_v52 = vmax.f32 %v1335_v24, %v1339_v44 }
 0x951   :  { %v1317_v58 = vpop.permute.xlu0 %1316  ;;  %v1327_v20 = vpop.permute.xlu2 %1326 }
 0x952   :  { %v1338_v26 = vmul.f32 %v1317_v58, %v2943_v4  ;;  %v1340_v42 = vmul.f32 %v1327_v20, %v2953_v6 }
 0x954   :  { %v1342_v23 = vmax.f32 %v1334_v38, %v1338_v26  ;;  %v1344_v47 = vmax.f32 %v1336_v28, %v1340_v42  ;;  %v1248_v42 = vld [vmem:[%s3870_s2 + $0x20] sm:$0xff]  ;;  %v1249_v28 = vld [vmem:[%s3870_s2 + $0x28] sm:$0xff] }
 0x956   :  { %v1346_v36 = vmax.f32 %v1342_v23, %v1343_v52  ;;  %v1257_v23 = vld [vmem:[%s3874_s6 + $0x28] sm:$0xff] }
 0x957   :  { %v1259_v52 = vld [vmem:[%s3875_s7 + $0x28] sm:$0xff] }
 0x969   :  { %v1332_v35 = vpop.permute.xlu1 %1331 }
 0x96a   :  { %v1341_v31 = vmul.f32 %v1332_v35, %v2958_v7  ;;  %v1253_v35 = vld [vmem:[%s3872_s4 + $0x28] sm:$0xff] }
 0x96c   :  { %v1345_v33 = vmax.f32 %v1337_v29, %v1341_v31  ;;  %v1256_v29 = vld [vmem:[%s3874_s6 + $0x20] sm:$0xff] }
 0x96d   :  { %v1258_v31 = vld [vmem:[%s3875_s7 + $0x20] sm:$0xff] }
 0x96e   :  { %v1347_v12 = vmax.f32 %v1344_v47, %v1345_v33  ;;  %v1260_v47 = vld [vmem:[%s3876_s8 + $0x20] sm:$0xff]  ;;  %v1261_v33 = vld [vmem:[%s3876_s8 + $0x28] sm:$0xff] }
 0x970   :  { %v1348_v14 = vmax.f32 %v1346_v36, %v1347_v12  ;;  %v1254_v36 = vld [vmem:[%s3873_s5 + $0x20] sm:$0xff]  ;;  %v1484_v12 = vpop.permute.xlu0 %1483 }
 0x972   :  { %v1349_v45 = vrot.slane %v1348_v14, 4 }
 0x974   :  { %v1350_v25 = vmax.f32 %v1348_v14, %v1349_v45  ;;  %v1255_v14 = vld [vmem:[%s3873_s5 + $0x28] sm:$0xff]  ;;  %v1471_v45 = vpop.permute.xlu2 %1470 }
 0x976   :  { %v1351_v43 = vrot.slane %v1350_v25, 2 }
 0x978   :  { %v1352_v9 = vmax.f32 %v1350_v25, %v1351_v43 }
 0x97a   :  { %v1353_v16 = vrot.slane %v1352_v9, 1 }
 0x97c   :  { %v1354_v17 = vmax.f32 %v1352_v9, %v1353_v16 }
 0x97e   :  { %v1355_v61 = vmul.f32 %v1354_v17, %v3142_v30 }
 0x980   :  { %v1358_v15 = vmul.f32 %v1355_v61, %v2933_v2  ;;  %v1357_v55 = vmul.f32 %v1355_v61, %v2928_v1  ;;  %v1356_v58 = vmul.f32 %v1355_v61, %v2923_v0  ;;  %v1360_v20 = vmul.f32 %v1355_v61, %v2943_v4 }
 0x981   :  { %v1359_v26 = vmul.f32 %v1355_v61, %v2938_v3  ;;  %v1362_v38 = vmul.f32 %v1355_v61, %v2953_v6  ;;  %v1361_v44 = vmul.f32 %v1355_v61, %v2948_v5  ;;  %v1363_v24 = vmul.f32 %v1355_v61, %v2958_v7 }
 0x982   :  { %1368 = vmax.xlane.f32.xlu1 %v1358_v15  ;;  %1366 = vmax.xlane.f32.xlu2 %v1357_v55 }
 0x983   :  { %1364 = vmax.xlane.f32.xlu0 %v1356_v58 }
 0x98a   :  { %1372 = vmax.xlane.f32.xlu2 %v1360_v20 }
 0x98b   :  { %1370 = vmax.xlane.f32.xlu0 %v1359_v26 }
 0x992   :  { %1376 = vmax.xlane.f32.xlu2 %v1362_v38 }
 0x993   :  { %1374 = vmax.xlane.f32.xlu0 %v1361_v44 }
 0x99b   :  { %1378 = vmax.xlane.f32.xlu0 %v1363_v24  ;;  %1533 = vperm.xlu1 %2674, %v1248_v42  }
 0x9aa   :  { %1488 = vperm.xlu2 %2672, %v1253_v35  }
 0x9b2   :  { %1538 = vperm.xlu2 %2672, %v1249_v28  }
 0x9ba   :  { %1606 = vperm.xlu2 %2672, %v1256_v29  }
 0x9c2   :  { %1611 = vperm.xlu2 %2672, %v1257_v23  }
 0x9ca   :  { %1619 = vperm.xlu2 %2672, %v1258_v31  }
 0x9d0   :  { %1404 = vxpose.xlu1.b32.start [1/8] (short) (narrow) %v3418_v21, 8 }
 0x9d2   :  { %1624 = vperm.xlu2 %2672, %v1259_v52  }
 0x9d8   :  { %1405 = vxpose.xlu1.b32.cont [2/8] (short) (narrow) %v3422_v46, 8 }
 0x9da   :  { %1670 = vperm.xlu2 %2672, %v1260_v47  }
 0x9e0   :  { %1406 = vxpose.xlu1.b32.cont [3/8] (short) (narrow) %v3426_v39, 8 }
 0x9e2   :  { %1675 = vperm.xlu2 %2672, %v1261_v33  }
 0x9e8   :  { %1407 = vxpose.xlu1.b32.cont [4/8] (short) (narrow) %v3437_v49, 8 }
 0x9ea   :  { %1691 = vperm.xlu2 %2672, %v1254_v36  }
 0x9f0   :  { %1408 = vxpose.xlu1.b32.cont [5/8] (short) (narrow) %v3429_v40, 8 }
 0x9f2   :  { %1696 = vperm.xlu2 %2672, %v1255_v14  }
 0x9f5   :  { %v1367_v9 = vpop.xlane.xlu2 %1366  ;;  %v1369_v55 = vpop.xlane.xlu1 %1368 }
 0x9f6   :  { %v1365_v25 = vpop.xlane.xlu0 %1364  ;;  %v1381_v61 = vmul.f32 %v1367_v9, %v3056_v54  ;;  %v1382_v58 = vmul.f32 %v1369_v55, %v3063_v57 }
 0x9f7   :  { %v1380_v43 = vmul.f32 %v1365_v25, %v3050_v51 }
 0x9f8   :  { %1409 = vxpose.xlu1.b32.cont [6/8] (short) (narrow) %v3441_v41, 8  ;;  %v1389_v15 = vmul.f32 0.5, %v1381_v61  ;;  %v1390_v26 = vmul.f32 0.5, %v1382_v58 }
 0x9f9   :  { %v1388_v16 = vmul.f32 0.5, %v1380_v43 }
 0x9fa   :  { %v1397_v20 = vsub.f32 %v3422_v46, %v1389_v15  ;;  %v1398_v44 = vsub.f32 %v3426_v39, %v1390_v26 }
 0x9fb   :  { %v1396_v17 = vsub.f32 %v3418_v21, %v1388_v16 }
 0x9fd   :  { %1436 = vxpose.xlu0.b32.start [1/8] (short) (narrow) %v1396_v17, 8  ;;  %v1373_v24 = vpop.xlane.xlu2 %1372 }
 0x9fe   :  { %v1371_v38 = vpop.xlane.xlu0 %1370  ;;  %v1384_v28 = vmul.f32 %v1373_v24, %v3077_v63 }
 0x9ff   :  { %v1383_v21 = vmul.f32 %v1371_v38, %v3070_v60 }
 0xa00   :  { %1410 = vxpose.xlu1.b32.cont [7/8] (short) (narrow) %v3445_v62, 8  ;;  %v1392_v29 = vmul.f32 0.5, %v1384_v28 }
 0xa01   :  { %v1391_v42 = vmul.f32 0.5, %v1383_v21 }
 0xa02   :  { %v1400_v46 = vsub.f32 %v3429_v40, %v1392_v29 }
 0xa03   :  { %v1399_v35 = vsub.f32 %v3437_v49, %v1391_v42 }
 0xa05   :  { %1437 = vxpose.xlu0.b32.cont [2/8] (short) (narrow) %v1397_v20, 8  ;;  %v1377_v47 = vpop.xlane.xlu2 %1376 }
 0xa06   :  { %v1375_v23 = vpop.xlane.xlu0 %1374  ;;  %v1386_v33 = vmul.f32 %v1377_v47, %v3091_v13 }
 0xa07   :  { %v1385_v31 = vmul.f32 %v1375_v23, %v3084_v10 }
 0xa08   :  { %1411 = vxpose.xlu1.b32.end [8/8] (short) (narrow) %v3448_v32, 8  ;;  %v1394_v36 = vmul.f32 0.5, %v1386_v33 }
 0xa09   :  { %v1393_v52 = vmul.f32 0.5, %v1385_v31 }
 0xa0a   :  { %v1402_v49 = vsub.f32 %v3445_v62, %v1394_v36 }
 0xa0b   :  { %v1401_v39 = vsub.f32 %v3441_v41, %v1393_v52 }
 0xa0d   :  { %1438 = vxpose.xlu0.b32.cont [3/8] (short) (narrow) %v1398_v44, 8  ;;  %v1489_v41 = vpop.permute.xlu2 %1488  ;;  %v1534_v26 = vpop.permute.xlu1 %1533 }
 0xa0e   :  { %v1379_v14 = vpop.xlane.xlu0 %1378 }
 0xa0f   :  { %v1387_v25 = vmul.f32 %v1379_v14, %v3100_v19 }
 0xa11   :  { %v1395_v43 = vmul.f32 0.5, %v1387_v25 }
 0xa13   :  { %v1403_v40 = vsub.f32 %v3448_v32, %v1395_v43 }
 0xa15   :  { %1439 = vxpose.xlu0.b32.cont [4/8] (short) (narrow) %v1399_v35, 8 }
 0xa1d   :  { %1440 = vxpose.xlu0.b32.cont [5/8] (short) (narrow) %v1400_v46, 8 }
 0xa25   :  { %1441 = vxpose.xlu0.b32.cont [6/8] (short) (narrow) %v1401_v39, 8 }
 0xa2d   :  { %1442 = vxpose.xlu0.b32.cont [7/8] (short) (narrow) %v1402_v49, 8 }
 0xa35   :  { %1443 = vxpose.xlu0.b32.end [8/8] (short) (narrow) %v1403_v40, 8  ;;  %v1539_v40 = vpop.permute.xlu2 %1538 }
 0xa74   :  { %v1420_v32 = vpop.trf.xlu1 }
 0xa75   :  { %vm1560_vm0 = vweird.f32 %v1420_v32 }
 0xaa1   :  { %v1452_v9 = vpop.trf.xlu0 }
 0xaa2   :  { %v1478_v16 = vperm.slane %v1452_v9, 0 }
 0xaa4   :  { %v1479_v17 = vmul.f32 %v1478_v16, %v1471_v45  ;;  %v1480_v61 = vmul.f32 %v1478_v16, %v3455_v18 }
 0xaa6   :  { %v1491_v15 = vadd.f32 %v1484_v12, %v1479_v17  ;;  %v1492_v55 = vadd.f32 %v1489_v41, %v1480_v61 }
 0xaa8   :  { %v2654_v58 = vmul.f32 -1.442695, %v1491_v15  ;;  %v2655_v20 = vmul.f32 -1.442695, %v1492_v55 }
 0xaaa   :  { %2727 = vpow2.f32 %v2654_v58 }
 0xaab   :  { %2729 = vpow2.f32 %v2655_v20 }
 0xab0   :  { %v2728_v62 = vpop.eup %2727 }
 0xab1   :  { %v2730_v38 = vpop.eup %2729  ;;  %v1499_v44 = vadd.f32 1.0, %v2728_v62 }
 0xab2   :  { %v1500_v21 = vadd.f32 1.0, %v2730_v38 }
 0xab3   :  { %2731 = vrcp.f32 %v1499_v44  ;;  %v1512_v12 = vand.u32 2147483648, %v1499_v44  ;;  %v1510_v23 = vand.u32 2147483647, %v1499_v44  ;;  %vm1506_vm10 = vweird.f32 %v1499_v44 }
 0xab4   :  { %2733 = vrcp.f32 %v1500_v21  ;;  %v1527_v46 = vand.u32 2147483648, %v1500_v21  ;;  %v1525_v52 = vand.u32 2147483647, %v1500_v21  ;;  %vm1521_vm12 = vweird.f32 %v1500_v21 }
 0xab5   :  { %2735 = vrcp.f32 %v1420_v32  ;;  %v1513_v33 = vor.u32 1.1754944e-38, %v1512_v12  ;;  %vm1511_vm13 = vcmp.eq.f32.partialorder %v1510_v23, 8.507059e+37 }
 0xab6   :  { %v1528_v14 = vor.u32 1.1754944e-38, %v1527_v46  ;;  %vm1526_vm15 = vcmp.eq.f32.partialorder %v1525_v52, 8.507059e+37 }
 0xab9   :  { %v2732_v42 = vpop.eup %2731 }
 0xaba   :  { %v2734_v24 = vpop.eup %2733  ;;  %v1502_v45 = vmul.f32 %v2732_v42, %v1499_v44  ;;  %vm1507_vm8 = vweird.f32 %v2732_v42 }
 0xabb   :  { %v1517_v35 = vmul.f32 %v2734_v24, %v1500_v21  ;;  %vm1522_vm9 = vweird.f32 %v2734_v24  ;;  %v2736_v39 = vpop.eup %2735  ;;  %vm1508_vm11 = vmor %vm1506_vm10, %vm1507_vm8  ;;  %v1566_v21 = vand.u32 2147483648, %v1420_v32 }
 0xabc   :  { %v1503_v18 = vsub.f32 1.0, %v1502_v45  ;;  %vm1523_vm14 = vmor %vm1521_vm12, %vm1522_vm9  ;;  %v1556_v9 = vmul.f32 %v2736_v39, %v1420_v32  ;;  %vm1561_vm1 = vweird.f32 %v2736_v39 }
 0xabd   :  { %v1518_v28 = vsub.f32 1.0, %v1517_v35  ;;  %vm1562_vm3 = vmor %vm1560_vm0, %vm1561_vm1 }
 0xabe   :  { %v1504_v29 = vmul.f32 %v2732_v42, %v1503_v18  ;;  %v1557_v55 = vsub.f32 1.0, %v1556_v9 }
 0xabf   :  { %v1519_v31 = vmul.f32 %v2734_v24, %v1518_v28  ;;  %v1091_v28 = vmul.f32 %v3381_v56, %v3218_v27  ;;  %v677_v56 = vmul.f32 %v3232_v59, %v3142_v30 }
 0xac0   :  { %v1505_v47 = vadd.f32 %v2732_v42, %v1504_v29  ;;  %v1558_v62 = vmul.f32 %v2736_v39, %v1557_v55 }
 0xac1   :  { %v1520_v36 = vadd.f32 %v2734_v24, %v1519_v31 }
 0xac2   :  { %v1509_v49 = vsel %vm1508_vm11, %v2732_v42, %v1505_v47  ;;  %v1559_v42 = vadd.f32 %v2736_v39, %v1558_v62 }
 0xac3   :  { %v1514_v25 = vsel %vm1511_vm13, %v1513_v33, %v1509_v49  ;;  %v1524_v43 = vsel %vm1523_vm14, %v2734_v24, %v1520_v36  ;;  %v1564_v24 = vand.u32 2147483647, %v1420_v32  ;;  %v1607_v32 = vpop.permute.xlu2 %1606 }
 0xac4   :  { %v1529_v16 = vsel %vm1526_vm15, %v1528_v14, %v1524_v43  ;;  %v1541_v17 = vmul.f32 %v1534_v26, %v1514_v25  ;;  %v1567_v26 = vor.u32 1.1754944e-38, %v1566_v21  ;;  %v1563_v12 = vsel %vm1562_vm3, %v2736_v39, %v1559_v42 }
 0xac5   :  { %v1542_v61 = vmul.f32 %v1539_v40, %v1529_v16  ;;  %vm1565_vm4 = vcmp.eq.f32.partialorder %v1564_v24, 8.507059e+37  ;;  %v1138_v39 = vmul.f32 %v3385_v22, %v3243_v11 }
 0xac6   :  { %v1543_v41 = vsel %vm616_vm2, %v1541_v17, 0.0  ;;  %v1568_v23 = vsel %vm1565_vm4, %v1567_v26, %v1563_v12 }
 0xac7   :  { %v1544_v15 = vsel %vm616_vm2, %v1542_v61, 0.0  ;;  %v1139_v14 = vadd.f32 %v1138_v39, %v677_v56 }
 0xac8   :  { %v1545_v58 = vadd.f32 %v1544_v15, %v1543_v41 }
 0xac9   :  { %v1140_v43 = vmul.f32 %v1139_v14, %v3142_v30 }
 0xaca   :  { %v1546_v20 = vrot.slane %v1545_v58, 4 }
 0xacb   :  { %v1612_v33 = vpop.permute.xlu2 %1611 }
 0xacc   :  { %v1547_v38 = vadd.f32 %v1546_v20, %v1545_v58 }
 0xace   :  { %v1548_v44 = vrot.slane %v1547_v38, 2 }
 0xad0   :  { %v1549_v45 = vadd.f32 %v1548_v44, %v1547_v38 }
 0xad2   :  { %v1550_v35 = vrot.slane %v1549_v45, 1 }
 0xad3   :  { %v1620_v36 = vpop.permute.xlu2 %1619 }
 0xad4   :  { %v1551_v18 = vadd.f32 %v1550_v35, %v1549_v45 }
 0xad6   :  { %v1552_v29 = vmul.f32 %v1551_v18, %v3218_v27 }
 0xad8   :  { %v3537_v46 = vadd.f32 %v1552_v29, %v1091_v28  ;;  %v1570_v31 = vmul.f32 %v1568_v23, %v1552_v29 }
 0xada   :  { %v1572_v52 = vrot.slane %v1570_v31, 7 }
 0xadb   :  { %v1625_v49 = vpop.permute.xlu2 %1624 }
 0xadc   :  { %v1574_v47 = vsel %vm648_vm7, %v1552_v29, %v1572_v52 }
 0xadd   :  { %2656 = vmatmul.msk.f32.vlgmr.msra.gmra.mxu2 %vm616_vm2, %v1574_v47 }
 0xae3   :  { %v1671_v59 = vpop.permute.xlu2 %1670 }
 0xb60   :  { %v1595_v25 = vpop.f32.mrf.mxu2 }
 0xb61   :  { %v1598_v40 = vmax.f32 %v1595_v25, 0.0  ;;  %v1601_v9 = vmul.f32 %v1595_v25, %v3396_v8  ;;  %v1676_v8 = vpop.permute.xlu2 %1675 }
 0xb63   :  { %v1599_v16 = vsub.f32 %v3390_v34, %v1598_v40  ;;  %v3548_v17 = vadd.f32 %v1601_v9, %v1140_v43 }
 0xb65   :  { %v3551_v61 = vmul.f32 %v1599_v16, %v3142_v30 }
 0xb67   :  { %v1614_v11 = vperm.slane %v3551_v61, 0  ;;  %v1667_v58 = vsub.f32 %v3551_v61, %v3230_v53 }
 0xb69   :  { %v1615_v22 = vmul.f32 %v1614_v11, %v1607_v32  ;;  %v1616_v41 = vmul.f32 %v1614_v11, %v1612_v33  ;;  %v1678_v34 = vperm.slane %v1667_v58, 0  ;;  %v1692_v23 = vpop.permute.xlu2 %1691 }
 0xb6b   :  { %v1627_v15 = vadd.f32 %v1620_v36, %v1615_v22  ;;  %v1628_v55 = vadd.f32 %v1625_v49, %v1616_v41  ;;  %v1679_v38 = vmul.f32 %v1678_v34, %v1671_v59  ;;  %v1680_v21 = vmul.f32 %v1678_v34, %v1676_v8 }
 0xb6d   :  { %v2657_v20 = vmul.f32 -1.442695, %v1627_v15  ;;  %v2658_v62 = vmul.f32 -1.442695, %v1628_v55  ;;  %v1681_v35 = vmax.f32 %v1679_v38, 0.0  ;;  %v1682_v26 = vmax.f32 %v1680_v21, 0.0 }
 0xb6f   :  { %2737 = vpow2.f32 %v2657_v20  ;;  %v1683_v18 = vmul.f32 -0.6931472, %v1681_v35  ;;  %v1684_v12 = vmul.f32 -0.6931472, %v1682_v26 }
 0xb70   :  { %2739 = vpow2.f32 %v2658_v62 }
 0xb71   :  { %v1685_v47 = vmul.f32 1.442695, %v1683_v18  ;;  %v1687_v33 = vmul.f32 1.442695, %v1684_v12  ;;  %v1697_v15 = vpop.permute.xlu2 %1696 }
 0xb75   :  { %v2738_v44 = vpop.eup %2737 }
 0xb76   :  { %v2740_v42 = vpop.eup %2739  ;;  %v1635_v24 = vadd.f32 1.0, %v2738_v44 }
 0xb77   :  { %v1636_v45 = vadd.f32 1.0, %v2740_v42 }
 0xb78   :  { %2741 = vrcp.f32 %v1635_v24  ;;  %v1648_v36 = vand.u32 2147483648, %v1635_v24  ;;  %v1646_v14 = vand.u32 2147483647, %v1635_v24  ;;  %vm1642_vm8 = vweird.f32 %v1635_v24 }
 0xb79   :  { %2743 = vrcp.f32 %v1636_v45  ;;  %v1663_v49 = vand.u32 2147483648, %v1636_v45  ;;  %v1661_v43 = vand.u32 2147483647, %v1636_v45  ;;  %vm1657_vm10 = vweird.f32 %v1636_v45 }
 0xb7a   :  { %2745 = vpow2.f32 %v1685_v47  ;;  %v1649_v9 = vor.u32 1.1754944e-38, %v1648_v36  ;;  %vm1647_vm11 = vcmp.eq.f32.partialorder %v1646_v14, 8.507059e+37 }
 0xb7b   :  { %2747 = vpow2.f32 %v1687_v33  ;;  %v1664_v22 = vor.u32 1.1754944e-38, %v1663_v49  ;;  %vm1662_vm13 = vcmp.eq.f32.partialorder %v1661_v43, 8.507059e+37 }
 0xb7e   :  { %v2742_v28 = vpop.eup %2741 }
 0xb7f   :  { %v2744_v29 = vpop.eup %2743  ;;  %v1638_v31 = vmul.f32 %v2742_v28, %v1635_v24  ;;  %vm1643_vm5 = vweird.f32 %v2742_v28 }
 0xb80   :  { %v1653_v52 = vmul.f32 %v2744_v29, %v1636_v45  ;;  %vm1658_vm6 = vweird.f32 %v2744_v29  ;;  %vm1644_vm9 = vmor %vm1642_vm8, %vm1643_vm5  ;;  %v2746_v20 = vpop.eup %2745 }
 0xb81   :  { %v1639_v32 = vsub.f32 1.0, %v1638_v31  ;;  %vm1659_vm12 = vmor %vm1657_vm10, %vm1658_vm6  ;;  %v2748_v34 = vpop.eup %2747 }
 0xb82   :  { %v1654_v39 = vsub.f32 1.0, %v1653_v52  ;;  %v1714_v52 = vld [vmem:[%s3871_s3 + $0x38] sm:$0xff] }
 0xb83   :  { %v1640_v56 = vmul.f32 %v2742_v28, %v1639_v32 }
 0xb84   :  { %v1655_v25 = vmul.f32 %v2744_v29, %v1654_v39 }
 0xb85   :  { %v1641_v40 = vadd.f32 %v2742_v28, %v1640_v56 }
 0xb86   :  { %v1656_v16 = vadd.f32 %v2744_v29, %v1655_v25 }
 0xb87   :  { %v1645_v11 = vsel %vm1644_vm9, %v2742_v28, %v1641_v40 }
 0xb88   :  { %v1650_v41 = vsel %vm1647_vm11, %v1649_v9, %v1645_v11  ;;  %v1660_v59 = vsel %vm1659_vm12, %v2744_v29, %v1656_v16  ;;  %v1713_v11 = vld [vmem:[%s3871_s3 + $0x30] sm:$0xff] }
 0xb89   :  { %v1665_v55 = vsel %vm1662_vm13, %v1664_v22, %v1660_v59  ;;  %v1699_v58 = vmul.f32 %v1692_v23, %v1650_v41 }
 0xb8a   :  { %v1700_v62 = vmul.f32 %v1697_v15, %v1665_v55 }
 0xb8b   :  { %v1701_v8 = vmul.f32 %v2746_v20, %v1699_v58 }
 0xb8c   :  { %v1702_v38 = vmul.f32 %v2748_v34, %v1700_v62 }
 0xb8e   :  { %v1703_v44 = vadd.f32 %v1702_v38, %v1701_v8 }
 0xb90   :  { %v1704_v21 = vrot.slane %v1703_v44, 4 }
 0xb92   :  { %v1705_v42 = vadd.f32 %v1704_v21, %v1703_v44 }
 0xb94   :  { %v1706_v24 = vrot.slane %v1705_v42, 2 }
 0xb96   :  { %v1707_v45 = vadd.f32 %v1706_v24, %v1705_v42 }
 0xb98   :  { %v1708_v35 = vrot.slane %v1707_v45, 1 }
 0xb9a   :  { %v1709_v26 = vadd.f32 %v1708_v35, %v1707_v45 }
 0xb9c   :  { %v3557_v18 = vmul.f32 %v1709_v26, %v3142_v30 }
 0xb9e   :  { %v1728_v12 = vmul.f32 %v3557_v18, %v2938_v3  ;;  %v1726_v28 = vmul.f32 %v3557_v18, %v2928_v1  ;;  %v1725_v29 = vmul.f32 %v3557_v18, %v2923_v0  ;;  %v1727_v23 = vmul.f32 %v3557_v18, %v2933_v2 }
 0xb9f   :  { %v1729_v31 = vmul.f32 %v3557_v18, %v2943_v4  ;;  %v1730_v47 = vmul.f32 %v3557_v18, %v2948_v5  ;;  %v1731_v32 = vmul.f32 %v3557_v18, %v2953_v6  ;;  %v1732_v33 = vmul.f32 %v3557_v18, %v2958_v7 }
 0xba0   :  { %1739 = vadd.xlane.f32.xlu1 %v1728_v12  ;;  %1735 = vadd.xlane.f32.xlu0 %v1726_v28 }
 0xba1   :  { %1733 = vadd.xlane.f32.xlu2 %v1725_v29 }
 0xba9   :  { %1737 = vadd.xlane.f32.xlu2 %v1727_v23 }
 0xbb1   :  { %1741 = vadd.xlane.f32.xlu2 %v1729_v31 }
 0xbb9   :  { %1743 = vadd.xlane.f32.xlu2 %v1730_v47  ;;  %1938 = vperm.xlu1 %2674, %v1714_v52  }
 0xbc1   :  { %1745 = vadd.xlane.f32.xlu2 %v1731_v32 }
 0xbc9   :  { %1747 = vadd.xlane.f32.xlu2 %v1732_v33 }
 0xc13   :  { %v1736_v56 = vpop.xlane.xlu0 %1735  ;;  %v1740_v9 = vpop.xlane.xlu1 %1739 }
 0xc14   :  { %v1734_v36 = vpop.xlane.xlu2 %1733  ;;  %v3583_v49 = vmul.f32 %v1736_v56, %v3056_v54  ;;  %v3598_v22 = vmul.f32 %v1740_v9, %v3070_v60 }
 0xc15   :  { %v3579_v39 = vmul.f32 %v1734_v36, %v3050_v51 }
 0xc17   :  { %1759 = vperm.xlu2 %2672, %v3579_v39  }
 0xc1c   :  { %v1738_v14 = vpop.xlane.xlu2 %1737 }
 0xc1d   :  { %v3587_v43 = vmul.f32 %v1738_v14, %v3063_v57 }
 0xc1f   :  { %1764 = vperm.xlu2 %2672, %v3583_v49  }
 0xc24   :  { %v1742_v25 = vpop.xlane.xlu2 %1741 }
 0xc25   :  { %v3590_v40 = vmul.f32 %v1742_v25, %v3077_v63 }
 0xc27   :  { %1769 = vperm.xlu2 %2672, %v3587_v43   ;;  %1779 = vperm.xlu0 %2673, %v3590_v40  }
 0xc2b   :  { %v3613_v44 = vpop.permute.xlu1 %1938 }
 0xc2c   :  { %v1744_v16 = vpop.xlane.xlu2 %1743 }
 0xc2d   :  { %v3602_v59 = vmul.f32 %v1744_v16, %v3084_v10 }
 0xc2f   :  { %1774 = vperm.xlu2 %2672, %v3598_v22   ;;  %1933 = vperm.xlu0 %2673, %v1713_v11  }
 0xc34   :  { %v1746_v41 = vpop.xlane.xlu2 %1745 }
 0xc35   :  { %v3606_v55 = vmul.f32 %v1746_v41, %v3091_v13 }
 0xc37   :  { %1784 = vperm.xlu2 %2672, %v3602_v59  }
 0xc3c   :  { %v1748_v15 = vpop.xlane.xlu2 %1747 }
 0xc3d   :  { %v3609_v58 = vmul.f32 %v1748_v15, %v3100_v19 }
 0xc3f   :  { %1789 = vperm.xlu2 %2672, %v3606_v55   ;;  %1794 = vperm.xlu1 %2674, %v3609_v58  }
 0xc71   :  { %v1760_v20 = vpop.permute.xlu2 %1759 }
 0xc72   :  { %v1797_v45 = vmul.f32 %v1760_v20, %v2923_v0 }
 0xc79   :  { %v1765_v62 = vpop.permute.xlu2 %1764 }
 0xc7a   :  { %v1798_v12 = vmul.f32 %v1765_v62, %v2928_v1 }
 0xc81   :  { %v1770_v34 = vpop.permute.xlu2 %1769 }
 0xc82   :  { %v1799_v29 = vmul.f32 %v1770_v34, %v2933_v2 }
 0xc89   :  { %v1775_v8 = vpop.permute.xlu2 %1774 }
 0xc8a   :  { %v1800_v23 = vmul.f32 %v1775_v8, %v2938_v3 }
 0xc91   :  { %v1785_v38 = vpop.permute.xlu2 %1784 }
 0xc92   :  { %v1802_v35 = vmul.f32 %v1785_v38, %v2948_v5 }
 0xc94   :  { %v1806_v47 = vmax.f32 %v1798_v12, %v1802_v35  ;;  %v1716_v35 = vld [vmem:[%s3872_s4 + $0x38] sm:$0xff]  ;;  %v1715_v12 = vld [vmem:[%s3872_s4 + $0x30] sm:$0xff] }
 0xc99   :  { %v1780_v21 = vpop.permute.xlu0 %1779  ;;  %v1790_v42 = vpop.permute.xlu2 %1789 }
 0xc9a   :  { %v1801_v24 = vmul.f32 %v1780_v21, %v2943_v4  ;;  %v1803_v26 = vmul.f32 %v1790_v42, %v2953_v6 }
 0xc9c   :  { %v1805_v31 = vmax.f32 %v1797_v45, %v1801_v24  ;;  %v1807_v32 = vmax.f32 %v1799_v29, %v1803_v26  ;;  %v1711_v26 = vld [vmem:[%s3870_s2 + $0x30] sm:$0xff] }
 0xc9d   :  { %v1719_v29 = vld [vmem:[%s3874_s6 + $0x30] sm:$0xff] }
 0xc9e   :  { %v1809_v36 = vmax.f32 %v1805_v31, %v1806_v47  ;;  %v1721_v31 = vld [vmem:[%s3875_s7 + $0x30] sm:$0xff] }
 0xc9f   :  { %v1723_v47 = vld [vmem:[%s3876_s8 + $0x30] sm:$0xff] }
 0xcb1   :  { %v1795_v28 = vpop.permute.xlu1 %1794 }
 0xcb2   :  { %v1804_v52 = vmul.f32 %v1795_v28, %v2958_v7  ;;  %v1712_v28 = vld [vmem:[%s3870_s2 + $0x38] sm:$0xff] }
 0xcb4   :  { %v1808_v33 = vmax.f32 %v1800_v23, %v1804_v52  ;;  %v1720_v23 = vld [vmem:[%s3874_s6 + $0x38] sm:$0xff]  ;;  %s2607_s6 = sshll.u32 %s3882_s14, 4  ;;  %s2608_s6 = int_to_ptr.hbm [resolvable:$true] %s2607_s6 }
 0xcb5   :  { %v1722_v52 = vld [vmem:[%s3875_s7 + $0x38] sm:$0xff] }
 0xcb6   :  { %v1810_v56 = vmax.f32 %v1807_v32, %v1808_v33  ;;  %v1724_v32 = vld [vmem:[%s3876_s8 + $0x38] sm:$0xff]  ;;  %v1934_v33 = vpop.permute.xlu0 %1933 }
 0xcb8   :  { %v1811_v14 = vmax.f32 %v1809_v36, %v1810_v56  ;;  %v1717_v36 = vld [vmem:[%s3873_s5 + $0x30] sm:$0xff] }
 0xcba   :  { %v1812_v25 = vrot.slane %v1811_v14, 4 }
 0xcbc   :  { %v1813_v9 = vmax.f32 %v1811_v14, %v1812_v25 }
 0xcbe   :  { %v1814_v16 = vrot.slane %v1813_v9, 2 }
 0xcc0   :  { %v1815_v11 = vmax.f32 %v1813_v9, %v1814_v16  ;;  %v1718_v9 = vld [vmem:[%s3873_s5 + $0x38] sm:$0xff] }
 0xcc2   :  { %v1816_v41 = vrot.slane %v1815_v11, 1 }
 0xcc4   :  { %v1817_v15 = vmax.f32 %v1815_v11, %v1816_v41 }
 0xcc6   :  { %v1818_v20 = vmul.f32 %v1817_v15, %v3142_v30 }
 0xcc8   :  { %v1821_v62 = vmul.f32 %v1818_v20, %v2933_v2  ;;  %v1820_v34 = vmul.f32 %v1818_v20, %v2928_v1  ;;  %v1819_v8 = vmul.f32 %v1818_v20, %v2923_v0  ;;  %v1823_v38 = vmul.f32 %v1818_v20, %v2943_v4 }
 0xcc9   :  { %v1822_v21 = vmul.f32 %v1818_v20, %v2938_v3  ;;  %v1825_v42 = vmul.f32 %v1818_v20, %v2953_v6  ;;  %v1824_v24 = vmul.f32 %v1818_v20, %v2948_v5  ;;  %v1826_v45 = vmul.f32 %v1818_v20, %v2958_v7 }
 0xcca   :  { %1831 = vmax.xlane.f32.xlu1 %v1821_v62  ;;  %1829 = vmax.xlane.f32.xlu0 %v1820_v34 }
 0xccb   :  { %1827 = vmax.xlane.f32.xlu2 %v1819_v8 }
 0xcd2   :  { %1835 = vmax.xlane.f32.xlu0 %v1823_v38 }
 0xcd3   :  { %1833 = vmax.xlane.f32.xlu2 %v1822_v21 }
 0xcda   :  { %1839 = vmax.xlane.f32.xlu0 %v1825_v42 }
 0xcdb   :  { %1837 = vmax.xlane.f32.xlu2 %v1824_v24 }
 0xce3   :  { %1841 = vmax.xlane.f32.xlu2 %v1826_v45 }
 0xcee   :  { %1951 = vperm.xlu0 %2673, %v1716_v35  }
 0xcf6   :  { %1996 = vperm.xlu0 %2673, %v1711_v26  }
 0xcfb   :  { %1946 = vperm.xlu2 %2672, %v1715_v12  }
 0xd03   :  { %2001 = vperm.xlu2 %2672, %v1712_v28  }
 0xd0b   :  { %2069 = vperm.xlu2 %2672, %v1719_v29  }
 0xd13   :  { %2074 = vperm.xlu2 %2672, %v1720_v23  }
 0xd18   :  { %1867 = vxpose.xlu0.b32.start [1/8] (short) (narrow) %v3579_v39, 8 }
 0xd1b   :  { %2082 = vperm.xlu2 %2672, %v1721_v31  }
 0xd20   :  { %1868 = vxpose.xlu0.b32.cont [2/8] (short) (narrow) %v3583_v49, 8 }
 0xd23   :  { %2087 = vperm.xlu2 %2672, %v1722_v52  }
 0xd28   :  { %1869 = vxpose.xlu0.b32.cont [3/8] (short) (narrow) %v3587_v43, 8 }
 0xd2b   :  { %2133 = vperm.xlu2 %2672, %v1723_v47  }
 0xd30   :  { %1870 = vxpose.xlu0.b32.cont [4/8] (short) (narrow) %v3598_v22, 8 }
 0xd33   :  { %2138 = vperm.xlu2 %2672, %v1724_v32  }
 0xd38   :  { %1871 = vxpose.xlu0.b32.cont [5/8] (short) (narrow) %v3590_v40, 8 }
 0xd3b   :  { %2154 = vperm.xlu2 %2672, %v1717_v36  }
 0xd3d   :  { %v1830_v25 = vpop.xlane.xlu0 %1829  ;;  %v1832_v20 = vpop.xlane.xlu1 %1831 }
 0xd3e   :  { %v1828_v56 = vpop.xlane.xlu2 %1827  ;;  %v1844_v11 = vmul.f32 %v1830_v25, %v3056_v54  ;;  %v1845_v62 = vmul.f32 %v1832_v20, %v3063_v57 }
 0xd3f   :  { %v1843_v14 = vmul.f32 %v1828_v56, %v3050_v51 }
 0xd40   :  { %1872 = vxpose.xlu0.b32.cont [6/8] (short) (narrow) %v3602_v59, 8  ;;  %v1852_v15 = vmul.f32 0.5, %v1844_v11  ;;  %v1853_v8 = vmul.f32 0.5, %v1845_v62 }
 0xd41   :  { %v1851_v16 = vmul.f32 0.5, %v1843_v14 }
 0xd42   :  { %v1860_v34 = vsub.f32 %v3583_v49, %v1852_v15  ;;  %v1861_v21 = vsub.f32 %v3587_v43, %v1853_v8 }
 0xd43   :  { %v1859_v41 = vsub.f32 %v3579_v39, %v1851_v16  ;;  %2159 = vperm.xlu2 %2672, %v1718_v9  }
 0xd45   :  { %1899 = vxpose.xlu1.b32.start [1/8] (short) (narrow) %v1859_v41, 8  ;;  %v1836_v24 = vpop.xlane.xlu0 %1835 }
 0xd46   :  { %v1834_v38 = vpop.xlane.xlu2 %1833  ;;  %v1847_v45 = vmul.f32 %v1836_v24, %v3077_v63 }
 0xd47   :  { %v1846_v42 = vmul.f32 %v1834_v38, %v3070_v60 }
 0xd48   :  { %1873 = vxpose.xlu0.b32.cont [7/8] (short) (narrow) %v3606_v55, 8  ;;  %v1855_v26 = vmul.f32 0.5, %v1847_v45 }
 0xd49   :  { %v1854_v39 = vmul.f32 0.5, %v1846_v42 }
 0xd4a   :  { %v1863_v49 = vsub.f32 %v3590_v40, %v1855_v26 }
 0xd4b   :  { %v1862_v35 = vsub.f32 %v3598_v22, %v1854_v39 }
 0xd4d   :  { %1900 = vxpose.xlu1.b32.cont [2/8] (short) (narrow) %v1860_v34, 8  ;;  %v1840_v23 = vpop.xlane.xlu0 %1839 }
 0xd4e   :  { %v1838_v12 = vpop.xlane.xlu2 %1837  ;;  %v1849_v43 = vmul.f32 %v1840_v23, %v3091_v13 }
 0xd4f   :  { %v1848_v28 = vmul.f32 %v1838_v12, %v3084_v10 }
 0xd50   :  { %1874 = vxpose.xlu0.b32.end [8/8] (short) (narrow) %v3609_v58, 8  ;;  %v1857_v52 = vmul.f32 0.5, %v1849_v43 }
 0xd51   :  { %v1856_v29 = vmul.f32 0.5, %v1848_v28 }
 0xd52   :  { %v1865_v32 = vsub.f32 %v3606_v55, %v1857_v52 }
 0xd53   :  { %v1864_v31 = vsub.f32 %v3602_v59, %v1856_v29 }
 0xd55   :  { %1901 = vxpose.xlu1.b32.cont [3/8] (short) (narrow) %v1861_v21, 8 }
 0xd56   :  { %v1842_v47 = vpop.xlane.xlu2 %1841 }
 0xd57   :  { %v1850_v22 = vmul.f32 %v1842_v47, %v3100_v19 }
 0xd59   :  { %v1858_v36 = vmul.f32 0.5, %v1850_v22 }
 0xd5b   :  { %v1866_v40 = vsub.f32 %v3609_v58, %v1858_v36 }
 0xd5d   :  { %1902 = vxpose.xlu1.b32.cont [4/8] (short) (narrow) %v1862_v35, 8 }
 0xd5e   :  { %v1947_v16 = vpop.permute.xlu2 %1946 }
 0xd60   :  { %v1952_v11 = vpop.permute.xlu0 %1951 }
 0xd65   :  { %1903 = vxpose.xlu1.b32.cont [5/8] (short) (narrow) %v1863_v49, 8 }
 0xd66   :  { %v2002_v36 = vpop.permute.xlu2 %2001 }
 0xd68   :  { %v1997_v62 = vpop.permute.xlu0 %1996 }
 0xd6d   :  { %1904 = vxpose.xlu1.b32.cont [6/8] (short) (narrow) %v1864_v31, 8 }
 0xd75   :  { %1905 = vxpose.xlu1.b32.cont [7/8] (short) (narrow) %v1865_v32, 8 }
 0xd7d   :  { %1906 = vxpose.xlu1.b32.end [8/8] (short) (narrow) %v1866_v40, 8 }
 0xdbc   :  { %v1883_v58 = vpop.trf.xlu0 }
 0xdbd   :  { %vm2023_vm8 = vweird.f32 %v1883_v58 }
 0xde9   :  { %v1915_v56 = vpop.trf.xlu1 }
 0xdea   :  { %v1941_v14 = vperm.slane %v1915_v56, 0 }
 0xdec   :  { %v1942_v25 = vmul.f32 %v1941_v14, %v1934_v33  ;;  %v1943_v9 = vmul.f32 %v1941_v14, %v3613_v44 }
 0xdee   :  { %v1954_v59 = vadd.f32 %v1947_v16, %v1942_v25  ;;  %v1955_v41 = vadd.f32 %v1952_v11, %v1943_v9 }
 0xdf0   :  { %v2659_v15 = vmul.f32 -1.442695, %v1954_v59  ;;  %v2660_v20 = vmul.f32 -1.442695, %v1955_v41 }
 0xdf2   :  { %2749 = vpow2.f32 %v2659_v15 }
 0xdf3   :  { %2751 = vpow2.f32 %v2660_v20 }
 0xdf8   :  { %v2750_v55 = vpop.eup %2749 }
 0xdf9   :  { %v2752_v34 = vpop.eup %2751  ;;  %v1962_v8 = vadd.f32 1.0, %v2750_v55 }
 0xdfa   :  { %v1963_v38 = vadd.f32 1.0, %v2752_v34  ;;  %v2029_v34 = vand.u32 2147483648, %v1883_v58 }
 0xdfb   :  { %2753 = vrcp.f32 %v1962_v8  ;;  %v1975_v24 = vand.u32 2147483648, %v1962_v8  ;;  %v1973_v26 = vand.u32 2147483647, %v1962_v8  ;;  %vm1969_vm0 = vweird.f32 %v1962_v8 }
 0xdfc   :  { %2755 = vrcp.f32 %v1963_v38  ;;  %v1990_v12 = vand.u32 2147483648, %v1963_v38  ;;  %v1988_v28 = vand.u32 2147483647, %v1963_v38  ;;  %vm1984_vm3 = vweird.f32 %v1963_v38 }
 0xdfd   :  { %2757 = vrcp.f32 %v1883_v58  ;;  %v1976_v43 = vor.u32 1.1754944e-38, %v1975_v24  ;;  %vm1974_vm4 = vcmp.eq.f32.partialorder %v1973_v26, 8.507059e+37  ;;  %v1554_v24 = vmul.f32 %v3537_v46, %v3218_v27 }
 0xdfe   :  { %v1991_v52 = vor.u32 1.1754944e-38, %v1990_v12  ;;  %vm1989_vm6 = vcmp.eq.f32.partialorder %v1988_v28, 8.507059e+37 }
 0xe01   :  { %v2754_v21 = vpop.eup %2753 }
 0xe02   :  { %v2756_v33 = vpop.eup %2755  ;;  %v1965_v42 = vmul.f32 %v2754_v21, %v1962_v8  ;;  %vm1970_vm14 = vweird.f32 %v2754_v21 }
 0xe03   :  { %v1980_v44 = vmul.f32 %v2756_v33, %v1963_v38  ;;  %vm1985_vm15 = vweird.f32 %v2756_v33  ;;  %v2758_v23 = vpop.eup %2757  ;;  %vm1971_vm1 = vmor %vm1969_vm0, %vm1970_vm14  ;;  %v2027_v38 = vand.u32 2147483647, %v1883_v58 }
 0xe04   :  { %v1966_v39 = vsub.f32 1.0, %v1965_v42  ;;  %vm1986_vm5 = vmor %vm1984_vm3, %vm1985_vm15  ;;  %v2019_v40 = vmul.f32 %v2758_v23, %v1883_v58  ;;  %vm2024_vm9 = vweird.f32 %v2758_v23  ;;  %v2070_v58 = vpop.permute.xlu2 %2069 }
 0xe05   :  { %v1981_v45 = vsub.f32 1.0, %v1980_v44  ;;  %vm2025_vm10 = vmor %vm2023_vm8, %vm2024_vm9  ;;  %vm2028_vm11 = vcmp.eq.f32.partialorder %v2027_v38, 8.507059e+37 }
 0xe06   :  { %v1967_v35 = vmul.f32 %v2754_v21, %v1966_v39  ;;  %v2020_v11 = vsub.f32 1.0, %v2019_v40 }
 0xe07   :  { %v1982_v49 = vmul.f32 %v2756_v33, %v1981_v45 }
 0xe08   :  { %v1968_v29 = vadd.f32 %v2754_v21, %v1967_v35  ;;  %v2021_v15 = vmul.f32 %v2758_v23, %v2020_v11 }
 0xe09   :  { %v1983_v31 = vadd.f32 %v2756_v33, %v1982_v49 }
 0xe0a   :  { %v1972_v47 = vsel %vm1971_vm1, %v2754_v21, %v1968_v29  ;;  %v2022_v8 = vadd.f32 %v2758_v23, %v2021_v15 }
 0xe0b   :  { %v1977_v32 = vsel %vm1974_vm4, %v1976_v43, %v1972_v47  ;;  %v1987_v22 = vsel %vm1986_vm5, %v2756_v33, %v1983_v31  ;;  %vm2527_vm5 = vweird.f32 %v3117_v37 }
 0xe0c   :  { %v1992_v56 = vsel %vm1989_vm6, %v1991_v52, %v1987_v22  ;;  %v2004_v14 = vmul.f32 %v1997_v62, %v1977_v32  ;;  %v2030_v62 = vor.u32 1.1754944e-38, %v2029_v34  ;;  %v2026_v44 = vsel %vm2025_vm10, %v2758_v23, %v2022_v8  ;;  %v2075_v28 = vpop.permute.xlu2 %2074 }
 0xe0d   :  { %v2005_v25 = vmul.f32 %v2002_v36, %v1992_v56  ;;  %v1603_v23 = vmul.f32 %v3548_v17, %v3142_v30 }
 0xe0e   :  { %v2006_v9 = vsel %vm616_vm2, %v2004_v14, 0.0  ;;  %v2031_v45 = vsel %vm2028_vm11, %v2030_v62, %v2026_v44 }
 0xe0f   :  { %v2007_v16 = vsel %vm616_vm2, %v2005_v25, 0.0 }
 0xe10   :  { %v2008_v59 = vadd.f32 %v2007_v16, %v2006_v9 }
 0xe12   :  { %v2009_v41 = vrot.slane %v2008_v59, 4 }
 0xe14   :  { %v2010_v20 = vadd.f32 %v2009_v41, %v2008_v59  ;;  %v2083_v29 = vpop.permute.xlu2 %2082 }
 0xe16   :  { %v2011_v55 = vrot.slane %v2010_v20, 2 }
 0xe18   :  { %v2012_v21 = vadd.f32 %v2011_v55, %v2010_v20 }
 0xe1a   :  { %v2013_v33 = vrot.slane %v2012_v21, 1 }
 0xe1c   :  { %v2014_v42 = vadd.f32 %v2013_v33, %v2012_v21  ;;  %v2088_v43 = vpop.permute.xlu2 %2087 }
 0xe1e   :  { %v2015_v39 = vmul.f32 %v2014_v42, %v3218_v27 }
 0xe20   :  { %v2033_v35 = vmul.f32 %v2031_v45, %v2015_v39  ;;  %v3698_v26 = vadd.f32 %v2015_v39, %v1554_v24 }
 0xe22   :  { %v2035_v12 = vrot.slane %v2033_v35, 7 }
 0xe24   :  { %v2037_v49 = vsel %vm648_vm7, %v2015_v39, %v2035_v12  ;;  %v2134_v14 = vpop.permute.xlu2 %2133 }
 0xe25   :  { %2661 = vmatmul.msk.f32.vlgmr.msra.gmra.mxu3 %vm616_vm2, %v2037_v49 }
 0xea8   :  { %v2058_v31 = vpop.f32.mrf.mxu3 }
 0xea9   :  { %v2061_v52 = vmax.f32 %v2058_v31, 0.0  ;;  %v2064_v46 = vmul.f32 %v2058_v31, %v3557_v18  ;;  %v2139_v18 = vpop.permute.xlu2 %2138 }
 0xeab   :  { %v2062_v47 = vsub.f32 %v3551_v61, %v2061_v52  ;;  %v3706_v32 = vadd.f32 %v2064_v46, %v1603_v23 }
 0xead   :  { %v2063_v22 = vmul.f32 %v2062_v47, %v3142_v30 }
 0xeaf   :  { %v2077_v36 = vperm.slane %v2063_v22, 0  ;;  %v2130_v16 = vsub.f32 %v2063_v22, %v3230_v53 }
 0xeb1   :  { %v2078_v40 = vmul.f32 %v2077_v36, %v2070_v58  ;;  %v2079_v56 = vmul.f32 %v2077_v36, %v2075_v28  ;;  %v2141_v17 = vperm.slane %v2130_v16, 0  ;;  %v2155_v42 = vpop.permute.xlu2 %2154 }
 0xeb3   :  { %v2090_v25 = vadd.f32 %v2083_v29, %v2078_v40  ;;  %v2091_v9 = vadd.f32 %v2088_v43, %v2079_v56  ;;  %v2142_v41 = vmul.f32 %v2141_v17, %v2134_v14  ;;  %v2143_v15 = vmul.f32 %v2141_v17, %v2139_v18 }
 0xeb5   :  { %v2662_v11 = vmul.f32 -1.442695, %v2090_v25  ;;  %v2663_v59 = vmul.f32 -1.442695, %v2091_v9  ;;  %v2144_v8 = vmax.f32 %v2142_v41, 0.0  ;;  %v2145_v38 = vmax.f32 %v2143_v15, 0.0 }
 0xeb7   :  { %2759 = vpow2.f32 %v2662_v11  ;;  %v2146_v21 = vmul.f32 -0.6931472, %v2144_v8  ;;  %v2147_v33 = vmul.f32 -0.6931472, %v2145_v38 }
 0xeb8   :  { %2761 = vpow2.f32 %v2663_v59 }
 0xeb9   :  { %v2148_v24 = vmul.f32 1.442695, %v2146_v21  ;;  %v2150_v35 = vmul.f32 1.442695, %v2147_v33  ;;  %v2160_v56 = vpop.permute.xlu2 %2159 }
 0xebd   :  { %v2760_v61 = vpop.eup %2759 }
 0xebe   :  { %v2762_v20 = vpop.eup %2761  ;;  %v2098_v55 = vadd.f32 1.0, %v2760_v61 }
 0xebf   :  { %v2099_v34 = vadd.f32 1.0, %v2762_v20 }
 0xec0   :  { %2763 = vrcp.f32 %v2098_v55  ;;  %v2111_v12 = vand.u32 2147483648, %v2098_v55  ;;  %v2109_v28 = vand.u32 2147483647, %v2098_v55  ;;  %vm2105_vm14 = vweird.f32 %v2098_v55 }
 0xec1   :  { %2765 = vrcp.f32 %v2099_v34  ;;  %v2126_v29 = vand.u32 2147483648, %v2099_v34  ;;  %v2124_v31 = vand.u32 2147483647, %v2099_v34  ;;  %vm2120_vm0 = vweird.f32 %v2099_v34 }
 0xec2   :  { %2767 = vpow2.f32 %v2148_v24  ;;  %v2112_v52 = vor.u32 1.1754944e-38, %v2111_v12  ;;  %vm2110_vm1 = vcmp.eq.f32.partialorder %v2109_v28, 8.507059e+37 }
 0xec3   :  { %2769 = vpow2.f32 %v2150_v35  ;;  %v2127_v22 = vor.u32 1.1754944e-38, %v2126_v29  ;;  %vm2125_vm4 = vcmp.eq.f32.partialorder %v2124_v31, 8.507059e+37 }
 0xec4   :  { %2771 = vrcp.f32 %v3117_v37 }
 0xec6   :  { %v2764_v62 = vpop.eup %2763 }
 0xec7   :  { %v2766_v53 = vpop.eup %2765  ;;  %v2101_v44 = vmul.f32 %v2764_v62, %v2098_v55  ;;  %vm2106_vm12 = vweird.f32 %v2764_v62 }
 0xec8   :  { %v2116_v39 = vmul.f32 %v2766_v53, %v2099_v34  ;;  %vm2121_vm13 = vweird.f32 %v2766_v53  ;;  %vm2107_vm15 = vmor %vm2105_vm14, %vm2106_vm12  ;;  %v2768_v9 = vpop.eup %2767 }
 0xec9   :  { %v2102_v45 = vsub.f32 1.0, %v2101_v44  ;;  %vm2122_vm3 = vmor %vm2120_vm0, %vm2121_vm13  ;;  %v2770_v11 = vpop.eup %2769 }
 0xeca   :  { %v2117_v49 = vsub.f32 1.0, %v2116_v39 }
 0xecb   :  { %v2103_v58 = vmul.f32 %v2764_v62, %v2102_v45 }
 0xecc   :  { %v2118_v43 = vmul.f32 %v2766_v53, %v2117_v49 }
 0xecd   :  { %v2104_v23 = vadd.f32 %v2764_v62, %v2103_v58 }
 0xece   :  { %v2119_v46 = vadd.f32 %v2766_v53, %v2118_v43 }
 0xecf   :  { %v2108_v47 = vsel %vm2107_vm15, %v2764_v62, %v2104_v23  ;;  %v2176_v23 = vld [vmem:[%s3871_s3 + $0x40] sm:$0xff] }
 0xed0   :  { %v2113_v36 = vsel %vm2110_vm1, %v2112_v52, %v2108_v47  ;;  %v2123_v40 = vsel %vm2122_vm3, %v2766_v53, %v2119_v46 }
 0xed1   :  { %v2128_v14 = vsel %vm2125_vm4, %v2127_v22, %v2123_v40  ;;  %v2162_v25 = vmul.f32 %v2155_v42, %v2113_v36 }
 0xed2   :  { %v2163_v16 = vmul.f32 %v2160_v56, %v2128_v14  ;;  %v2178_v56 = vld [vmem:[%s3872_s4 + $0x40] sm:$0xff]  ;;  %v2177_v14 = vld [vmem:[%s3871_s3 + $0x48] sm:$0xff] }
 0xed3   :  { %v2164_v59 = vmul.f32 %v2768_v9, %v2162_v25 }
 0xed4   :  { %v2165_v17 = vmul.f32 %v2770_v11, %v2163_v16 }
 0xed6   :  { %v2166_v18 = vadd.f32 %v2165_v17, %v2164_v59 }
 0xed8   :  { %v2167_v41 = vrot.slane %v2166_v18, 4 }
 0xeda   :  { %v2168_v61 = vadd.f32 %v2167_v41, %v2166_v18 }
 0xedc   :  { %v2169_v15 = vrot.slane %v2168_v61, 2 }
 0xede   :  { %v2170_v20 = vadd.f32 %v2169_v15, %v2168_v61 }
 0xee0   :  { %v2171_v55 = vrot.slane %v2170_v20, 1 }
 0xee2   :  { %v2172_v34 = vadd.f32 %v2171_v55, %v2170_v20 }
 0xee4   :  { %v3711_v8 = vmul.f32 %v2172_v34, %v3142_v30 }
 0xee6   :  { %v2182_v38 = vmul.f32 %v3711_v8, %v2933_v2  ;;  %v2181_v21 = vmul.f32 %v3711_v8, %v2928_v1  ;;  %v2180_v33 = vmul.f32 %v3711_v8, %v2923_v0  ;;  %v2183_v62 = vmul.f32 %v3711_v8, %v2938_v3 }
 0xee7   :  { %v2184_v53 = vmul.f32 %v3711_v8, %v2943_v4  ;;  %v2185_v42 = vmul.f32 %v3711_v8, %v2948_v5  ;;  %v2186_v44 = vmul.f32 %v3711_v8, %v2953_v6  ;;  %v2187_v39 = vmul.f32 %v3711_v8, %v2958_v7 }
 0xee8   :  { %2192 = vadd.xlane.f32.xlu1 %v2182_v38  ;;  %2190 = vadd.xlane.f32.xlu0 %v2181_v21 }
 0xee9   :  { %2188 = vadd.xlane.f32.xlu2 %v2180_v33 }
 0xef1   :  { %2194 = vadd.xlane.f32.xlu2 %v2183_v62 }
 0xef9   :  { %2196 = vadd.xlane.f32.xlu2 %v2184_v53 }
 0xf01   :  { %2198 = vadd.xlane.f32.xlu2 %v2185_v42 }
 0xf09   :  { %2200 = vadd.xlane.f32.xlu2 %v2186_v44 }
 0xf11   :  { %2202 = vadd.xlane.f32.xlu2 %v2187_v39 }
 0xf5b   :  { %v2191_v35 = vpop.xlane.xlu0 %2190  ;;  %v2193_v58 = vpop.xlane.xlu1 %2192 }
 0xf5c   :  { %v2189_v24 = vpop.xlane.xlu2 %2188  ;;  %v3734_v49 = vmul.f32 %v2191_v35, %v3056_v54  ;;  %v3738_v29 = vmul.f32 %v2193_v58, %v3063_v57 }
 0xf5d   :  { %v3730_v45 = vmul.f32 %v2189_v24, %v3050_v51 }
 0xf5f   :  { %2214 = vperm.xlu2 %2672, %v3730_v45  }
 0xf64   :  { %v2195_v12 = vpop.xlane.xlu2 %2194 }
 0xf65   :  { %v3749_v52 = vmul.f32 %v2195_v12, %v3070_v60 }
 0xf67   :  { %2219 = vperm.xlu2 %2672, %v3734_v49  }
 0xf6c   :  { %v2197_v28 = vpop.xlane.xlu2 %2196 }
 0xf6d   :  { %v3741_v43 = vmul.f32 %v2197_v28, %v3077_v63 }
 0xf6f   :  { %2224 = vperm.xlu2 %2672, %v3738_v29   ;;  %2234 = vperm.xlu1 %2674, %v3741_v43  }
 0xf74   :  { %v2199_v31 = vpop.xlane.xlu2 %2198 }
 0xf75   :  { %v3753_v47 = vmul.f32 %v2199_v31, %v3084_v10 }
 0xf77   :  { %2229 = vperm.xlu2 %2672, %v3749_v52   ;;  %2388 = vperm.xlu1 %2674, %v2176_v23  }
 0xf7c   :  { %v2201_v46 = vpop.xlane.xlu2 %2200 }
 0xf7d   :  { %v3757_v36 = vmul.f32 %v2201_v46, %v3091_v13 }
 0xf7f   :  { %2239 = vperm.xlu2 %2672, %v3753_v47  }
 0xf84   :  { %v2203_v22 = vpop.xlane.xlu2 %2202 }
 0xf85   :  { %v3760_v40 = vmul.f32 %v2203_v22, %v3100_v19 }
 0xf87   :  { %2244 = vperm.xlu2 %2672, %v3757_v36   ;;  %2249 = vperm.xlu0 %2673, %v3760_v40  }
 0xf8f   :  { %2401 = vperm.xlu2 %2672, %v2178_v56   ;;  %2393 = vperm.xlu0 %2673, %v2177_v14  }
 0xfb9   :  { %v2215_v25 = vpop.permute.xlu2 %2214 }
 0xfba   :  { %v2252_v61 = vmul.f32 %v2215_v25, %v2923_v0 }
 0xfc1   :  { %v2220_v9 = vpop.permute.xlu2 %2219 }
 0xfc2   :  { %v2253_v55 = vmul.f32 %v2220_v9, %v2928_v1 }
 0xfc9   :  { %v2225_v16 = vpop.permute.xlu2 %2224 }
 0xfca   :  { %v2254_v38 = vmul.f32 %v2225_v16, %v2933_v2 }
 0xfd1   :  { %v2230_v11 = vpop.permute.xlu2 %2229 }
 0xfd2   :  { %v2255_v21 = vmul.f32 %v2230_v11, %v2938_v3 }
 0xfd9   :  { %v2240_v59 = vpop.permute.xlu2 %2239 }
 0xfda   :  { %v2257_v15 = vmul.f32 %v2240_v59, %v2948_v5 }
 0xfdc   :  { %v2261_v53 = vmax.f32 %v2253_v55, %v2257_v15 }
 0xfe1   :  { %v2235_v17 = vpop.permute.xlu1 %2234  ;;  %v2245_v18 = vpop.permute.xlu2 %2244 }
 0xfe2   :  { %v2256_v41 = vmul.f32 %v2235_v17, %v2943_v4  ;;  %v2258_v20 = vmul.f32 %v2245_v18, %v2953_v6  ;;  %v2179_v18 = vld [vmem:[%s3872_s4 + $0x48] sm:$0xff] }
 0xfe4   :  { %v2260_v33 = vmax.f32 %v2252_v61, %v2256_v41  ;;  %v2262_v42 = vmax.f32 %v2254_v38, %v2258_v20  ;;  %v2175_v41 = vld [vmem:[%s3870_s2 + $0x48] sm:$0xff]  ;;  %v2772_v61 = vpop.eup %2771  ;;  %v2174_v20 = vld [vmem:[%s3870_s2 + $0x40] sm:$0xff]  ;;  %v2533_v38 = vand.u32 2147483648, %v3117_v37 }
 0xfe5   :  { %v2523_v15 = vmul.f32 %v2772_v61, %v3117_v37  ;;  %vm2528_vm6 = vweird.f32 %v2772_v61 }
 0xfe6   :  { %v2264_v39 = vmax.f32 %v2260_v33, %v2261_v53  ;;  %v2531_v33 = vand.u32 2147483647, %v3117_v37  ;;  %vm2529_vm8 = vmor %vm2527_vm5, %vm2528_vm6  ;;  %v2534_v53 = vor.u32 1.1754944e-38, %v2533_v38 }
 0xfe7   :  { %v2524_v55 = vsub.f32 1.0, %v2523_v15 }
 0xfe8   :  { %vm2532_vm9 = vcmp.eq.f32.partialorder %v2531_v33, 8.507059e+37 }
 0xff9   :  { %v2250_v34 = vpop.permute.xlu0 %2249 }
 0xffa   :  { %v2259_v62 = vmul.f32 %v2250_v34, %v2958_v7  ;;  %v2525_v34 = vmul.f32 %v2772_v61, %v2524_v55 }
 0xffc   :  { %v2263_v44 = vmax.f32 %v2255_v21, %v2259_v62  ;;  %v2526_v21 = vadd.f32 %v2772_v61, %v2525_v34  ;;  %v2520_v62 = vld [vmem:[%s3869_s1] sm:$0x1]  ;;  %s2838_s1 = smov [#allocation7]  }
 0xffd   :  { %s2616_s2 = sshll.u32 %s2838_s1, 4  ;;  %s2617_s2 = int_to_ptr.vmem [resolvable:$true] %s2616_s2 }
 0xffe   :  { %v2265_v24 = vmax.f32 %v2262_v42, %v2263_v44  ;;  %v2530_v42 = vsel %vm2529_vm8, %v2772_v61, %v2526_v21  ;;  %v2521_v44 = vmul.f32 %v2520_v62, %v3139_v50  ;;  %v3812_v50 = vpop.permute.xlu2 %2401  ;;  %vm2598_vm8 = vcmask 516096  }
0x1000   :  { %v2266_v35 = vmax.f32 %v2264_v39, %v2265_v24  ;;  %v2535_v39 = vsel %vm2532_vm9, %v2534_v53, %v2530_v42 }
0x1001   :  { %v2536_v24 = vmul.f32 %v2535_v39, %v2521_v44 }
0x1002   :  { %v2267_v12 = vrot.slane %v2266_v35, 4 }
0x1004   :  { %v2268_v58 = vmax.f32 %v2266_v35, %v2267_v12  ;;  %v2539_v35 = vperm.slane %v2536_v24, 0 }
0x1006   :  { %v2269_v28 = vrot.slane %v2268_v58, 2  ;;  %v2541_v12 = vmul.f32 %v2539_v35, %v2923_v0  ;;  %v2543_v37 = vmul.f32 %v2539_v35, %v2933_v2 }
0x1008   :  { %v2270_v31 = vmax.f32 %v2268_v58, %v2269_v28  ;;  %v2542_v58 = vmul.f32 %v2539_v35, %v2928_v1  ;;  %v2544_v28 = vmul.f32 %v2539_v35, %v2938_v3 }
0x100a   :  { %v2271_v23 = vrot.slane %v2270_v31, 1 }
0x100c   :  { %v2272_v46 = vmax.f32 %v2270_v31, %v2271_v23  ;;  %v3815_v31 = vpop.permute.xlu1 %2388 }
0x100e   :  { %v2273_v22 = vmul.f32 %v2272_v46, %v3142_v30  ;;  %v3820_v46 = vpop.permute.xlu0 %2393 }
0x1010   :  { %v2276_v56 = vmul.f32 %v2273_v22, %v2933_v2  ;;  %v2275_v14 = vmul.f32 %v2273_v22, %v2928_v1  ;;  %v2274_v25 = vmul.f32 %v2273_v22, %v2923_v0  ;;  %v2280_v9 = vmul.f32 %v2273_v22, %v2953_v6 }
0x1011   :  { %v2279_v16 = vmul.f32 %v2273_v22, %v2948_v5  ;;  %v2277_v11 = vmul.f32 %v2273_v22, %v2938_v3  ;;  %v2278_v59 = vmul.f32 %v2273_v22, %v2943_v4  ;;  %v2281_v17 = vmul.f32 %v2273_v22, %v2958_v7 }
0x1012   :  { %2286 = vmax.xlane.f32.xlu0 %v2276_v56  ;;  %2284 = vmax.xlane.f32.xlu1 %v2275_v14  ;;  %v2545_v0 = vmul.f32 %v2539_v35, %v2943_v4  ;;  %v2546_v2 = vmul.f32 %v2539_v35, %v2948_v5  ;;  %v2547_v14 = vmul.f32 %v2539_v35, %v2953_v6 }
0x1013   :  { %2282 = vmax.xlane.f32.xlu2 %v2274_v25 }
0x101a   :  { %2294 = vmax.xlane.f32.xlu0 %v2280_v9  ;;  %2292 = vmax.xlane.f32.xlu1 %v2279_v16 }
0x101b   :  { %2288 = vmax.xlane.f32.xlu2 %v2277_v11  ;;  %v2548_v11 = vmul.f32 %v2539_v35, %v2958_v7 }
0x1023   :  { %2290 = vmax.xlane.f32.xlu2 %v2278_v59 }
0x102b   :  { %2296 = vmax.xlane.f32.xlu2 %v2281_v17 }
0x102e   :  { %2406 = vperm.xlu0 %2673, %v2179_v18  }
0x1036   :  { %2456 = vperm.xlu0 %2673, %v2175_v41  }
0x1043   :  { %2451 = vperm.xlu2 %2672, %v2174_v20  }
0x1060   :  { %2549 = vadd.xlane.f32.xlu0 %v2541_v12 }
0x1068   :  { %2551 = vadd.xlane.f32.xlu0 %v2542_v58 }
0x1069   :  { %2322 = vxpose.xlu2.b32.start [1/8] (short) (narrow) %v3730_v45, 8 }
0x1070   :  { %2553 = vadd.xlane.f32.xlu0 %v2543_v37 }
0x1071   :  { %2323 = vxpose.xlu2.b32.cont [2/8] (short) (narrow) %v3734_v49, 8 }
0x1078   :  { %2555 = vadd.xlane.f32.xlu0 %v2544_v28 }
0x1079   :  { %2324 = vxpose.xlu2.b32.cont [3/8] (short) (narrow) %v3738_v29, 8 }
0x1080   :  { %2557 = vadd.xlane.f32.xlu0 %v2545_v0 }
0x1081   :  { %2325 = vxpose.xlu2.b32.cont [4/8] (short) (narrow) %v3749_v52, 8 }
0x1085   :  { %v2285_v3 = vpop.xlane.xlu1 %2284  ;;  %v2287_v9 = vpop.xlane.xlu0 %2286 }
0x1086   :  { %v2283_v1 = vpop.xlane.xlu2 %2282  ;;  %v2299_v56 = vmul.f32 %v2285_v3, %v3056_v54  ;;  %v2300_v5 = vmul.f32 %v2287_v9, %v3063_v57 }
0x1087   :  { %v2298_v23 = vmul.f32 %v2283_v1, %v3050_v51 }
0x1088   :  { %2559 = vadd.xlane.f32.xlu0 %v2546_v2  ;;  %v2307_v25 = vmul.f32 0.5, %v2299_v56  ;;  %v2308_v59 = vmul.f32 0.5, %v2300_v5 }
0x1089   :  { %v2306_v22 = vmul.f32 0.5, %v2298_v23  ;;  %2326 = vxpose.xlu2.b32.cont [5/8] (short) (narrow) %v3741_v43, 8 }
0x108a   :  { %v2315_v51 = vsub.f32 %v3734_v49, %v2307_v25  ;;  %v2316_v54 = vsub.f32 %v3738_v29, %v2308_v59 }
0x108b   :  { %v2314_v4 = vsub.f32 %v3730_v45, %v2306_v22 }
0x108d   :  { %2354 = vxpose.xlu1.b32.start [1/8] (short) (narrow) %v2314_v4, 8  ;;  %v2293_v7 = vpop.xlane.xlu1 %2292  ;;  %v2295_v15 = vpop.xlane.xlu0 %2294 }
0x108e   :  { %v2289_v16 = vpop.xlane.xlu2 %2288  ;;  %v2303_v41 = vmul.f32 %v2293_v7, %v3084_v10 }
0x108f   :  { %v2301_v6 = vmul.f32 %v2289_v16, %v3070_v60  ;;  %v2304_v60 = vmul.f32 %v2295_v15, %v3091_v13 }
0x1090   :  { %2561 = vadd.xlane.f32.xlu0 %v2547_v14  ;;  %v2311_v29 = vmul.f32 0.5, %v2303_v41 }
0x1091   :  { %2327 = vxpose.xlu2.b32.cont [6/8] (short) (narrow) %v3753_v47, 8  ;;  %v2309_v45 = vmul.f32 0.5, %v2301_v6  ;;  %v2312_v55 = vmul.f32 0.5, %v2304_v60 }
0x1092   :  { %v2319_v20 = vsub.f32 %v3753_v47, %v2311_v29 }
0x1093   :  { %v2317_v57 = vsub.f32 %v3749_v52, %v2309_v45  ;;  %v2320_v52 = vsub.f32 %v3757_v36, %v2312_v55 }
0x1095   :  { %2355 = vxpose.xlu1.b32.cont [2/8] (short) (narrow) %v2315_v51, 8 }
0x1096   :  { %v2291_v17 = vpop.xlane.xlu2 %2290 }
0x1097   :  { %v2302_v49 = vmul.f32 %v2291_v17, %v3077_v63 }
0x1098   :  { %2563 = vadd.xlane.f32.xlu0 %v2548_v11 }
0x1099   :  { %2328 = vxpose.xlu2.b32.cont [7/8] (short) (narrow) %v3757_v36, 8  ;;  %v2310_v18 = vmul.f32 0.5, %v2302_v49 }
0x109b   :  { %v2318_v61 = vsub.f32 %v3741_v43, %v2310_v18 }
0x109d   :  { %2356 = vxpose.xlu1.b32.cont [3/8] (short) (narrow) %v2316_v54, 8 }
0x109e   :  { %v2297_v34 = vpop.xlane.xlu2 %2296 }
0x109f   :  { %v2305_v63 = vmul.f32 %v2297_v34, %v3100_v19 }
0x10a0   :  { %v2407_v21 = vpop.permute.xlu0 %2406 }
0x10a1   :  { %2329 = vxpose.xlu2.b32.end [8/8] (short) (narrow) %v3760_v40, 8  ;;  %v2313_v38 = vmul.f32 0.5, %v2305_v63 }
0x10a3   :  { %v2321_v10 = vsub.f32 %v3760_v40, %v2313_v38 }
0x10a5   :  { %2357 = vxpose.xlu1.b32.cont [4/8] (short) (narrow) %v2317_v57, 8 }
0x10a6   :  { %v2452_v0 = vpop.permute.xlu2 %2451 }
0x10a8   :  { %v3843_v43 = vpop.permute.xlu0 %2456 }
0x10ad   :  { %2358 = vxpose.xlu1.b32.cont [5/8] (short) (narrow) %v2318_v61, 8 }
0x10b5   :  { %2359 = vxpose.xlu1.b32.cont [6/8] (short) (narrow) %v2319_v20, 8 }
0x10bd   :  { %2360 = vxpose.xlu1.b32.cont [7/8] (short) (narrow) %v2320_v52, 8 }
0x10c5   :  { %2361 = vxpose.xlu1.b32.end [8/8] (short) (narrow) %v2321_v10, 8 }
0x10d3   :  { %v2550_v33 = vpop.xlane.xlu0 %2549 }
0x10d4   :  { %2565 = vxpose.xlu2.b32.start [1/8] (short) (narrow) %v2550_v33, 8 }
0x10db   :  { %v2552_v13 = vpop.xlane.xlu0 %2551 }
0x10dc   :  { %2566 = vxpose.xlu2.b32.cont [2/8] (short) (narrow) %v2552_v13, 8 }
0x10e3   :  { %v2554_v47 = vpop.xlane.xlu0 %2553 }
0x10e4   :  { %2567 = vxpose.xlu2.b32.cont [3/8] (short) (narrow) %v2554_v47, 8 }
0x10eb   :  { %v2556_v62 = vpop.xlane.xlu0 %2555 }
0x10ec   :  { %2568 = vxpose.xlu2.b32.cont [4/8] (short) (narrow) %v2556_v62, 8 }
0x10f3   :  { %v2558_v53 = vpop.xlane.xlu0 %2557 }
0x10f4   :  { %2569 = vxpose.xlu2.b32.cont [5/8] (short) (narrow) %v2558_v53, 8 }
0x10fb   :  { %v2560_v36 = vpop.xlane.xlu0 %2559 }
0x10fc   :  { %2570 = vxpose.xlu2.b32.cont [6/8] (short) (narrow) %v2560_v36, 8  ;;  %v2017_v36 = vmul.f32 %v3698_v26, %v3218_v27  ;;  %v2066_v26 = vmul.f32 %v3706_v32, %v3142_v30 }
0x1102   :  { %v2338_v3 = vpop.trf.xlu2 }
0x1103   :  { %v2562_v19 = vpop.xlane.xlu0 %2561  ;;  %vm2478_vm3 = vweird.f32 %v2338_v3  ;;  %v2484_v38 = vand.u32 2147483648, %v2338_v3  ;;  %v2482_v10 = vand.u32 2147483647, %v2338_v3 }
0x1104   :  { %2571 = vxpose.xlu2.b32.cont [7/8] (short) (narrow) %v2562_v19, 8 }
0x1105   :  { %v2485_v47 = vor.u32 1.1754944e-38, %v2484_v38  ;;  %vm2483_vm6 = vcmp.eq.f32.partialorder %v2482_v10, 8.507059e+37 }
0x110b   :  { %v2564_v42 = vpop.xlane.xlu0 %2563 }
0x110c   :  { %2572 = vxpose.xlu2.b32.end [8/8] (short) (narrow) %v2564_v42, 8 }
0x1131   :  { %v2370_v40 = vpop.trf.xlu1 }
0x1132   :  { %v2396_v44 = vperm.slane %v2370_v40, 0 }
0x1134   :  { %v2397_v39 = vmul.f32 %v2396_v44, %v3815_v31  ;;  %v2398_v24 = vmul.f32 %v2396_v44, %v3820_v46 }
0x1136   :  { %v2409_v35 = vadd.f32 %v3812_v50, %v2397_v39  ;;  %v2410_v12 = vadd.f32 %v2407_v21, %v2398_v24 }
0x1138   :  { %v2664_v58 = vmul.f32 -1.442695, %v2409_v35  ;;  %v2665_v37 = vmul.f32 -1.442695, %v2410_v12 }
0x113a   :  { %2773 = vpow2.f32 %v2664_v58 }
0x113b   :  { %2775 = vpow2.f32 %v2665_v37 }
0x1140   :  { %v2774_v28 = vpop.eup %2773 }
0x1141   :  { %v2776_v1 = vpop.eup %2775  ;;  %v2417_v2 = vadd.f32 1.0, %v2774_v28 }
0x1142   :  { %v2418_v23 = vadd.f32 1.0, %v2776_v1 }
0x1143   :  { %2777 = vrcp.f32 %v2417_v2  ;;  %v2430_v50 = vand.u32 2147483648, %v2417_v2  ;;  %v2428_v9 = vand.u32 2147483647, %v2417_v2  ;;  %vm2424_vm12 = vweird.f32 %v2417_v2 }
0x1144   :  { %2779 = vrcp.f32 %v2418_v23  ;;  %v2445_v5 = vand.u32 2147483648, %v2418_v23  ;;  %v2443_v16 = vand.u32 2147483647, %v2418_v23  ;;  %vm2439_vm14 = vweird.f32 %v2418_v23 }
0x1145   :  { %2781 = vrcp.f32 %v2338_v3  ;;  %v2431_v54 = vor.u32 1.1754944e-38, %v2430_v50  ;;  %vm2429_vm15 = vcmp.eq.f32.partialorder %v2428_v9, 8.507059e+37 }
0x1146   :  { %v2446_v45 = vor.u32 1.1754944e-38, %v2445_v5  ;;  %vm2444_vm1 = vcmp.eq.f32.partialorder %v2443_v16, 8.507059e+37 }
0x1149   :  { %v2778_v22 = vpop.eup %2777 }
0x114a   :  { %v2780_v56 = vpop.eup %2779  ;;  %v2420_v31 = vmul.f32 %v2778_v22, %v2417_v2  ;;  %vm2425_vm10 = vweird.f32 %v2778_v22 }
0x114b   :  { %v2435_v4 = vmul.f32 %v2780_v56, %v2418_v23  ;;  %vm2440_vm11 = vweird.f32 %v2780_v56  ;;  %v2782_v59 = vpop.eup %2781  ;;  %vm2426_vm13 = vmor %vm2424_vm12, %vm2425_vm10 }
0x114c   :  { %v2421_v46 = vsub.f32 1.0, %v2420_v31  ;;  %vm2441_vm0 = vmor %vm2439_vm14, %vm2440_vm11  ;;  %v2474_v18 = vmul.f32 %v2782_v59, %v2338_v3  ;;  %vm2479_vm4 = vweird.f32 %v2782_v59 }
0x114d   :  { %v2436_v14 = vsub.f32 1.0, %v2435_v4  ;;  %vm2480_vm5 = vmor %vm2478_vm3, %vm2479_vm4 }
0x114e   :  { %v2422_v25 = vmul.f32 %v2778_v22, %v2421_v46  ;;  %v2475_v60 = vsub.f32 1.0, %v2474_v18 }
0x114f   :  { %v2437_v51 = vmul.f32 %v2780_v56, %v2436_v14 }
0x1150   :  { %v2423_v11 = vadd.f32 %v2778_v22, %v2422_v25  ;;  %v2476_v34 = vmul.f32 %v2782_v59, %v2475_v60 }
0x1151   :  { %v2438_v6 = vadd.f32 %v2780_v56, %v2437_v51 }
0x1152   :  { %v2427_v17 = vsel %vm2426_vm13, %v2778_v22, %v2423_v11  ;;  %v2477_v21 = vadd.f32 %v2782_v59, %v2476_v34 }
0x1153   :  { %v2432_v57 = vsel %vm2429_vm15, %v2431_v54, %v2427_v17  ;;  %v2442_v49 = vsel %vm2441_vm0, %v2780_v56, %v2438_v6 }
0x1154   :  { %v2447_v7 = vsel %vm2444_vm1, %v2446_v45, %v2442_v49  ;;  %v2459_v41 = vmul.f32 %v2452_v0, %v2432_v57  ;;  %v2481_v62 = vsel %vm2480_vm5, %v2782_v59, %v2477_v21 }
0x1155   :  { %v2460_v61 = vmul.f32 %v3843_v43, %v2447_v7  ;;  %v2486_v19 = vsel %vm2483_vm6, %v2485_v47, %v2481_v62 }
0x1156   :  { %v2461_v29 = vsel %vm616_vm2, %v2459_v41, 0.0 }
0x1157   :  { %v2462_v15 = vsel %vm616_vm2, %v2460_v61, 0.0 }
0x1158   :  { %v2463_v20 = vadd.f32 %v2462_v15, %v2461_v29 }
0x115a   :  { %v2464_v55 = vrot.slane %v2463_v20, 4 }
0x115c   :  { %v2465_v52 = vadd.f32 %v2464_v55, %v2463_v20 }
0x115e   :  { %v2466_v63 = vrot.slane %v2465_v52, 2 }
0x1160   :  { %v2467_v33 = vadd.f32 %v2466_v63, %v2465_v52 }
0x1162   :  { %v2468_v13 = vrot.slane %v2467_v33, 1 }
0x1164   :  { %v2469_v43 = vadd.f32 %v2468_v13, %v2467_v33 }
0x1166   :  { %v2470_v53 = vmul.f32 %v2469_v43, %v3218_v27 }
0x1168   :  { %v2488_v42 = vmul.f32 %v2486_v19, %v2470_v53  ;;  %v2471_v40 = vadd.f32 %v2470_v53, %v2017_v36 }
0x116a   :  { %v2490_v44 = vrot.slane %v2488_v42, 7  ;;  %v2472_v39 = vmul.f32 %v2471_v40, %v3218_v27 }
0x116c   :  { %v2492_v24 = vsel %vm648_vm7, %v2470_v53, %v2490_v44  ;;  %v2537_v35 = vadd.f32 %v2472_v39, %v3044_v48 }
0x116d   :  { %2666 = vmatmul.msk.f32.vlgmr.msrb.gmra.mxu0 %vm616_vm2, %v2492_v24  ;;  %v2581_v12 = vpop.trf.xlu2 }
0x116e   :  { %v2597_v58 = vadd.f32 %v2581_v12, %v2537_v35 }
0x1170   :  { %2599 = vst.msk [vmem:[#allocation7] sm:$0x1] %vm2598_vm8, %v2597_v58 }
0x1171   :  { %2621 = dma.vmem_to_hbm [thread:$0]  %s2617_s2, 16, %s2619_s24, [#allocation8]  }
0x11ea   :  { %v2513_v27 = vpop.f32.mrf.mxu0 }
0x11eb   :  { %v2516_v48 = vmul.f32 %v2513_v27, %v3711_v8 }
0x11ed   :  { %v2517_v37 = vadd.f32 %v2516_v48, %v2066_v26 }
0x11ef   :  { %v2518_v28 = vmul.f32 %v2517_v37, %v3142_v30 }
0x11f1   :  { %2519 = vst [vmem:[#allocation5 - $0x1] sm:$0x2] %v2518_v28 }
0x11f2   :  { %2610 = dma.vmem_to_hbm [thread:$0]  %s2606_s10, 16, %s2608_s6, [#allocation6]  }
0x11f3   :  { %2833 = dma.done.wait [#allocation6], 16  }
0x11f4   :  { %2834 = vsyncadd [#allocation6], 4294967280 }
0x11f5   :  { %2835 = dma.done.wait [#allocation8], 16  }
0x11f6   :  { %2836 = vsyncadd [#allocation8], 4294967280 }
0x11f7   :  { %2630 = vsyncpa [#allocation6], 1 }
0x11f8   :  { %2631 = vsyncpa [#allocation8], 1 }
0x11f9   :  { %2632 = vsyncmov [#allocation3] }
0x11fc   :  { %s2633_s15 = vpop.sfrf %2632 }
0x11fd   :  { %p2667_p0 = scmp.ne.s32.totalorder %s2633_s15, 0 }
0x11ff   :  { %2637 = shalt.err (%p2667_p0)  }

</bundles_post_ra>
